<compile_context>
chip_gen: v7x
topology: tpu7x:2x2x1
jax: 0.10.0
libtpu: 0.0.40
codegen_flags: <defaults>
</compile_context>

<pallas_src>
import functools

import jax
import jax.numpy as jnp
from jax.experimental import pallas as pl
from jax.experimental.pallas import tpu as pltpu


DEFAULT_COMPUTE_DTYPE = jnp.bfloat16   # MXU-native on v5e/v6e/v7x; accumulation stays f32.


def _pick_tile(dim, target, align):
    """Largest multiple of `align` that divides `dim` and is <= `target`.

    Falls back to the full dimension (single tile) when no such divisor exists or
    when `dim` already fits in one tile, so grid extents always divide exactly.
    """
    if dim <= target:
        return dim
    best = None
    for cand in range(align, target + 1, align):
        if dim % cand == 0:
            best = cand
    return best if best is not None else dim


# ---------------------------------------------------------------------------
# Row/column-tiled linear: out = x @ w + b
# ---------------------------------------------------------------------------
def _linear_kernel(x_ref, w_ref, b_ref, o_ref, *, compute_dtype):
    x = x_ref[...].astype(compute_dtype)
    w = w_ref[...].astype(compute_dtype)
    acc = jnp.dot(x, w, preferred_element_type=jnp.float32)
    o_ref[...] = (acc + b_ref[...]).astype(o_ref.dtype)


def linear_rowtiled(x2d, w, b, *, tm=512, tn=1024,
                    out_dtype=jnp.float32, compute_dtype=DEFAULT_COMPUTE_DTYPE):
    """x2d: (M, K), w: (K, N), b: (N,) -> (M, N).

    Tiled over rows and output columns; the full-K contraction is done per block so
    the (K, tn) weight block must fit VMEM (tn bounds it for v7x's 64 MiB budget).
    With a single column tile the weight block index is constant -> DMA'd once and
    kept resident across the row tiles.
    """
    M, K = x2d.shape
    N = w.shape[1]
    tm = _pick_tile(M, tm, 8)
    tn = _pick_tile(N, tn, 128)
    grid = (M // tm, N // tn)
    return pl.pallas_call(
        functools.partial(_linear_kernel, compute_dtype=compute_dtype),
        out_shape=jax.ShapeDtypeStruct((M, N), out_dtype),
        grid=grid,
        in_specs=[
            pl.BlockSpec((tm, K), lambda i, j: (i, 0)),
            pl.BlockSpec((K, tn), lambda i, j: (0, j)),
            pl.BlockSpec((1, tn), lambda i, j: (0, j)),
        ],
        out_specs=pl.BlockSpec((tm, tn), lambda i, j: (i, j)),
        compiler_params=pltpu.CompilerParams(
            dimension_semantics=("parallel", "parallel")),
    )(x2d, w, b.reshape(1, N))


# ---------------------------------------------------------------------------
# Flash attention on "heads-in-lane" layout.
#   Inputs are (tile, D) slabs where head h occupies columns [h*dk, (h+1)*dk).
#   Output block is the combined-heads, lane-dense (tq, D) slab.
# ---------------------------------------------------------------------------
def _flash_attn_kernel(q_ref, k_ref, v_ref, o_ref, qs_sc, m_sc, l_sc, acc_sc,
                       *, scale, num_heads, d_k, compute_dtype):
    kv = pl.program_id(2)

    @pl.when(kv == 0)
    def _():
        m_sc[...] = jnp.full(m_sc.shape, -jnp.inf, m_sc.dtype)
        l_sc[...] = jnp.zeros(l_sc.shape, l_sc.dtype)
        acc_sc[...] = jnp.zeros(acc_sc.shape, acc_sc.dtype)
        # Hoist 1/sqrt(d_k) scaling + cast out of the KV loop: the q block is
        # resident across the kv axis, so do this once per q tile.
        qs_sc[...] = (q_ref[...].astype(jnp.float32) * scale).astype(compute_dtype)

    contract_last = (((1,), (1,)), ((), ()))   # q @ k^T without materializing k^T

    for h in range(num_heads):                 # static unroll; all ops below are 2-D
        lo = h * d_k
        q_h = qs_sc[:, lo:lo + d_k]                            # (tq, dk) compute dtype
        k_h = k_ref[:, lo:lo + d_k].astype(compute_dtype)      # (tkv, dk)
        v_h = v_ref[:, lo:lo + d_k].astype(compute_dtype)      # (tkv, dk)

        s = jax.lax.dot_general(q_h, k_h, contract_last,
                                preferred_element_type=jnp.float32)   # (tq, tkv)

        m_prev = m_sc[h]
        m_new = jnp.maximum(m_prev, jnp.max(s, axis=-1, keepdims=True))
        alpha = jnp.exp(m_prev - m_new)
        p = jnp.exp(s - m_new)
        l_sc[h] = alpha * l_sc[h] + jnp.sum(p, axis=-1, keepdims=True)
        acc_sc[h] = alpha * acc_sc[h] + jnp.dot(
            p.astype(compute_dtype), v_h, preferred_element_type=jnp.float32)
        m_sc[h] = m_new

    @pl.when(kv == pl.num_programs(2) - 1)
    def _():
        # Assemble the combined-heads (tq, D) block -> single lane-dense store,
        # and the downstream output projection needs no combine-heads pass.
        outs = []
        for h in range(num_heads):
            inv_l = pl.reciprocal(l_sc[h], approx=True)        # EUP slot, off the VALU path
            outs.append(acc_sc[h] * inv_l)                     # (tq, dk) f32
        o_ref[...] = jnp.concatenate(outs, axis=-1).astype(o_ref.dtype)


def _flash_attention_call(arrays, in_specs, *, B, Sq, Skv, D, num_heads,
                          tq, tkv, compute_dtype, out_dtype):
    d_k = D // num_heads
    scale = 1.0 / (d_k ** 0.5)
    grid = (B, Sq // tq, Skv // tkv)
    out_spec = pl.BlockSpec((pl.Squeezed(), tq, D), lambda b, qi, ki: (b, qi, 0))
    return pl.pallas_call(
        functools.partial(_flash_attn_kernel, scale=scale, num_heads=num_heads,
                          d_k=d_k, compute_dtype=compute_dtype),
        out_shape=jax.ShapeDtypeStruct((B, Sq, D), out_dtype),
        grid=grid,
        in_specs=in_specs,
        out_specs=out_spec,
        scratch_shapes=[
            pltpu.VMEM((tq, D), compute_dtype),                 # scaled/cast q (hoisted)
            pltpu.VMEM((num_heads, tq, 1), jnp.float32),        # running max m
            pltpu.VMEM((num_heads, tq, 1), jnp.float32),        # running sum l
            pltpu.VMEM((num_heads, tq, d_k), jnp.float32),      # output accumulator
        ],
        compiler_params=pltpu.CompilerParams(
            dimension_semantics=("parallel", "parallel", "arbitrary")),
    )(*arrays)


def _kv_spec(block_shape, index_map, kv_buffering):
    if kv_buffering is None:
        return pl.BlockSpec(block_shape, index_map)
    # Deeper K/V buffering hides exposed DMA latency on v5e (~820 GB/s HBM).
    return pl.BlockSpec(block_shape, index_map, pipeline_mode=pl.Buffered(kv_buffering))


def flash_attention_fused_qkv(qkv, num_heads, *, tq=256, tkv=256,
                              compute_dtype=DEFAULT_COMPUTE_DTYPE,
                              out_dtype=DEFAULT_COMPUTE_DTYPE,
                              kv_buffering=None):
    """Self-attention straight from the fused projection output.

    qkv: (B, S, 3*D) laid out [Q | K | V] along the last axis, heads contiguous in
    dk-wide column groups inside each segment.  The Q/K/V segments are selected by
    the last-axis *block* index in the BlockSpecs, so no XLA slicing / split-heads
    transpose pass ever touches HBM.
    Returns (B, S, D) with heads already combined.
    """
    B, S, threeD = qkv.shape
    D = threeD // 3
    assert D % 128 == 0, "d_model must be a multiple of 128 for the fused-QKV path"
    tq = _pick_tile(S, tq, 8)
    tkv = _pick_tile(S, tkv, 8)
    q_spec = pl.BlockSpec((pl.Squeezed(), tq, D), lambda b, qi, ki: (b, qi, 0))
    k_spec = _kv_spec((pl.Squeezed(), tkv, D), lambda b, qi, ki: (b, ki, 1), kv_buffering)
    v_spec = _kv_spec((pl.Squeezed(), tkv, D), lambda b, qi, ki: (b, ki, 2), kv_buffering)
    return _flash_attention_call((qkv, qkv, qkv), [q_spec, k_spec, v_spec],
                                 B=B, Sq=S, Skv=S, D=D, num_heads=num_heads,
                                 tq=tq, tkv=tkv, compute_dtype=compute_dtype,
                                 out_dtype=out_dtype)


def flash_attention(q, k, v, num_heads, *, tq=256, tkv=256,
                    compute_dtype=DEFAULT_COMPUTE_DTYPE,
                    out_dtype=DEFAULT_COMPUTE_DTYPE,
                    kv_buffering=None):
    """Cross-attention path: q (B, Sq, D), k/v (B, Skv, D), heads in dk column groups."""
    B, Sq, D = q.shape
    Skv = k.shape[1]
    tq = _pick_tile(Sq, tq, 8)
    tkv = _pick_tile(Skv, tkv, 8)
    q_spec = pl.BlockSpec((pl.Squeezed(), tq, D), lambda b, qi, ki: (b, qi, 0))
    k_spec = _kv_spec((pl.Squeezed(), tkv, D), lambda b, qi, ki: (b, ki, 0), kv_buffering)
    v_spec = _kv_spec((pl.Squeezed(), tkv, D), lambda b, qi, ki: (b, ki, 0), kv_buffering)
    return _flash_attention_call((q, k, v), [q_spec, k_spec, v_spec],
                                 B=B, Sq=Sq, Skv=Skv, D=D, num_heads=num_heads,
                                 tq=tq, tkv=tkv, compute_dtype=compute_dtype,
                                 out_dtype=out_dtype)


# ---------------------------------------------------------------------------
# Parameter packing (done ONCE, at setup time — not per forward call)
# ---------------------------------------------------------------------------
def prepare_mha_params(params, *, compute_dtype=DEFAULT_COMPUTE_DTYPE):
    wd = compute_dtype
    f32 = jnp.float32
    return {
        # fused (D, 3D) QKV weight / (3D,) bias for the self-attention path
        "w_qkv": jnp.concatenate([params["wq"], params["wk"], params["wv"]],
                                 axis=1).astype(wd),
        "b_qkv": jnp.concatenate([params["bq"], params["bk"], params["bv"]],
                                 axis=0).astype(f32),
        # separate weights for the cross-attention path
        "wq": params["wq"].astype(wd), "bq": params["bq"].astype(f32),
        "wk": params["wk"].astype(wd), "bk": params["bk"].astype(f32),
        "wv": params["wv"].astype(wd), "bv": params["bv"].astype(f32),
        "wo": params["wo"].astype(wd), "bo": params["bo"].astype(f32),
    }


# ---------------------------------------------------------------------------
# Full MultiHeadAttention forward (dropout = identity, mask = None)
# ---------------------------------------------------------------------------
def multi_head_attention(Q, K, V, prepared, num_heads, *,
                         compute_dtype=DEFAULT_COMPUTE_DTYPE,
                         is_self_attention=None):
    B, Sq, D = Q.shape
    assert D % num_heads == 0
    if is_self_attention is None:
        # NOTE: object-identity check; under jit with distinct-but-equal tracers this
        # silently takes the (numerically identical, slower) non-fused path — pass
        # is_self_attention=True explicitly when Q, K, V are known to be the same.
        is_self_attention = (Q is K) and (K is V)

    if is_self_attention:
        # Fused QKV projection: activation read from HBM once, wide (3D) lane-dense
        # output, stored in bf16 for the attention kernel to consume directly.
        qkv = linear_rowtiled(Q.reshape(B * Sq, D), prepared["w_qkv"], prepared["b_qkv"],
                              out_dtype=compute_dtype, compute_dtype=compute_dtype)
        qkv = qkv.reshape(B, Sq, 3 * D)          # free view; no transpose / HBM pass
        attn = flash_attention_fused_qkv(qkv, num_heads,
                                         compute_dtype=compute_dtype,
                                         out_dtype=compute_dtype)
    else:
        Skv = K.shape[1]
        qh = linear_rowtiled(Q.reshape(B * Sq, D), prepared["wq"], prepared["bq"],
                             out_dtype=compute_dtype,
                             compute_dtype=compute_dtype).reshape(B, Sq, D)
        kh = linear_rowtiled(K.reshape(B * Skv, D), prepared["wk"], prepared["bk"],
                             out_dtype=compute_dtype,
                             compute_dtype=compute_dtype).reshape(B, Skv, D)
        vh = linear_rowtiled(V.reshape(B * Skv, D), prepared["wv"], prepared["bv"],
                             out_dtype=compute_dtype,
                             compute_dtype=compute_dtype).reshape(B, Skv, D)
        attn = flash_attention(qh, kh, vh, num_heads,
                               compute_dtype=compute_dtype, out_dtype=compute_dtype)

    # attn is already (B, Sq, D) with heads combined -> plain full-D contraction.
    out = linear_rowtiled(attn.reshape(B * Sq, D), prepared["wo"], prepared["bo"],
                          out_dtype=jnp.float32, compute_dtype=compute_dtype)
    return out.reshape(B, Sq, D)


# pure-JAX f32 reference for sanity checking
def reference_mha(Q, K, V, params, num_heads):
    B, Sq, D = Q.shape
    dk = D // num_heads

    def lin(x, w, b):
        return x @ w + b

    def split(x):
        return x.reshape(x.shape[0], x.shape[1], num_heads, dk).transpose(0, 2, 1, 3)

    q = split(lin(Q, params["wq"], params["bq"]))
    k = split(lin(K, params["wk"], params["bk"]))
    v = split(lin(V, params["wv"], params["bv"]))
    s = jnp.einsum("bhqd,bhkd->bhqk", q, k) / (dk ** 0.5)
    p = jax.nn.softmax(s, axis=-1)
    o = jnp.einsum("bhqk,bhkd->bhqd", p, v)
    o = o.transpose(0, 2, 1, 3).reshape(B, Sq, D)
    return lin(o, params["wo"], params["bo"])


if __name__ == "__main__":
    # d_k = 64; at tq = tkv = 256 this gives 2 q tiles x 2 kv tiles per batch
    # (exercises the online softmax) and even parallel grid extents (v7x 2 TCs).
    B, S, D, H = 2, 512, 256, 4
    key = jax.random.PRNGKey(0)
    ks = jax.random.split(key, 9)

    wscale = 1.0 / (D ** 0.5)
    params = {
        "wq": jax.random.normal(ks[0], (D, D), jnp.float32) * wscale,
        "bq": jax.random.normal(ks[1], (D,), jnp.float32) * 0.01,
        "wk": jax.random.normal(ks[2], (D, D), jnp.float32) * wscale,
        "bk": jax.random.normal(ks[3], (D,), jnp.float32) * 0.01,
        "wv": jax.random.normal(ks[4], (D, D), jnp.float32) * wscale,
        "bv": jax.random.normal(ks[5], (D,), jnp.float32) * 0.01,
        "wo": jax.random.normal(ks[6], (D, D), jnp.float32) * wscale,
        "bo": jax.random.normal(ks[7], (D,), jnp.float32) * 0.01,
    }

    X = jax.random.normal(ks[8], (B, S, D), jnp.float32)

    # One-time parameter packing (concat + bf16 weight casts), outside the forward.
    prepared = prepare_mha_params(params)

    # Self-attention (Q = K = V) exercises the fused QKV + segment-indexed flash path.
    out = multi_head_attention(X, X, X, prepared, H, is_self_attention=True)
    out = jax.block_until_ready(out)

    ref = reference_mha(X, X, X, params, H)
    assert out.shape == (B, S, D)
    max_err = float(jnp.max(jnp.abs(out - ref)))
    assert jnp.allclose(out, ref, atol=2e-2, rtol=2e-2), f"mismatch vs reference: {max_err}"

    print("KERNEL_OK")
</pallas_src>

<mosaic_0001>
module attributes {stable_mosaic.version = 11 : i64} {
  func.func @_linear_kernel(%arg0: i32, %arg1: i32, %arg2: memref<512x256xf32, #tpu.memory_space<vmem>>, %arg3: memref<256x768xbf16, #tpu.memory_space<vmem>>, %arg4: memref<1x768xf32, #tpu.memory_space<vmem>>, %arg5: memref<512x768xbf16, #tpu.memory_space<vmem>>) attributes {dimension_semantics = [#tpu.dimension_semantics<parallel>, #tpu.dimension_semantics<parallel>], iteration_bounds = array<i64: 2, 1>, scalar_prefetch = 0 : i64, scratch_operands = 0 : i64, tpu.core_type = #tpu.core_type<tc>, window_params = [{transform_indices = @transform_0, window_bounds = array<i64: 512, 256>}, {transform_indices = @transform_1, window_bounds = array<i64: 256, 768>}, {transform_indices = @transform_2, window_bounds = array<i64: 1, 768>}, {transform_indices = @transform_3, window_bounds = array<i64: 512, 768>}]} {
    %c0 = arith.constant 0 : index
    %c0_0 = arith.constant 0 : index
    %0 = vector.load %arg2[%c0, %c0_0] : memref<512x256xf32, #tpu.memory_space<vmem>>, vector<512x256xf32>
    %1 = arith.truncf %0 : vector<512x256xf32> to vector<512x256xbf16>
    %c0_1 = arith.constant 0 : index
    %c0_2 = arith.constant 0 : index
    %2 = vector.load %arg3[%c0_1, %c0_2] : memref<256x768xbf16, #tpu.memory_space<vmem>>, vector<256x768xbf16>
    %cst = arith.constant dense<0.000000e+00> : vector<512x768xf32>
    %3 = tpu.matmul %1, %2, %cst {dimension_numbers = #tpu.dot_dimension_numbers<[1], [0], [0], [1], [0, 0, 1, 1], [], []>} : vector<512x256xbf16>, vector<256x768xbf16>, vector<512x768xf32> -> vector<512x768xf32>
    %c0_3 = arith.constant 0 : index
    %c0_4 = arith.constant 0 : index
    %4 = vector.load %arg4[%c0_3, %c0_4] : memref<1x768xf32, #tpu.memory_space<vmem>>, vector<1x768xf32>
    %5 = vector.broadcast %4 : vector<1x768xf32> to vector<512x768xf32>
    %6 = arith.addf %3, %5 : vector<512x768xf32>
    %7 = arith.truncf %6 : vector<512x768xf32> to vector<512x768xbf16>
    %c0_5 = arith.constant 0 : index
    %c0_6 = arith.constant 0 : index
    %8 = vector.load %arg5[%c0_5, %c0_6] : memref<512x768xbf16, #tpu.memory_space<vmem>>, vector<512x768xbf16>
    tpu.vector_store %arg5[%c0_5, %c0_6], %7 {strides = array<i32>} : memref<512x768xbf16, #tpu.memory_space<vmem>>, vector<512x768xbf16>,
    return
  }
  func.func @transform_0(%arg0: i32, %arg1: i32) -> (i32, i32) {
    %c0_i32 = arith.constant 0 : i32
    %c0_i32_0 = arith.constant 0 : i32
    return %arg0, %c0_i32 : i32, i32
  }
  func.func @transform_1(%arg0: i32, %arg1: i32) -> (i32, i32) {
    %c0_i32 = arith.constant 0 : i32
    %c0_i32_0 = arith.constant 0 : i32
    return %c0_i32, %arg1 : i32, i32
  }
  func.func @transform_2(%arg0: i32, %arg1: i32) -> (i32, i32) {
    %c0_i32 = arith.constant 0 : i32
    %c0_i32_0 = arith.constant 0 : i32
    return %c0_i32, %arg1 : i32, i32
  }
  func.func @transform_3(%arg0: i32, %arg1: i32) -> (i32, i32) {
    %c0_i32 = arith.constant 0 : i32
    return %arg0, %arg1 : i32, i32
  }
}

</mosaic_0001>

<bundles_post_ra>
// kernel: tpu_custom_call.1
= control target key start
LH: loop header
LB: loop body
LE: loop exit
PB: predicated region body
PF: predicated region fallthrough
CT: control target
= control target key end

     0   :  { %8 = vsyncpa [#allocation3], 0  ;;  %s5864_s0 = inlined_call_operand.hbm [shape: f32[1024,256], index: 0, kind: input, shape index: {}]   ;;  %s5865_s1 = inlined_call_operand.hbm [shape: bf16[256,768], index: 1, kind: input, shape index: {}]   ;;  %s5866_s2 = inlined_call_operand.hbm [shape: f32[1,768], index: 2, kind: input, shape index: {}]   ;;  %s5867_s3 = inlined_call_operand.hbm [shape: bf16[1024,768], index: 3, kind: output, shape index: {}]  }
   0x1   :  { %10 = vsyncpa [#allocation3 + $0x1], 0 }
   0x2   :  { %11 = vsyncpa [#allocation6], 0 }
   0x3   :  { %12 = vsyncpa [#allocation4], 0 }
   0x4   :  { %14 = vsyncpa [#allocation4 + $0x1], 0  ;;  %s4551_s12 = smov 0   ;;  %s4553_s13 = smov 0  }
   0x5   :  { %s4555_s14 = smov 0   ;;  %s4557_s15 = smov 0  }
   0x6   :  { %s4559_s16 = smov 0   ;;  %s4561_s17 = smov 0  }
   0x7 LB: > { %s3579_s18 = sadd.s32 4294967295, %s4519_s17   ;;  %s3580_s19 = sadd.s32 4294967294, %s4519_s17   ;;  %s4519_s17 = sphi %s4561_s17, %s20_s17   ;;  %s4515_s16 = sphi %s4559_s16, %s5929_s16   ;;  %s4511_s15 = sphi %s4557_s15, %s5928_s15   ;;  %s4507_s14 = sphi %s4555_s14, %s5927_s14   ;;  %s4503_s13 = sphi %s4553_s13, %s5926_s13   ;;  %s4499_s12 = sphi %s4551_s12, %s5925_s12  }
   0x8   : > { %p52_p0 = scmp.ne.s32.totalorder %s4503_s13, %s4499_s12  ;;  %p4585_p1 = scmp.eq.s32.totalorder %s3579_s18, 0 }
   0x9   : > { %p4589_p2 = scmp.eq.s32.totalorder %s3579_s18, 1  ;;  %p136_p3 = scmp.eq.s32.totalorder %s3580_s19, 1 }
   0xa   : > { %s5892_s20 = scalar_select %p4585_p1, 1, 0 }
   0xb   : > { %p4595_p4 = por %p4585_p1, %p52_p0  ;;  %p3581_p5 = scmp.ge.s32.totalorder %s4519_s17, 1 }
   0xc   : > { %p4600_p6 = por %p136_p3, %p52_p0  ;;  %p143_p7 = scmp.lt.s32.totalorder %s4519_s17, 3 }
   0xd   : > { %s5894_s22 = scalar_select %p4595_p4, 1, 0 }
   0xe   : > { %s5895_s23 = scalar_select %p4600_p6, 1, 0 }
   0xf   : > { %p4605_p8 = pnand %p3581_p5, %p143_p7  ;;  %s4521_s25 = smov [#allocation5]  }
  0x10   : > { %s158_s26 = sshll.u32 %s4521_s25, 4  ;;  %s4522_s28 = smov [#allocation7]   ;;  %s4609_s26 = int_to_ptr.vmem [resolvable:$true] %s158_s26 }
  0x11   : > { %p4126_p9 = pneg %p4605_p8  ;;  %s175_s29 = sshll.u32 %s4522_s28, 4  ;;  %s4620_s29 = int_to_ptr.vmem [resolvable:$true] %s175_s29 }
  0x12   : > { %s4347_s5 = scalar_lea.hbm %s5865_s1, 12288 }
  0x13   : > { %p4616_p11 = pnand %p4126_p9, %p4585_p1  ;;  %p4348_p12 = scmp.ne.s32.totalorder %s5865_s1, %s4347_s5 }
  0x14   : > { %p4354_p5 = scmp.lt.u32.totalorder %s4347_s5, %s5865_s1 }
  0x15   : > { %p4349_p13 = pneg %p4616_p11 }
  0x17   : > { %p4350_p0 = pnand %p4349_p13, %p4348_p12 }
  0x19   : > { %p4351_p3 = pneg %p4350_p0 }
  0x1b   : > { %p4356_p7 = pnand %p4354_p5, %p4351_p3 }
  0x1d   : > { %4359 = shalt.err (!%p4356_p7)
}
  0x1e   : > { %s4360_s10 = scalar_lea.vmem %s4609_s26, 12288  ;;  %p4368_p1 = scmp.lt.s32.totalorder %s4609_s26, %s4609_s26 }
  0x1f   : > { %p4361_p9 = scmp.ne.s32.totalorder %s4609_s26, %s4360_s10  ;;  %p4369_p12 = scmp.lt.s32.totalorder %s4360_s10, %s4360_s10 }
  0x21   : > { %p4363_p10 = pnand %p4361_p9, %p4349_p13  ;;  %p4370_p0 = por %p4369_p12, %p4368_p1 }
  0x23   : > { %p4364_p6 = pneg %p4363_p10 }
  0x25   : > { %p4371_p4 = pnand %p4370_p0, %p4364_p6 }
  0x27   : > { %4374 = shalt.err (!%p4371_p4)
}
  0x28   : > { %s4523_s11 = smov 384   ;;  %s4524_s18 = smov 24  }
  0x29   : > { %4129 = dma.hbm_to_vmem [thread:$0]  (!%p4616_p11), %s5865_s1, 12288, %s4609_s26, [#allocation6], %s4523_s11, %s4523_s11, %s4524_s18  }
  0x2a   : > { %s4375_s4 = scalar_lea.hbm %s5866_s2, 96 }
  0x2b   : > { %p4376_p1 = scmp.ne.s32.totalorder %s5866_s2, %s4375_s4  ;;  %p4382_p10 = scmp.lt.u32.totalorder %s4375_s4, %s5866_s2 }
  0x2d   : > { %p4378_p4 = pnand %p4376_p1, %p4349_p13 }
  0x2f   : > { %p4379_p6 = pneg %p4378_p4 }
  0x31   : > { %p4384_p3 = pnand %p4382_p10, %p4379_p6 }
  0x33   : > { %4387 = shalt.err (!%p4384_p3)
}
  0x34   : > { %s4388_s26 = scalar_lea.vmem %s4620_s29, 96  ;;  %p4396_p12 = scmp.lt.s32.totalorder %s4620_s29, %s4620_s29 }
  0x35   : > { %p4389_p5 = scmp.ne.s32.totalorder %s4620_s29, %s4388_s26  ;;  %p4397_p0 = scmp.lt.s32.totalorder %s4388_s26, %s4388_s26 }
  0x37   : > { %p4391_p7 = pnand %p4389_p5, %p4349_p13  ;;  %p4398_p1 = por %p4397_p0, %p4396_p12 }
  0x39   : > { %p4392_p9 = pneg %p4391_p7 }
  0x3b   : > { %p4399_p4 = pnand %p4398_p1, %p4392_p9 }
  0x3d   : > { %4402 = shalt.err (!%p4399_p4)
}
  0x3e   : > { %4132 = dma.hbm_to_vmem [thread:$0]  (!%p4616_p11), %s5866_s2, 96, %s4620_s29, [#allocation6]  }
  0x3f   : > { %s32_s11 = sadd.s32 1, %s4515_s16  ;;  %s39_s18 = sadd.s32 1, %s4507_s14 }
  0x40   : > { %p34_p13 = scmp.ge.s32.totalorder %s32_s11, 2  ;;  %p46_p6 = scmp.ne.s32.totalorder %s4507_s14, %s4503_s13 }
  0x41   : > { %p47_p10 = scmp.eq.s32.totalorder %s4519_s17, 0  ;;  %p4143_p3 = scmp.lt.s32.totalorder %s4519_s17, 2 }
  0x42   : > { %s5931_s11 = smov (%p34_p13, %s32_s11), 0  ;;  %p4684_p7 = por %p4589_p2, %p46_p6 }
  0x43   : > { %p48_p5 = por %p47_p10, %p46_p6  ;;  %s36_s19 = ssub.s32 %s4515_s16, %s5931_s11 }
  0x44   : > { %s5898_s27 = scalar_select %p4684_p7, 1, 0 }
  0x45   : > { %s186_s25 = sand.u32 1, %s4507_s14   ;;  %p37_p9 = scmp.eq.s32.totalorder %s36_s19, 0 }
  0x46   : > { %s3585_s29 = sshll.u32 %s186_s25, 10  ;;  %s3887_s28 = sshll.u32 %s4515_s16, 14 }
  0x47   : > { %s4693_s30 = scalar_select %p37_p9, %s4507_s14, %s39_s18  }
  0x48   : > { %s4698_s6 = scalar_lea.hbm %s5864_s0, %s3887_s28  ;;  %s190_s21 = scalar_lea.vmem [#allocation2], %s3585_s29 }
  0x49   : > { %s198_s7 = sshll.u32 %s190_s21, 4  ;;  %p4702_p2 = pnand %p4143_p3, %p48_p5  ;;  %s4706_s7 = int_to_ptr.vmem [resolvable:$true] %s198_s7 }
  0x4a   : > { %s4708_s26 = scalar_lea.sflag [#allocation3], %s186_s25  ;;  %s4403_s9 = scalar_lea.hbm %s4698_s6, 16384 }
  0x4b   : > { %p4404_p11 = scmp.ne.s32.totalorder %s4698_s6, %s4403_s9  ;;  %p4405_p12 = pneg %p4702_p2 }
  0x4c   : > { %s4408_s19 = scalar_lea.hbm %s5864_s0, 32768  ;;  %p4409_p4 = scmp.lt.u32.totalorder %s4698_s6, %s5864_s0 }
  0x4d   : > { %p4406_p0 = pnand %p4405_p12, %p4404_p11  ;;  %p4410_p13 = scmp.lt.u32.totalorder %s4408_s19, %s4403_s9 }
  0x4e   : > { %p4412_p10 = scmp.lt.u32.totalorder %s4403_s9, %s4698_s6 }
  0x4f   : > { %p4407_p1 = pneg %p4406_p0  ;;  %p4411_p6 = por %p4410_p13, %p4409_p4 }
  0x51   : > { %p4413_p3 = por %p4412_p10, %p4411_p6 }
  0x53   : > { %p4414_p5 = pnand %p4413_p3, %p4407_p1 }
  0x55   : > { %4417 = shalt.err (!%p4414_p5)
}
  0x56   : > { %s4418_s25 = scalar_lea.vmem %s4706_s7, 16384  ;;  %s4525_s4 = smov [#allocation2]  }
  0x57   : > { %p4419_p9 = scmp.ne.s32.totalorder %s4706_s7, %s4418_s25  ;;  %s4423_s5 = sshll.u32 %s4525_s4, 4  ;;  %s4424_s5 = int_to_ptr.vmem [resolvable:$false] %s4423_s5 }
  0x58   : > { %s4425_s21 = scalar_lea.vmem %s4424_s5, 32768  ;;  %p4426_p7 = scmp.lt.s32.totalorder %s4706_s7, %s4424_s5 }
  0x59   : > { %p4421_p11 = pnand %p4419_p9, %p4405_p12  ;;  %p4427_p4 = scmp.lt.s32.totalorder %s4425_s21, %s4418_s25 }
  0x5b   : > { %p4422_p0 = pneg %p4421_p11  ;;  %p4428_p13 = por %p4427_p4, %p4426_p7 }
  0x5d   : > { %p4429_p6 = pnand %p4428_p13, %p4422_p0 }
  0x5f   : > { %4432 = shalt.err (!%p4429_p6)
}
  0x60   : > { %s4526_s9 = smov 256   ;;  %s4527_s10 = smov 16  }
  0x61   : > { %4136 = dma.hbm_to_vmem [thread:$0]  (!%p4702_p2), %s4698_s6, 16384, %s4706_s7, %s4708_s26, %s4526_s9, %s4526_s9, %s4527_s10  }
  0x62   : > { %210 = sbr.rel (%p4605_p8) target bundleno = 787 (0x313), region = 32 }
  0x69   : > { %s4739_s18 = sand.u32 1, %s4503_s13   ;;  %p5900_p7 = scmp.ne.s32.totalorder %s5894_s22, 0 }
  0x6a   : > { %s3590_s19 = sshll.u32 %s4739_s18, 10  ;;  %s213_s29 = scalar_lea.sflag [#allocation3], %s4739_s18 }
  0x6b   : > { %s4743_s28 = scalar_lea.vmem [#allocation2], %s3590_s19 }
  0x6c   : > { %4486 = dma.done.wait (%p5900_p7), %s213_s29, 16384  }
  0x6d   : > { %4488 = vsyncadd (%p5900_p7), %s213_s29, 4294950912  ;;  %p5901_p2 = scmp.ne.s32.totalorder %s5892_s20, 0 }
  0x6f   : > { %4490 = dma.done.wait (%p5901_p2), [#allocation6], 12384  }
  0x70   : > { %4492 = vsyncadd (%p5901_p2), [#allocation6], 4294954912  ;;  %v4203_v0 = vld [vmem:[#allocation5 + $0x4] ss:$24 sps:$4 sm:$0xff]   ;;  %v4205_v1 = vld [vmem:[#allocation5] ss:$24 sps:$4 sm:$0xff]  }
  0x71   : > { %1052 = vmatprep.subr.bf16.mxu0 %v4203_v0  ;;  %4080 = vmatprep.subr.bf16.mxu1 %v4203_v0  ;;  %v4206_v2 = vld [vmem:[#allocation5 + $0x34] ss:$24 sps:$4 sm:$0xff]   ;;  %v4208_v3 = vld [vmem:[#allocation5 + $0x30] ss:$24 sps:$4 sm:$0xff]   ;;  %v4209_v4 = vld [vmem:[#allocation5 + $0x64] ss:$24 sps:$4 sm:$0xff]  }
  0x72   : > { %1053 = vmatpush1.bf16.msra.mxu0 %v4205_v1  ;;  %4096 = vmatpush1.bf16.msra.mxu1 %v4205_v1  ;;  %v4211_v5 = vld [vmem:[#allocation5 + $0x60] ss:$24 sps:$4 sm:$0xff]   ;;  %v4212_v6 = vld [vmem:[#allocation5 + $0x94] ss:$24 sps:$4 sm:$0xff]   ;;  %v4214_v7 = vld [vmem:[#allocation5 + $0x90] ss:$24 sps:$4 sm:$0xff]  }
  0x73   : > { %1054 = vmatprep.subr.bf16.mxu0 %v4206_v2  ;;  %4081 = vmatprep.subr.bf16.mxu1 %v4206_v2  ;;  %v4215_v8 = vld [vmem:[#allocation5 + $0xc4] ss:$24 sps:$4 sm:$0xff]   ;;  %v4217_v9 = vld [vmem:[#allocation5 + $0xc0] ss:$24 sps:$4 sm:$0xff]   ;;  %v4218_v10 = vld [vmem:[#allocation5 + $0xf4] ss:$24 sps:$4 sm:$0xff]  }
  0x74   : > { %v4220_v11 = vld [vmem:[#allocation5 + $0xf0] ss:$24 sps:$4 sm:$0xff]   ;;  %v4221_v12 = vld [vmem:[#allocation5 + $0x124] ss:$24 sps:$4 sm:$0xff]   ;;  %v4223_v18 = vld [vmem:[#allocation5 + $0x120] ss:$24 sps:$4 sm:$0xff]  }
  0x75   : > { %v253_v13 = vld [vmem:[%s4743_s28 + $0x8] sm:$0xff]  ;;  %v255_v14 = vld [vmem:[%s4743_s28 + $0x18] sm:$0xff]  ;;  %v252_v38 = vld [vmem:[%s4743_s28] sm:$0xff]  ;;  %s4112_s20 = smul.u32 1536, %s4739_s18  ;;  %s3456_s26 = scalar_lea.sflag [#allocation4], %s4739_s18 }
  0x76   : > { %1055 = vmatpush1.bf16.msra.mxu0 %v4208_v3  ;;  %4097 = vmatpush1.bf16.msra.mxu1 %v4208_v3  ;;  %v4755_v15 = vpack.c.bf16 %v255_v14, %v253_v13  ;;  %v317_v16 = vld [vmem:[%s4743_s28 + $0x208] sm:$0xff]  ;;  %v319_v17 = vld [vmem:[%s4743_s28 + $0x218] sm:$0xff]  ;;  %v254_v39 = vld [vmem:[%s4743_s28 + $0x10] sm:$0xff]  ;;  %s4113_s24 = smul.u32 24576, %s4511_s15  ;;  %p5922_p12 = scmp.ne.s32.totalorder %s5898_s27, 0 }
  0x77   : > { %1056 = vmatprep.subr.bf16.mxu0 %v4209_v4  ;;  %4082 = vmatprep.subr.bf16.mxu1 %v4209_v4  ;;  %v4759_v19 = vpack.c.bf16 %v319_v17, %v317_v16  ;;  %v4224_v20 = vld [vmem:[#allocation5 + $0x154] ss:$24 sps:$4 sm:$0xff]   ;;  %v4226_v21 = vld [vmem:[#allocation5 + $0x150] ss:$24 sps:$4 sm:$0xff]   ;;  %v4227_v22 = vld [vmem:[#allocation5 + $0x184] ss:$24 sps:$4 sm:$0xff]   ;;  %v4771_v48 = vpack.c.bf16 %v254_v39, %v252_v38 }
  0x78   : > { %1084 = vmatprep.mubr.bf16.mxu0 %v4755_v15  ;;  %v4229_v23 = vld [vmem:[#allocation5 + $0x180] ss:$24 sps:$4 sm:$0xff]   ;;  %v4230_v24 = vld [vmem:[#allocation5 + $0x1b4] ss:$24 sps:$4 sm:$0xff]   ;;  %v4232_v25 = vld [vmem:[#allocation5 + $0x1b0] ss:$24 sps:$4 sm:$0xff]   ;;  %s5809_s8 = scalar_lea.hbm %s5867_s3, %s4113_s24 }
  0x79   : > { %1244 = vmatprep.mubr.bf16.mxu1 %v4759_v19  ;;  %v4233_v26 = vld [vmem:[#allocation5 + $0x1e4] ss:$24 sps:$4 sm:$0xff]   ;;  %v4235_v27 = vld [vmem:[#allocation5 + $0x1e0] ss:$24 sps:$4 sm:$0xff]   ;;  %v4236_v28 = vld [vmem:[#allocation5 + $0x214] ss:$24 sps:$4 sm:$0xff]  }
  0x7a   : > { %1057 = vmatpush1.bf16.msra.mxu0 %v4211_v5  ;;  %4098 = vmatpush1.bf16.msra.mxu1 %v4211_v5  ;;  %v4238_v29 = vld [vmem:[#allocation5 + $0x210] ss:$24 sps:$4 sm:$0xff]   ;;  %v4239_v30 = vld [vmem:[#allocation5 + $0x244] ss:$24 sps:$4 sm:$0xff]   ;;  %v4241_v31 = vld [vmem:[#allocation5 + $0x240] ss:$24 sps:$4 sm:$0xff]  }
  0x7b   : > { %1058 = vmatprep.subr.bf16.mxu0 %v4212_v6  ;;  %4083 = vmatprep.subr.bf16.mxu1 %v4212_v6  ;;  %v4242_v32 = vld [vmem:[#allocation5 + $0x274] ss:$24 sps:$4 sm:$0xff]   ;;  %v4244_v33 = vld [vmem:[#allocation5 + $0x270] ss:$24 sps:$4 sm:$0xff]   ;;  %v4245_v34 = vld [vmem:[#allocation5 + $0x2a4] ss:$24 sps:$4 sm:$0xff]  }
  0x7c   : > { %v4247_v35 = vld [vmem:[#allocation5 + $0x2a0] ss:$24 sps:$4 sm:$0xff]   ;;  %v4248_v36 = vld [vmem:[#allocation5 + $0x2d4] ss:$24 sps:$4 sm:$0xff]   ;;  %v4250_v37 = vld [vmem:[#allocation5 + $0x2d0] ss:$24 sps:$4 sm:$0xff]  }
  0x7d   : > { %v316_v40 = vld [vmem:[%s4743_s28 + $0x200] sm:$0xff]  ;;  %v318_v41 = vld [vmem:[%s4743_s28 + $0x210] sm:$0xff]  ;;  %v257_v44 = vld [vmem:[%s4743_s28 + $0x28] sm:$0xff]  ;;  %s5142_s22 = scalar_lea.vmem [#allocation8], %s4112_s20  ;;  %s4528_s4 = smov [#allocation8]  }
  0x7e   : > { %1059 = vmatpush1.bf16.msra.mxu0 %v4214_v7  ;;  %4099 = vmatpush1.bf16.msra.mxu1 %v4214_v7  ;;  %v4253_v42 = vld [vmem:[#allocation5 + $0xc] ss:$24 sps:$4 sm:$0xff]   ;;  %v259_v45 = vld [vmem:[%s4743_s28 + $0x38] sm:$0xff]  ;;  %v4773_v49 = vpack.c.bf16 %v318_v41, %v316_v40  ;;  %v4251_v50 = vld [vmem:[#allocation5 + $0x8] ss:$24 sps:$4 sm:$0xff]   ;;  %s3472_s6 = sshll.u32 %s5142_s22, 4  ;;  %s5811_s6 = int_to_ptr.vmem [resolvable:$true] %s3472_s6 }
  0x7f   : > { %1060 = vmatprep.subr.bf16.mxu0 %v4215_v8  ;;  %4084 = vmatprep.subr.bf16.mxu1 %v4215_v8  ;;  %v4256_v43 = vld [vmem:[#allocation5 + $0x14] ss:$24 sps:$4 sm:$0xff]   ;;  %v323_v47 = vld [vmem:[%s4743_s28 + $0x238] sm:$0xff]  ;;  %v4254_v51 = vld [vmem:[#allocation5 + $0x10] ss:$24 sps:$4 sm:$0xff]   ;;  %v4775_v52 = vpack.c.bf16 %v259_v45, %v257_v44  ;;  %s4433_s25 = scalar_lea.vmem %s5811_s6, 24576 }
  0x80   : > { %v321_v46 = vld [vmem:[%s4743_s28 + $0x228] sm:$0xff]  ;;  %v256_v54 = vld [vmem:[%s4743_s28 + $0x20] sm:$0xff]  ;;  %v258_v55 = vld [vmem:[%s4743_s28 + $0x30] sm:$0xff]  ;;  %p4434_p8 = scmp.ne.s32.totalorder %s5811_s6, %s4433_s25  ;;  %s4437_s5 = sshll.u32 %s4528_s4, 4  ;;  %s4438_s5 = int_to_ptr.vmem [resolvable:$false] %s4437_s5 }
  0x81   : > { %v4777_v53 = vpack.c.bf16 %v323_v47, %v321_v46  ;;  %v320_v56 = vld [vmem:[%s4743_s28 + $0x220] sm:$0xff]  ;;  %v322_v57 = vld [vmem:[%s4743_s28 + $0x230] sm:$0xff]  ;;  %v261_v62 = vld [vmem:[%s4743_s28 + $0x48] sm:$0xff]  ;;  %v4791_v4 = vpack.c.bf16 %v258_v55, %v256_v54  ;;  %s4439_s21 = scalar_lea.vmem %s4438_s5, 49152  ;;  %p4440_p3 = scmp.lt.s32.totalorder %s5811_s6, %s4438_s5 }
  0x82   : > { %1061 = vmatpush1.bf16.msra.mxu0 %v4217_v9  ;;  %4100 = vmatpush1.bf16.msra.mxu1 %v4217_v9  ;;  %v4257_v58 = vld [vmem:[#allocation5 + $0x38] ss:$24 sps:$4 sm:$0xff]   ;;  %v4259_v59 = vld [vmem:[#allocation5 + $0x3c] ss:$24 sps:$4 sm:$0xff]   ;;  %v325_v0 = vld [vmem:[%s4743_s28 + $0x248] sm:$0xff]  ;;  %v4793_v5 = vpack.c.bf16 %v322_v57, %v320_v56  ;;  %p4435_p1 = pnand %p4434_p8, %p5922_p12  ;;  %p4441_p5 = scmp.lt.s32.totalorder %s4439_s21, %s4433_s25 }
  0x83   : > { %1062 = vmatprep.subr.bf16.mxu0 %v4218_v10  ;;  %4085 = vmatprep.subr.bf16.mxu1 %v4218_v10  ;;  %v4260_v60 = vld [vmem:[#allocation5 + $0x40] ss:$24 sps:$4 sm:$0xff]   ;;  %v4262_v61 = vld [vmem:[#allocation5 + $0x44] ss:$24 sps:$4 sm:$0xff]   ;;  %v4268_v3 = vld [vmem:[#allocation5 + $0x74] ss:$24 sps:$4 sm:$0xff]  }
  0x84   : > { %v263_v63 = vld [vmem:[%s4743_s28 + $0x58] sm:$0xff]  ;;  %v4265_v2 = vld [vmem:[#allocation5 + $0x6c] ss:$24 sps:$4 sm:$0xff]   ;;  %v4263_v8 = vld [vmem:[#allocation5 + $0x68] ss:$24 sps:$4 sm:$0xff]   ;;  %p4436_p10 = pneg %p4435_p1  ;;  %p4442_p9 = por %p4441_p5, %p4440_p3 }
  0x85   : > { %v327_v1 = vld [vmem:[%s4743_s28 + $0x258] sm:$0xff]  ;;  %v4795_v6 = vpack.c.bf16 %v263_v63, %v261_v62  ;;  %v4266_v9 = vld [vmem:[#allocation5 + $0x70] ss:$24 sps:$4 sm:$0xff]   ;;  %v324_v14 = vld [vmem:[%s4743_s28 + $0x240] sm:$0xff] }
  0x86   : > { %1063 = vmatpush1.bf16.msra.mxu0 %v4220_v11  ;;  %4101 = vmatpush1.bf16.msra.mxu1 %v4220_v11  ;;  %v4797_v7 = vpack.c.bf16 %v327_v1, %v325_v0  ;;  %v4271_v10 = vld [vmem:[#allocation5 + $0x9c] ss:$24 sps:$4 sm:$0xff]   ;;  %v260_v11 = vld [vmem:[%s4743_s28 + $0x40] sm:$0xff]  ;;  %v265_v17 = vld [vmem:[%s4743_s28 + $0x68] sm:$0xff]  ;;  %p4443_p11 = pnand %p4442_p9, %p4436_p10 }
  0x87   : > { %1064 = vmatprep.subr.bf16.mxu0 %v4221_v12  ;;  %4086 = vmatprep.subr.bf16.mxu1 %v4221_v12  ;;  %v262_v12 = vld [vmem:[%s4743_s28 + $0x50] sm:$0xff]  ;;  %v4274_v13 = vld [vmem:[#allocation5 + $0xa4] ss:$24 sps:$4 sm:$0xff]   ;;  %v269_v38 = vld [vmem:[%s4743_s28 + $0x88] sm:$0xff] }
  0x88   : > { %v326_v16 = vld [vmem:[%s4743_s28 + $0x250] sm:$0xff]  ;;  %v271_v39 = vld [vmem:[%s4743_s28 + $0x98] sm:$0xff]  ;;  %v333_v40 = vld [vmem:[%s4743_s28 + $0x288] sm:$0xff] }
  0x89   : > { %v335_v41 = vld [vmem:[%s4743_s28 + $0x298] sm:$0xff]  ;;  %v4289_v44 = vld [vmem:[#allocation5 + $0x12c] ss:$24 sps:$4 sm:$0xff]   ;;  %v4287_v54 = vld [vmem:[#allocation5 + $0x128] ss:$24 sps:$4 sm:$0xff]  }
  0x8a   : > { %1065 = vmatpush1.bf16.msra.mxu0 %v4223_v18  ;;  %4102 = vmatpush1.bf16.msra.mxu1 %v4223_v18  ;;  %v267_v18 = vld [vmem:[%s4743_s28 + $0x78] sm:$0xff]  ;;  %v4292_v45 = vld [vmem:[#allocation5 + $0x134] ss:$24 sps:$4 sm:$0xff]   ;;  %v4290_v55 = vld [vmem:[#allocation5 + $0x130] ss:$24 sps:$4 sm:$0xff]  }
  0x8b   : > { %1066 = vmatprep.subr.bf16.mxu0 %v4224_v20  ;;  %4087 = vmatprep.subr.bf16.mxu1 %v4224_v20  ;;  %v329_v20 = vld [vmem:[%s4743_s28 + $0x268] sm:$0xff]  ;;  %v4295_v56 = vld [vmem:[#allocation5 + $0x15c] ss:$24 sps:$4 sm:$0xff]   ;;  %v268_v57 = vld [vmem:[%s4743_s28 + $0x80] sm:$0xff] }
  0x8c   : > { %v273_v62 = vld [vmem:[%s4743_s28 + $0xa8] sm:$0xff]  ;;  %v275_v63 = vld [vmem:[%s4743_s28 + $0xb8] sm:$0xff] }
  0x8d   : > { %v337_v0 = vld [vmem:[%s4743_s28 + $0x2a8] sm:$0xff]  ;;  %v339_v1 = vld [vmem:[%s4743_s28 + $0x2b8] sm:$0xff] }
  0x8e   : > { %1067 = vmatpush1.bf16.msra.mxu0 %v4226_v21  ;;  %4103 = vmatpush1.bf16.msra.mxu1 %v4226_v21  ;;  %v331_v21 = vld [vmem:[%s4743_s28 + $0x278] sm:$0xff] }
  0x8f   : > { %1068 = vmatprep.subr.bf16.mxu0 %v4227_v22  ;;  %4088 = vmatprep.subr.bf16.mxu1 %v4227_v22  ;;  %v4269_v22 = vld [vmem:[#allocation5 + $0x98] ss:$24 sps:$4 sm:$0xff]  }
  0x92   : > { %1069 = vmatpush1.bf16.msra.mxu0 %v4229_v23  ;;  %4104 = vmatpush1.bf16.msra.mxu1 %v4229_v23  ;;  %v4272_v23 = vld [vmem:[#allocation5 + $0xa0] ss:$24 sps:$4 sm:$0xff]  }
  0x93   : > { %1070 = vmatprep.subr.bf16.mxu0 %v4230_v24  ;;  %4089 = vmatprep.subr.bf16.mxu1 %v4230_v24  ;;  %v4277_v24 = vld [vmem:[#allocation5 + $0xcc] ss:$24 sps:$4 sm:$0xff]  }
  0x96   : > { %1071 = vmatpush1.bf16.msra.mxu0 %v4232_v25  ;;  %4105 = vmatpush1.bf16.msra.mxu1 %v4232_v25  ;;  %v4280_v25 = vld [vmem:[#allocation5 + $0xd4] ss:$24 sps:$4 sm:$0xff]  }
  0x97   : > { %1072 = vmatprep.subr.bf16.mxu0 %v4233_v26  ;;  %4090 = vmatprep.subr.bf16.mxu1 %v4233_v26  ;;  %v4811_v26 = vpack.c.bf16 %v262_v12, %v260_v11  ;;  %v4855_v12 = vpack.c.bf16 %v275_v63, %v273_v62  ;;  %v4325_v62 = vld [vmem:[#allocation5 + $0x24c] ss:$24 sps:$4 sm:$0xff]  }
  0x98   : > { %v4328_v63 = vld [vmem:[#allocation5 + $0x254] ss:$24 sps:$4 sm:$0xff]  }
  0x9a   : > { %1073 = vmatpush1.bf16.msra.mxu0 %v4235_v27  ;;  %4106 = vmatpush1.bf16.msra.mxu1 %v4235_v27  ;;  %v4813_v27 = vpack.c.bf16 %v326_v16, %v324_v14  ;;  %v4299_v14 = vld [vmem:[#allocation5 + $0x188] ss:$24 sps:$4 sm:$0xff]  }
  0x9b   : > { %1074 = vmatprep.subr.bf16.mxu0 %v4236_v28  ;;  %4091 = vmatprep.subr.bf16.mxu1 %v4236_v28  ;;  %v4815_v28 = vpack.c.bf16 %v267_v18, %v265_v17  ;;  %v4302_v16 = vld [vmem:[#allocation5 + $0x190] ss:$24 sps:$4 sm:$0xff]   ;;  %v272_v17 = vld [vmem:[%s4743_s28 + $0xa0] sm:$0xff] }
  0x9c   : > { %v274_v18 = vld [vmem:[%s4743_s28 + $0xb0] sm:$0xff] }
  0x9e   : > { %1075 = vmatpush1.bf16.msra.mxu0 %v4238_v29  ;;  %4107 = vmatpush1.bf16.msra.mxu1 %v4238_v29  ;;  %v4817_v29 = vpack.c.bf16 %v331_v21, %v329_v20  ;;  %v336_v20 = vld [vmem:[%s4743_s28 + $0x2a0] sm:$0xff]  ;;  %v338_v21 = vld [vmem:[%s4743_s28 + $0x2b0] sm:$0xff] }
  0x9f   : > { %1076 = vmatprep.subr.bf16.mxu0 %v4239_v30  ;;  %4092 = vmatprep.subr.bf16.mxu1 %v4239_v30  ;;  %v4275_v30 = vld [vmem:[#allocation5 + $0xc8] ss:$24 sps:$4 sm:$0xff]  }
  0xa2   : > { %1077 = vmatpush1.bf16.msra.mxu0 %v4241_v31  ;;  %4108 = vmatpush1.bf16.msra.mxu1 %v4241_v31  ;;  %v4278_v31 = vld [vmem:[#allocation5 + $0xd0] ss:$24 sps:$4 sm:$0xff]  }
  0xa3   : > { %1078 = vmatprep.subr.bf16.mxu0 %v4242_v32  ;;  %4093 = vmatprep.subr.bf16.mxu1 %v4242_v32  ;;  %v264_v32 = vld [vmem:[%s4743_s28 + $0x60] sm:$0xff] }
  0xa6   : > { %1079 = vmatpush1.bf16.msra.mxu0 %v4244_v33  ;;  %4109 = vmatpush1.bf16.msra.mxu1 %v4244_v33  ;;  %v266_v33 = vld [vmem:[%s4743_s28 + $0x70] sm:$0xff] }
  0xa7   : > { %1080 = vmatprep.subr.bf16.mxu0 %v4245_v34  ;;  %4094 = vmatprep.subr.bf16.mxu1 %v4245_v34  ;;  %v328_v34 = vld [vmem:[%s4743_s28 + $0x260] sm:$0xff]  ;;  %v4831_v46 = vpack.c.bf16 %v266_v33, %v264_v32  ;;  %v4305_v32 = vld [vmem:[#allocation5 + $0x1b8] ss:$24 sps:$4 sm:$0xff]  }
  0xa8   : > { %v4308_v33 = vld [vmem:[#allocation5 + $0x1c0] ss:$24 sps:$4 sm:$0xff]  }
  0xaa   : > { %1081 = vmatpush1.bf16.msra.mxu0 %v4247_v35  ;;  %4110 = vmatpush1.bf16.msra.mxu1 %v4247_v35  ;;  %v330_v35 = vld [vmem:[%s4743_s28 + $0x270] sm:$0xff] }
  0xab   : > { %1082 = vmatprep.subr.bf16.mxu0 %v4248_v36  ;;  %4095 = vmatprep.subr.bf16.mxu1 %v4248_v36  ;;  %v4283_v36 = vld [vmem:[#allocation5 + $0xfc] ss:$24 sps:$4 sm:$0xff]   ;;  %v4833_v47 = vpack.c.bf16 %v330_v35, %v328_v34  ;;  %v4313_v34 = vld [vmem:[#allocation5 + $0x1ec] ss:$24 sps:$4 sm:$0xff]  }
  0xac   : > { %v4316_v35 = vld [vmem:[#allocation5 + $0x1f4] ss:$24 sps:$4 sm:$0xff]  }
  0xae   : > { %1083 = vmatpush1.bf16.msra.mxu0 %v4250_v37  ;;  %4111 = vmatpush1.bf16.msra.mxu1 %v4250_v37  ;;  %v4286_v37 = vld [vmem:[#allocation5 + $0x104] ss:$24 sps:$4 sm:$0xff]  }
  0xaf   : > { %1405 = vmatprep.subr.bf16.mxu1 %v4253_v42  ;;  %1758 = vmatprep.subr.bf16.mxu0 %v4256_v43  ;;  %v4281_v42 = vld [vmem:[#allocation5 + $0xf8] ss:$24 sps:$4 sm:$0xff]  }
  0xb0   : > { %v4284_v43 = vld [vmem:[#allocation5 + $0x100] ss:$24 sps:$4 sm:$0xff]  }
  0xb1   : > { %1085 = vmatmul.mubr.bf16.vlgmr.msra.gmra.mrb[0].mxu0 %v4771_v48  ;;  %1245 = vmatmul.mubr.bf16.vlgmr.msra.gmra.mrb[0].mxu1 %v4773_v49 }
  0xb2   : > { %1406 = vmatpush1.bf16.msra.mxu1 %v4251_v50  ;;  %1759 = vmatpush1.bf16.msra.mxu0 %v4254_v51  ;;  %v4835_v50 = vpack.c.bf16 %v271_v39, %v269_v38  ;;  %v4837_v51 = vpack.c.bf16 %v335_v41, %v333_v40  ;;  %v4311_v40 = vld [vmem:[#allocation5 + $0x1e8] ss:$24 sps:$4 sm:$0xff]  }
  0xb3   : > { %1094 = vmatprep.mubr.bf16.mxu0 %v4775_v52  ;;  %1254 = vmatprep.mubr.bf16.mxu1 %v4777_v53  ;;  %v4314_v41 = vld [vmem:[#allocation5 + $0x1f0] ss:$24 sps:$4 sm:$0xff]  }
  0xb4   : > { %1407 = vmatprep.subr.bf16.mxu1 %v4259_v59  ;;  %1760 = vmatprep.subr.bf16.mxu0 %v4262_v61  ;;  %v4298_v59 = vld [vmem:[#allocation5 + $0x164] ss:$24 sps:$4 sm:$0xff]   ;;  %v334_v61 = vld [vmem:[%s4743_s28 + $0x290] sm:$0xff] }
  0xb6   : > { %1408 = vmatpush1.bf16.msra.mxu1 %v4257_v58  ;;  %1761 = vmatpush1.bf16.msra.mxu0 %v4260_v60  ;;  %v270_v58 = vld [vmem:[%s4743_s28 + $0x90] sm:$0xff]  ;;  %v332_v60 = vld [vmem:[%s4743_s28 + $0x280] sm:$0xff] }
  0xb7   : > { %1409 = vmatprep.subr.bf16.mxu1 %v4265_v2  ;;  %1762 = vmatprep.subr.bf16.mxu0 %v4268_v3  ;;  %v4293_v2 = vld [vmem:[#allocation5 + $0x158] ss:$24 sps:$4 sm:$0xff]   ;;  %v4853_v11 = vpack.c.bf16 %v334_v61, %v332_v60 }
  0xb8   : > { %v4296_v3 = vld [vmem:[#allocation5 + $0x160] ss:$24 sps:$4 sm:$0xff]  }
  0xb9   : > { %1095 = vmatmul.mubr.bf16.gmra.mrb[4].mxu0 %v4791_v4  ;;  %1255 = vmatmul.mubr.bf16.gmra.mrb[4].mxu1 %v4793_v5  ;;  %v4317_v60 = vld [vmem:[#allocation5 + $0x218] ss:$24 sps:$4 sm:$0xff]  }
  0xba   : > { %1104 = vmatprep.mubr.bf16.mxu0 %v4795_v6  ;;  %1264 = vmatprep.mubr.bf16.mxu1 %v4797_v7  ;;  %v4320_v61 = vld [vmem:[#allocation5 + $0x220] ss:$24 sps:$4 sm:$0xff]  }
  0xbb   : > { %1410 = vmatpush1.bf16.msra.mxu1 %v4263_v8  ;;  %1763 = vmatpush1.bf16.msra.mxu0 %v4266_v9  ;;  %v4301_v8 = vld [vmem:[#allocation5 + $0x18c] ss:$24 sps:$4 sm:$0xff]  }
  0xbc   : > { %1411 = vmatprep.subr.bf16.mxu1 %v4271_v10  ;;  %1764 = vmatprep.subr.bf16.mxu0 %v4274_v13  ;;  %v4304_v9 = vld [vmem:[#allocation5 + $0x194] ss:$24 sps:$4 sm:$0xff]   ;;  %v4851_v10 = vpack.c.bf16 %v270_v58, %v268_v57  ;;  %v4857_v13 = vpack.c.bf16 %v339_v1, %v337_v0  ;;  %v283_v57 = vld [vmem:[%s4743_s28 + $0xf8] sm:$0xff] }
  0xbd   : > { %v345_v58 = vld [vmem:[%s4743_s28 + $0x2e8] sm:$0xff] }
  0xbf   : > { %1412 = vmatpush1.bf16.msra.mxu1 %v4269_v22  ;;  %1765 = vmatpush1.bf16.msra.mxu0 %v4272_v23  ;;  %v4307_v22 = vld [vmem:[#allocation5 + $0x1bc] ss:$24 sps:$4 sm:$0xff]  }
  0xc0   : > { %1413 = vmatprep.subr.bf16.mxu1 %v4277_v24  ;;  %1766 = vmatprep.subr.bf16.mxu0 %v4280_v25  ;;  %v4310_v23 = vld [vmem:[#allocation5 + $0x1c4] ss:$24 sps:$4 sm:$0xff]   ;;  %v277_v24 = vld [vmem:[%s4743_s28 + $0xc8] sm:$0xff] }
  0xc1   : > { %1105 = vmatmul.mubr.bf16.gmra.mrb[8].mxu0 %v4811_v26  ;;  %1265 = vmatmul.mubr.bf16.gmra.mrb[8].mxu1 %v4813_v27  ;;  %v279_v25 = vld [vmem:[%s4743_s28 + $0xd8] sm:$0xff] }
  0xc2   : > { %1114 = vmatprep.mubr.bf16.mxu0 %v4815_v28  ;;  %1274 = vmatprep.mubr.bf16.mxu1 %v4817_v29  ;;  %v4875_v38 = vpack.c.bf16 %v279_v25, %v277_v24  ;;  %v349_v24 = vld [vmem:[%s4743_s28 + $0x308] sm:$0xff]  ;;  %v351_v25 = vld [vmem:[%s4743_s28 + $0x318] sm:$0xff] }
  0xc3   : > { %1414 = vmatpush1.bf16.msra.mxu1 %v4275_v30  ;;  %1767 = vmatpush1.bf16.msra.mxu0 %v4278_v31  ;;  %v341_v30 = vld [vmem:[%s4743_s28 + $0x2c8] sm:$0xff]  ;;  %v343_v31 = vld [vmem:[%s4743_s28 + $0x2d8] sm:$0xff] }
  0xc4   : > { %1415 = vmatprep.subr.bf16.mxu1 %v4283_v36  ;;  %1768 = vmatprep.subr.bf16.mxu0 %v4286_v37  ;;  %v4871_v36 = vpack.c.bf16 %v274_v18, %v272_v17  ;;  %v4873_v37 = vpack.c.bf16 %v338_v21, %v336_v20  ;;  %v4877_v39 = vpack.c.bf16 %v343_v31, %v341_v30  ;;  %v4334_v17 = vld [vmem:[#allocation5 + $0x284] ss:$24 sps:$4 sm:$0xff]   ;;  %v282_v18 = vld [vmem:[%s4743_s28 + $0xf0] sm:$0xff]  ;;  %v4332_v31 = vld [vmem:[#allocation5 + $0x280] ss:$24 sps:$4 sm:$0xff]  }
  0xc5   : > { %v344_v20 = vld [vmem:[%s4743_s28 + $0x2e0] sm:$0xff]  ;;  %v346_v21 = vld [vmem:[%s4743_s28 + $0x2f0] sm:$0xff] }
  0xc6   : > { %v4329_v30 = vld [vmem:[#allocation5 + $0x278] ss:$24 sps:$4 sm:$0xff]  }
  0xc7   : > { %1416 = vmatpush1.bf16.msra.mxu1 %v4281_v42  ;;  %1769 = vmatpush1.bf16.msra.mxu0 %v4284_v43  ;;  %v4319_v42 = vld [vmem:[#allocation5 + $0x21c] ss:$24 sps:$4 sm:$0xff]   ;;  %v276_v43 = vld [vmem:[%s4743_s28 + $0xc0] sm:$0xff] }
  0xc8   : > { %1417 = vmatprep.subr.bf16.mxu1 %v4289_v44  ;;  %1770 = vmatprep.subr.bf16.mxu0 %v4292_v45  ;;  %v4322_v44 = vld [vmem:[#allocation5 + $0x224] ss:$24 sps:$4 sm:$0xff]   ;;  %v278_v45 = vld [vmem:[%s4743_s28 + $0xd0] sm:$0xff] }
  0xc9   : > { %1115 = vmatmul.mubr.bf16.gmra.mrb[12].mxu0 %v4831_v46  ;;  %1275 = vmatmul.mubr.bf16.gmra.mrb[12].mxu1 %v4833_v47  ;;  %v4891_v0 = vpack.c.bf16 %v278_v45, %v276_v43  ;;  %v4338_v43 = vld [vmem:[#allocation5 + $0x2b0] ss:$24 sps:$4 sm:$0xff]   ;;  %v4343_v45 = vld [vmem:[#allocation5 + $0x2dc] ss:$24 sps:$4 sm:$0xff]  }
  0xca   : > { %1124 = vmatprep.mubr.bf16.mxu0 %v4835_v50  ;;  %1284 = vmatprep.mubr.bf16.mxu1 %v4837_v51 }
  0xcb   : > { %1418 = vmatpush1.bf16.msra.mxu1 %v4287_v54  ;;  %1771 = vmatpush1.bf16.msra.mxu0 %v4290_v55  ;;  %v340_v54 = vld [vmem:[%s4743_s28 + $0x2c0] sm:$0xff]  ;;  %v342_v55 = vld [vmem:[%s4743_s28 + $0x2d0] sm:$0xff] }
  0xcc   : > { %1419 = vmatprep.subr.bf16.mxu1 %v4295_v56  ;;  %1772 = vmatprep.subr.bf16.mxu0 %v4298_v59  ;;  %v281_v56 = vld [vmem:[%s4743_s28 + $0xe8] sm:$0xff]  ;;  %v347_v59 = vld [vmem:[%s4743_s28 + $0x2f8] sm:$0xff]  ;;  %v4893_v1 = vpack.c.bf16 %v342_v55, %v340_v54  ;;  %v286_v55 = vld [vmem:[%s4743_s28 + $0x110] sm:$0xff] }
  0xcd   : > { %v4346_v54 = vld [vmem:[#allocation5 + $0x2e4] ss:$24 sps:$4 sm:$0xff]  }
  0xcf   : > { %1420 = vmatpush1.bf16.msra.mxu1 %v4293_v2  ;;  %1773 = vmatpush1.bf16.msra.mxu0 %v4296_v3  ;;  %v4895_v2 = vpack.c.bf16 %v283_v57, %v281_v56  ;;  %v4897_v3 = vpack.c.bf16 %v347_v59, %v345_v58  ;;  %v348_v56 = vld [vmem:[%s4743_s28 + $0x300] sm:$0xff]  ;;  %v350_v57 = vld [vmem:[%s4743_s28 + $0x310] sm:$0xff]  ;;  %v289_v58 = vld [vmem:[%s4743_s28 + $0x128] sm:$0xff] }
  0xd0   : > { %1421 = vmatprep.subr.bf16.mxu1 %v4301_v8  ;;  %1774 = vmatprep.subr.bf16.mxu0 %v4304_v9  ;;  %v4323_v8 = vld [vmem:[#allocation5 + $0x248] ss:$24 sps:$4 sm:$0xff]   ;;  %v291_v59 = vld [vmem:[%s4743_s28 + $0x138] sm:$0xff] }
  0xd1   : > { %1125 = vmatmul.mubr.bf16.gmra.mrb[16].mxu0 %v4851_v10  ;;  %1285 = vmatmul.mubr.bf16.gmra.mrb[16].mxu1 %v4853_v11  ;;  %v4326_v9 = vld [vmem:[#allocation5 + $0x250] ss:$24 sps:$4 sm:$0xff]  }
  0xd2   : > { %1134 = vmatprep.mubr.bf16.mxu0 %v4855_v12  ;;  %1294 = vmatprep.mubr.bf16.mxu1 %v4857_v13 }
  0xd3   : > { %1422 = vmatpush1.bf16.msra.mxu1 %v4299_v14  ;;  %1775 = vmatpush1.bf16.msra.mxu0 %v4302_v16  ;;  %v280_v14 = vld [vmem:[%s4743_s28 + $0xe0] sm:$0xff]  ;;  %v4331_v16 = vld [vmem:[#allocation5 + $0x27c] ss:$24 sps:$4 sm:$0xff]  }
  0xd4   : > { %1423 = vmatprep.subr.bf16.mxu1 %v4307_v22  ;;  %1776 = vmatprep.subr.bf16.mxu0 %v4310_v23  ;;  %v285_v22 = vld [vmem:[%s4743_s28 + $0x108] sm:$0xff]  ;;  %v287_v23 = vld [vmem:[%s4743_s28 + $0x118] sm:$0xff] }
  0xd7   : > { %1424 = vmatpush1.bf16.msra.mxu1 %v4305_v32  ;;  %1777 = vmatpush1.bf16.msra.mxu0 %v4308_v33  ;;  %v4337_v32 = vld [vmem:[#allocation5 + $0x2ac] ss:$24 sps:$4 sm:$0xff]  }
  0xd8   : > { %1425 = vmatprep.subr.bf16.mxu1 %v4313_v34  ;;  %1778 = vmatprep.subr.bf16.mxu0 %v4316_v35  ;;  %v4340_v33 = vld [vmem:[#allocation5 + $0x2b4] ss:$24 sps:$4 sm:$0xff]   ;;  %v4911_v34 = vpack.c.bf16 %v282_v18, %v280_v14  ;;  %v4913_v35 = vpack.c.bf16 %v346_v21, %v344_v20  ;;  %v4935_v14 = vpack.c.bf16 %v291_v59, %v289_v58  ;;  %v352_v20 = vld [vmem:[%s4743_s28 + $0x320] sm:$0xff] }
  0xd9   : > { %1135 = vmatmul.mubr.bf16.gmra.mrb[20].mxu0 %v4871_v36  ;;  %1295 = vmatmul.mubr.bf16.gmra.mrb[20].mxu1 %v4873_v37  ;;  %v290_v18 = vld [vmem:[%s4743_s28 + $0x130] sm:$0xff] }
  0xda   : > { %1144 = vmatprep.mubr.bf16.mxu0 %v4875_v38  ;;  %1304 = vmatprep.mubr.bf16.mxu1 %v4877_v39  ;;  %v354_v21 = vld [vmem:[%s4743_s28 + $0x330] sm:$0xff] }
  0xdb   : > { %1426 = vmatpush1.bf16.msra.mxu1 %v4311_v40  ;;  %1779 = vmatpush1.bf16.msra.mxu0 %v4314_v41  ;;  %v4915_v40 = vpack.c.bf16 %v287_v23, %v285_v22  ;;  %v4917_v41 = vpack.c.bf16 %v351_v25, %v349_v24  ;;  %v293_v22 = vld [vmem:[%s4743_s28 + $0x148] sm:$0xff]  ;;  %v295_v23 = vld [vmem:[%s4743_s28 + $0x158] sm:$0xff] }
  0xdc   : > { %1427 = vmatprep.subr.bf16.mxu1 %v4319_v42  ;;  %1780 = vmatprep.subr.bf16.mxu0 %v4322_v44  ;;  %v4335_v42 = vld [vmem:[#allocation5 + $0x2a8] ss:$24 sps:$4 sm:$0xff]   ;;  %v359_v25 = vld [vmem:[%s4743_s28 + $0x358] sm:$0xff] }
  0xdd   : > { %v284_v44 = vld [vmem:[%s4743_s28 + $0x100] sm:$0xff]  ;;  %v357_v24 = vld [vmem:[%s4743_s28 + $0x348] sm:$0xff] }
  0xdf   : > { %1428 = vmatpush1.bf16.msra.mxu1 %v4317_v60  ;;  %1781 = vmatpush1.bf16.msra.mxu0 %v4320_v61  ;;  %v353_v60 = vld [vmem:[%s4743_s28 + $0x328] sm:$0xff]  ;;  %v355_v61 = vld [vmem:[%s4743_s28 + $0x338] sm:$0xff] }
  0xe0   : > { %1429 = vmatprep.subr.bf16.mxu1 %v4325_v62  ;;  %1782 = vmatprep.subr.bf16.mxu0 %v4328_v63  ;;  %v4341_v62 = vld [vmem:[#allocation5 + $0x2d8] ss:$24 sps:$4 sm:$0xff]  }
  0xe1   : > { %1145 = vmatmul.mubr.bf16.gmra.mrb[24].mxu0 %v4891_v0  ;;  %1305 = vmatmul.mubr.bf16.gmra.mrb[24].mxu1 %v4893_v1  ;;  %v4344_v63 = vld [vmem:[#allocation5 + $0x2e0] ss:$24 sps:$4 sm:$0xff]  }
  0xe2   : > { %1154 = vmatprep.mubr.bf16.mxu0 %v4895_v2  ;;  %1314 = vmatprep.mubr.bf16.mxu1 %v4897_v3 }
  0xe3   : > { %1430 = vmatpush1.bf16.msra.mxu1 %v4323_v8  ;;  %1783 = vmatpush1.bf16.msra.mxu0 %v4326_v9  ;;  %v4931_v8 = vpack.c.bf16 %v286_v55, %v284_v44  ;;  %v4933_v9 = vpack.c.bf16 %v350_v57, %v348_v56  ;;  %v356_v44 = vld [vmem:[%s4743_s28 + $0x340] sm:$0xff]  ;;  %v299_v55 = vld [vmem:[%s4743_s28 + $0x178] sm:$0xff]  ;;  %v361_v56 = vld [vmem:[%s4743_s28 + $0x368] sm:$0xff] }
  0xe4   : > { %1431 = vmatprep.subr.bf16.mxu1 %v4331_v16  ;;  %1784 = vmatprep.subr.bf16.mxu0 %v4334_v17  ;;  %v4937_v16 = vpack.c.bf16 %v355_v61, %v353_v60  ;;  %v288_v17 = vld [vmem:[%s4743_s28 + $0x120] sm:$0xff]  ;;  %v363_v57 = vld [vmem:[%s4743_s28 + $0x378] sm:$0xff] }
  0xe5   : > { %v4977_v61 = vpack.c.bf16 %v363_v57, %v361_v56  ;;  %v305_v56 = vld [vmem:[%s4743_s28 + $0x1a8] sm:$0xff]  ;;  %v307_v57 = vld [vmem:[%s4743_s28 + $0x1b8] sm:$0xff] }
  0xe7   : > { %1432 = vmatpush1.bf16.msra.mxu1 %v4329_v30  ;;  %1785 = vmatpush1.bf16.msra.mxu0 %v4332_v31  ;;  %v4951_v30 = vpack.c.bf16 %v290_v18, %v288_v17  ;;  %v4953_v31 = vpack.c.bf16 %v354_v21, %v352_v20  ;;  %5905 = vst [vmem:[#allocation15_spill] sm:$0xff] %v4977_v61  ;;  %v360_v17 = vld [vmem:[%s4743_s28 + $0x360] sm:$0xff]  ;;  %v362_v18 = vld [vmem:[%s4743_s28 + $0x370] sm:$0xff]  ;;  %v301_v20 = vld [vmem:[%s4743_s28 + $0x188] sm:$0xff] }
  0xe8   : > { %1433 = vmatprep.subr.bf16.mxu1 %v4337_v32  ;;  %1786 = vmatprep.subr.bf16.mxu0 %v4340_v33  ;;  %v4955_v32 = vpack.c.bf16 %v295_v23, %v293_v22  ;;  %v4957_v33 = vpack.c.bf16 %v359_v25, %v357_v24  ;;  %v303_v21 = vld [vmem:[%s4743_s28 + $0x198] sm:$0xff]  ;;  %v365_v22 = vld [vmem:[%s4743_s28 + $0x388] sm:$0xff]  ;;  %v4993_v25 = vpack.c.bf16 %v362_v18, %v360_v17 }
  0xe9   : > { %1155 = vmatmul.mubr.bf16.gmra.mrb[28].mxu0 %v4911_v34  ;;  %1315 = vmatmul.mubr.bf16.gmra.mrb[28].mxu1 %v4913_v35  ;;  %5902 = vst [vmem:[#allocation12_spill] sm:$0xff] %v4953_v31  ;;  %v367_v23 = vld [vmem:[%s4743_s28 + $0x398] sm:$0xff] }
  0xea   : > { %1164 = vmatprep.mubr.bf16.mxu0 %v4915_v40  ;;  %1324 = vmatprep.mubr.bf16.mxu1 %v4917_v41  ;;  %5903 = vst [vmem:[#allocation13_spill] sm:$0xff] %v4957_v33  ;;  %5906 = vst [vmem:[#allocation16_spill] sm:$0xff] %v4993_v25 }
  0xeb   : > { %1434 = vmatpush1.bf16.msra.mxu1 %v4335_v42  ;;  %1787 = vmatpush1.bf16.msra.mxu0 %v4338_v43  ;;  %v292_v42 = vld [vmem:[%s4743_s28 + $0x140] sm:$0xff]  ;;  %v294_v43 = vld [vmem:[%s4743_s28 + $0x150] sm:$0xff] }
  0xec   : > { %1435 = vmatprep.subr.bf16.mxu1 %v4343_v45  ;;  %1788 = vmatprep.subr.bf16.mxu0 %v4346_v54  ;;  %v358_v45 = vld [vmem:[%s4743_s28 + $0x350] sm:$0xff]  ;;  %v297_v54 = vld [vmem:[%s4743_s28 + $0x168] sm:$0xff]  ;;  %v4971_v58 = vpack.c.bf16 %v294_v43, %v292_v42  ;;  %v4995_v42 = vpack.c.bf16 %v303_v21, %v301_v20  ;;  %v4997_v43 = vpack.c.bf16 %v367_v23, %v365_v22  ;;  %v304_v22 = vld [vmem:[%s4743_s28 + $0x1a0] sm:$0xff] }
  0xed   : > { %v4973_v59 = vpack.c.bf16 %v358_v45, %v356_v44  ;;  %v4975_v60 = vpack.c.bf16 %v299_v55, %v297_v54  ;;  %v300_v44 = vld [vmem:[%s4743_s28 + $0x180] sm:$0xff]  ;;  %v302_v45 = vld [vmem:[%s4743_s28 + $0x190] sm:$0xff]  ;;  %v5015_v20 = vpack.c.bf16 %v307_v57, %v305_v56  ;;  %v373_v56 = vld [vmem:[%s4743_s28 + $0x3c8] sm:$0xff] }
  0xee   : > { %5907 = vst [vmem:[#allocation17_spill] sm:$0xff] %v4997_v43  ;;  %v364_v54 = vld [vmem:[%s4743_s28 + $0x380] sm:$0xff]  ;;  %v366_v55 = vld [vmem:[%s4743_s28 + $0x390] sm:$0xff]  ;;  %v5011_v17 = vpack.c.bf16 %v302_v45, %v300_v44  ;;  %v375_v57 = vld [vmem:[%s4743_s28 + $0x3d8] sm:$0xff] }
  0xef   : > { %1436 = vmatpush1.bf16.msra.mxu1 %v4341_v62  ;;  %1789 = vmatpush1.bf16.msra.mxu0 %v4344_v63  ;;  %5904 = vst [vmem:[#allocation14_spill] sm:$0xff] %v4973_v59  ;;  %v296_v62 = vld [vmem:[%s4743_s28 + $0x160] sm:$0xff]  ;;  %v298_v63 = vld [vmem:[%s4743_s28 + $0x170] sm:$0xff]  ;;  %v5013_v18 = vpack.c.bf16 %v366_v55, %v364_v54  ;;  %v309_v54 = vld [vmem:[%s4743_s28 + $0x1c8] sm:$0xff] }
  0xf0   : > { %v4991_v24 = vpack.c.bf16 %v298_v63, %v296_v62  ;;  %v369_v62 = vld [vmem:[%s4743_s28 + $0x3a8] sm:$0xff]  ;;  %v371_v63 = vld [vmem:[%s4743_s28 + $0x3b8] sm:$0xff]  ;;  %v306_v23 = vld [vmem:[%s4743_s28 + $0x1b0] sm:$0xff] }
  0xf1   : > { %1165 = vmatmul.mubr.bf16.gmra.mrb[32].mxu0 %v4931_v8  ;;  %1325 = vmatmul.mubr.bf16.gmra.mrb[32].mxu1 %v4933_v9  ;;  %5908 = vst [vmem:[#allocation18_spill] sm:$0xff] %v5013_v18  ;;  %v5017_v21 = vpack.c.bf16 %v371_v63, %v369_v62  ;;  %v368_v44 = vld [vmem:[%s4743_s28 + $0x3a0] sm:$0xff]  ;;  %v370_v45 = vld [vmem:[%s4743_s28 + $0x3b0] sm:$0xff]  ;;  %v311_v55 = vld [vmem:[%s4743_s28 + $0x1d8] sm:$0xff]  ;;  %v5031_v62 = vpack.c.bf16 %v306_v23, %v304_v22 }
  0xf2   : > { %1174 = vmatprep.mubr.bf16.mxu0 %v4935_v14  ;;  %1334 = vmatprep.mubr.bf16.mxu1 %v4937_v16  ;;  %v5033_v63 = vpack.c.bf16 %v370_v45, %v368_v44  ;;  %v372_v22 = vld [vmem:[%s4743_s28 + $0x3c0] sm:$0xff]  ;;  %v374_v23 = vld [vmem:[%s4743_s28 + $0x3d0] sm:$0xff]  ;;  %v313_v44 = vld [vmem:[%s4743_s28 + $0x1e8] sm:$0xff] }
  0xf3   : > { %5909 = vst [vmem:[#allocation19_spill] sm:$0xff] %v5017_v21  ;;  %v315_v45 = vld [vmem:[%s4743_s28 + $0x1f8] sm:$0xff] }
  0xf4   : > { %5910 = vst [vmem:[#allocation20_spill] sm:$0xff] %v5033_v63 }
  0xf9   : > { %1175 = vmatmul.mubr.bf16.gmra.mrb[36].mxu0 %v4951_v30  ;;  %1335 = vmatmul.mubr.bf16.gmra.mrb[36].mxu1 %v4953_v31  ;;  %v378_v31 = vld [vmem:[%s4743_s28 + $0x3f0] sm:$0xff] }
  0xfa   : > { %1184 = vmatprep.mubr.bf16.mxu0 %v4955_v32  ;;  %1344 = vmatprep.mubr.bf16.mxu1 %v4957_v33  ;;  %v376_v33 = vld [vmem:[%s4743_s28 + $0x3e0] sm:$0xff] }
 0x101   : > { %1185 = vmatmul.mubr.bf16.gmra.mrb[40].mxu0 %v4971_v58  ;;  %1345 = vmatmul.mubr.bf16.gmra.mrb[40].mxu1 %v4973_v59  ;;  %v314_v59 = vld [vmem:[%s4743_s28 + $0x1f0] sm:$0xff] }
 0x102   : > { %1194 = vmatprep.mubr.bf16.mxu0 %v4975_v60  ;;  %1354 = vmatprep.mubr.bf16.mxu1 %v4977_v61 }
 0x109   : > { %1195 = vmatmul.mubr.bf16.gmra.mrb[44].mxu0 %v4991_v24  ;;  %1355 = vmatmul.mubr.bf16.gmra.mrb[44].mxu1 %v4993_v25  ;;  %v310_v25 = vld [vmem:[%s4743_s28 + $0x1d0] sm:$0xff] }
 0x10a   : > { %1204 = vmatprep.mubr.bf16.mxu0 %v4995_v42  ;;  %1364 = vmatprep.mubr.bf16.mxu1 %v4997_v43  ;;  %v5037_v43 = vpack.c.bf16 %v375_v57, %v373_v56  ;;  %v5053_v57 = vpack.c.bf16 %v374_v23, %v372_v22 }
 0x10c   : > { %5911 = vst [vmem:[#allocation21_spill] sm:$0xff] %v5037_v43 }
 0x111   : > { %1205 = vmatmul.mubr.bf16.gmra.mrb[48].mxu0 %v5011_v17  ;;  %1365 = vmatmul.mubr.bf16.gmra.mrb[48].mxu1 %v5013_v18  ;;  %v5035_v18 = vpack.c.bf16 %v311_v55, %v309_v54  ;;  %v377_v54 = vld [vmem:[%s4743_s28 + $0x3e8] sm:$0xff]  ;;  %v379_v55 = vld [vmem:[%s4743_s28 + $0x3f8] sm:$0xff] }
 0x112   : > { %1214 = vmatprep.mubr.bf16.mxu0 %v5015_v20  ;;  %1374 = vmatprep.mubr.bf16.mxu1 %v5017_v21  ;;  %v308_v21 = vld [vmem:[%s4743_s28 + $0x1c0] sm:$0xff]  ;;  %v5057_v61 = vpack.c.bf16 %v379_v55, %v377_v54 }
 0x113   : > { %v5051_v56 = vpack.c.bf16 %v310_v25, %v308_v21  ;;  %v5069_v21 = vpack.c.bf16 %v378_v31, %v376_v33 }
 0x119   : > { %1215 = vmatmul.mubr.bf16.gmra.mrb[52].mxu0 %v5031_v62  ;;  %1375 = vmatmul.mubr.bf16.gmra.mrb[52].mxu1 %v5033_v63  ;;  %v5055_v63 = vpack.c.bf16 %v315_v45, %v313_v44 }
 0x11a   : > { %1224 = vmatprep.mubr.bf16.mxu0 %v5035_v18  ;;  %1384 = vmatprep.mubr.bf16.mxu1 %v5037_v43  ;;  %v312_v43 = vld [vmem:[%s4743_s28 + $0x1e0] sm:$0xff] }
 0x11b   : > { %v5067_v25 = vpack.c.bf16 %v314_v59, %v312_v43 }
 0x121   : > { %1225 = vmatmul.mubr.bf16.gmra.mrb[56].mxu0 %v5051_v56  ;;  %1385 = vmatmul.mubr.bf16.gmra.mrb[56].mxu1 %v5053_v57 }
 0x122   : > { %1234 = vmatprep.mubr.bf16.mxu0 %v5055_v63  ;;  %1394 = vmatprep.mubr.bf16.mxu1 %v5057_v61 }
 0x129   : > { %1235 = vmatmul.mubr.bf16.gmra.mrb[60].mxu0 %v5067_v25  ;;  %1395 = vmatmul.mubr.bf16.gmra.mrb[60].mxu1 %v5069_v21 }
 0x12a   : > { %1437 = vmatprep.mubr.bf16.mxu1 %v4755_v15  ;;  %1790 = vmatprep.mubr.bf16.mxu0 %v4755_v15  ;;  %v542_v15 = vlaneseq }
 0x131   : > { %1438 = vmatmul.mubr.bf16.vlgmr.msra.gmra.mrb[64].mxu1 %v4771_v48  ;;  %1791 = vmatmul.mubr.bf16.vlgmr.msra.gmra.mrb[64].mxu0 %v4771_v48  ;;  %v5113_v48 = vshrl.u32 %v542_v15, 7 }
 0x132   : > { %1447 = vmatprep.mubr.bf16.mxu1 %v4775_v52  ;;  %1800 = vmatprep.mubr.bf16.mxu0 %v4775_v52 }
 0x133   : > { %v544_v52 = vsub.s32 0, %v5113_v48 }
 0x139   : > { %1448 = vmatmul.mubr.bf16.gmra.mrb[68].mxu1 %v4791_v4  ;;  %1801 = vmatmul.mubr.bf16.gmra.mrb[68].mxu0 %v4791_v4  ;;  %v5118_v4 = vld [vmem:[#allocation7] sm:$0x3f] }
 0x13a   : > { %1457 = vmatprep.mubr.bf16.mxu1 %v4795_v6  ;;  %1810 = vmatprep.mubr.bf16.mxu0 %v4795_v6  ;;  %v548_v6 = vsub.s32 1, %v5113_v48 }
 0x141   : > { %1458 = vmatmul.mubr.bf16.gmra.mrb[72].mxu1 %v4811_v26  ;;  %1811 = vmatmul.mubr.bf16.gmra.mrb[72].mxu0 %v4811_v26  ;;  %v5124_v26 = vrot.slane %v5118_v4, %v544_v52 }
 0x142   : > { %1467 = vmatprep.mubr.bf16.mxu1 %v4815_v28  ;;  %1820 = vmatprep.mubr.bf16.mxu0 %v4815_v28  ;;  %v5127_v28 = vrot.slane %v5118_v4, %v548_v6 }
 0x149   : > { %1468 = vmatmul.mubr.bf16.gmra.mrb[76].mxu1 %v4831_v46  ;;  %1821 = vmatmul.mubr.bf16.gmra.mrb[76].mxu0 %v4831_v46 }
 0x14a   : > { %1477 = vmatprep.mubr.bf16.mxu1 %v4835_v50  ;;  %1830 = vmatprep.mubr.bf16.mxu0 %v4835_v50 }
 0x151   : > { %1478 = vmatmul.mubr.bf16.gmra.mrb[80].mxu1 %v4851_v10  ;;  %1831 = vmatmul.mubr.bf16.gmra.mrb[80].mxu0 %v4851_v10 }
 0x152   : > { %1487 = vmatprep.mubr.bf16.mxu1 %v4855_v12  ;;  %1840 = vmatprep.mubr.bf16.mxu0 %v4855_v12 }
 0x159   : > { %1488 = vmatmul.mubr.bf16.gmra.mrb[84].mxu1 %v4871_v36  ;;  %1841 = vmatmul.mubr.bf16.gmra.mrb[84].mxu0 %v4871_v36 }
 0x15a   : > { %1497 = vmatprep.mubr.bf16.mxu1 %v4875_v38  ;;  %1850 = vmatprep.mubr.bf16.mxu0 %v4875_v38 }
 0x161   : > { %1498 = vmatmul.mubr.bf16.gmra.mrb[88].mxu1 %v4891_v0  ;;  %1851 = vmatmul.mubr.bf16.gmra.mrb[88].mxu0 %v4891_v0 }
 0x162   : > { %1507 = vmatprep.mubr.bf16.mxu1 %v4895_v2  ;;  %1860 = vmatprep.mubr.bf16.mxu0 %v4895_v2 }
 0x169   : > { %1508 = vmatmul.mubr.bf16.gmra.mrb[92].mxu1 %v4911_v34  ;;  %1861 = vmatmul.mubr.bf16.gmra.mrb[92].mxu0 %v4911_v34 }
 0x16a   : > { %1517 = vmatprep.mubr.bf16.mxu1 %v4915_v40  ;;  %1870 = vmatprep.mubr.bf16.mxu0 %v4915_v40 }
 0x171   : > { %1518 = vmatmul.mubr.bf16.gmra.mrb[96].mxu1 %v4931_v8  ;;  %1871 = vmatmul.mubr.bf16.gmra.mrb[96].mxu0 %v4931_v8 }
 0x172   : > { %1527 = vmatprep.mubr.bf16.mxu1 %v4935_v14  ;;  %1880 = vmatprep.mubr.bf16.mxu0 %v4935_v14 }
 0x179   : > { %1528 = vmatmul.mubr.bf16.gmra.mrb[100].mxu1 %v4951_v30  ;;  %1881 = vmatmul.mubr.bf16.gmra.mrb[100].mxu0 %v4951_v30 }
 0x17a   : > { %1537 = vmatprep.mubr.bf16.mxu1 %v4955_v32  ;;  %1890 = vmatprep.mubr.bf16.mxu0 %v4955_v32 }
 0x181   : > { %1538 = vmatmul.mubr.bf16.gmra.mrb[104].mxu1 %v4971_v58  ;;  %1891 = vmatmul.mubr.bf16.gmra.mrb[104].mxu0 %v4971_v58 }
 0x182   : > { %1547 = vmatprep.mubr.bf16.mxu1 %v4975_v60  ;;  %1900 = vmatprep.mubr.bf16.mxu0 %v4975_v60 }
 0x184   : > { %v1086_v46 = vpop.f32.mrb[0].mxu0  ;;  %v1246_v50 = vpop.f32.mrb[0].mxu1 }
 0x185   : > { %v1087_v10 = vadd.f32 %v1086_v46, %v5124_v26  ;;  %v1247_v12 = vadd.f32 %v1246_v50, %v5124_v26  ;;  %v1088_v36 = vpop.f32.mrb[1].mxu0  ;;  %v1248_v38 = vpop.f32.mrb[1].mxu1 }
 0x186   : > { %v1089_v0 = vadd.f32 %v1088_v36, %v5127_v28  ;;  %v1249_v2 = vadd.f32 %v1248_v38, %v5127_v28  ;;  %v1090_v34 = vpop.f32.mrb[2].mxu0  ;;  %v1250_v40 = vpop.f32.mrb[2].mxu1 }
 0x187   : > { %v1091_v8 = vadd.f32 %v1090_v34, %v5124_v26  ;;  %v1251_v14 = vadd.f32 %v1250_v40, %v5124_v26  ;;  %v1092_v30 = vpop.f32.mrb[3].mxu0  ;;  %v1252_v31 = vpop.f32.mrb[3].mxu1 }
 0x188   : > { %v3888_v32 = vpack.c.bf16 %v1089_v0, %v1087_v10  ;;  %v3984_v33 = vpack.c.bf16 %v1249_v2, %v1247_v12  ;;  %v1093_v58 = vadd.f32 %v1092_v30, %v5127_v28  ;;  %v1253_v59 = vadd.f32 %v1252_v31, %v5127_v28 }
 0x189   : > { %1548 = vmatmul.mubr.bf16.gmra.mrb[108].mxu1 %v4991_v24  ;;  %1901 = vmatmul.mubr.bf16.gmra.mrb[108].mxu0 %v4991_v24 }
 0x18a   : > { %3263 = vst [vmem:[%s5142_s22] sm:$0xff] %v3888_v32  ;;  %3359 = vst [vmem:[%s5142_s22 + $0x300] sm:$0xff] %v3984_v33  ;;  %v3891_v60 = vpack.c.bf16 %v1093_v58, %v1091_v8  ;;  %v3987_v43 = vpack.c.bf16 %v1253_v59, %v1251_v14  ;;  %1557 = vmatprep.mubr.bf16.mxu1 %v4995_v42  ;;  %1910 = vmatprep.mubr.bf16.mxu0 %v4995_v42 }
 0x18c   : > { %3266 = vst [vmem:[%s5142_s22 + $0x18] sm:$0xff] %v3891_v60  ;;  %3362 = vst [vmem:[%s5142_s22 + $0x318] sm:$0xff] %v3987_v43  ;;  %v1096_v22 = vpop.f32.mrb[4].mxu0  ;;  %v1256_v23 = vpop.f32.mrb[4].mxu1 }
 0x18d   : > { %v1097_v24 = vadd.f32 %v1096_v22, %v5124_v26  ;;  %v1257_v44 = vadd.f32 %v1256_v23, %v5124_v26  ;;  %v1098_v45 = vpop.f32.mrb[5].mxu0  ;;  %v1258_v54 = vpop.f32.mrb[5].mxu1 }
 0x18e   : > { %v1099_v55 = vadd.f32 %v1098_v45, %v5127_v28  ;;  %v1259_v15 = vadd.f32 %v1258_v54, %v5127_v28  ;;  %v1100_v52 = vpop.f32.mrb[6].mxu0  ;;  %v1260_v6 = vpop.f32.mrb[6].mxu1 }
 0x18f   : > { %v1101_v42 = vadd.f32 %v1100_v52, %v5124_v26  ;;  %v1261_v46 = vadd.f32 %v1260_v6, %v5124_v26  ;;  %v1102_v50 = vpop.f32.mrb[7].mxu0  ;;  %v1262_v10 = vpop.f32.mrb[7].mxu1 }
 0x190   : > { %v3894_v12 = vpack.c.bf16 %v1099_v55, %v1097_v24  ;;  %v3990_v36 = vpack.c.bf16 %v1259_v15, %v1257_v44  ;;  %v1103_v38 = vadd.f32 %v1102_v50, %v5127_v28  ;;  %v1263_v0 = vadd.f32 %v1262_v10, %v5127_v28 }
 0x191   : > { %1558 = vmatmul.mubr.bf16.gmra.mrb[112].mxu1 %v5011_v17  ;;  %1911 = vmatmul.mubr.bf16.gmra.mrb[112].mxu0 %v5011_v17 }
 0x192   : > { %3269 = vst [vmem:[%s5142_s22 + $0x30] sm:$0xff] %v3894_v12  ;;  %3365 = vst [vmem:[%s5142_s22 + $0x330] sm:$0xff] %v3990_v36  ;;  %v3897_v2 = vpack.c.bf16 %v1103_v38, %v1101_v42  ;;  %v3993_v34 = vpack.c.bf16 %v1263_v0, %v1261_v46  ;;  %1567 = vmatprep.mubr.bf16.mxu1 %v5015_v20  ;;  %1920 = vmatprep.mubr.bf16.mxu0 %v5015_v20 }
 0x194   : > { %3272 = vst [vmem:[%s5142_s22 + $0x48] sm:$0xff] %v3897_v2  ;;  %3368 = vst [vmem:[%s5142_s22 + $0x348] sm:$0xff] %v3993_v34  ;;  %v1106_v40 = vpop.f32.mrb[8].mxu0  ;;  %v1266_v8 = vpop.f32.mrb[8].mxu1 }
 0x195   : > { %v1107_v14 = vadd.f32 %v1106_v40, %v5124_v26  ;;  %v1267_v30 = vadd.f32 %v1266_v8, %v5124_v26  ;;  %v1108_v31 = vpop.f32.mrb[9].mxu0  ;;  %v1268_v32 = vpop.f32.mrb[9].mxu1 }
 0x196   : > { %v1109_v17 = vadd.f32 %v1108_v31, %v5127_v28  ;;  %v1269_v33 = vadd.f32 %v1268_v32, %v5127_v28  ;;  %v1110_v58 = vpop.f32.mrb[10].mxu0  ;;  %v1270_v59 = vpop.f32.mrb[10].mxu1 }
 0x197   : > { %v1111_v20 = vadd.f32 %v1110_v58, %v5124_v26  ;;  %v1271_v60 = vadd.f32 %v1270_v59, %v5124_v26  ;;  %v1112_v43 = vpop.f32.mrb[11].mxu0  ;;  %v1272_v22 = vpop.f32.mrb[11].mxu1 }
 0x198   : > { %v3900_v23 = vpack.c.bf16 %v1109_v17, %v1107_v14  ;;  %v3996_v24 = vpack.c.bf16 %v1269_v33, %v1267_v30  ;;  %v1113_v44 = vadd.f32 %v1112_v43, %v5127_v28  ;;  %v1273_v45 = vadd.f32 %v1272_v22, %v5127_v28 }
 0x199   : > { %1568 = vmatmul.mubr.bf16.gmra.mrb[116].mxu1 %v5031_v62  ;;  %1921 = vmatmul.mubr.bf16.gmra.mrb[116].mxu0 %v5031_v62 }
 0x19a   : > { %3275 = vst [vmem:[%s5142_s22 + $0x60] sm:$0xff] %v3900_v23  ;;  %3371 = vst [vmem:[%s5142_s22 + $0x360] sm:$0xff] %v3996_v24  ;;  %v3903_v54 = vpack.c.bf16 %v1113_v44, %v1111_v20  ;;  %v3999_v55 = vpack.c.bf16 %v1273_v45, %v1271_v60  ;;  %1577 = vmatprep.mubr.bf16.mxu1 %v5035_v18  ;;  %1930 = vmatprep.mubr.bf16.mxu0 %v5035_v18 }
 0x19c   : > { %3278 = vst [vmem:[%s5142_s22 + $0x78] sm:$0xff] %v3903_v54  ;;  %3374 = vst [vmem:[%s5142_s22 + $0x378] sm:$0xff] %v3999_v55  ;;  %v1116_v15 = vpop.f32.mrb[12].mxu0  ;;  %v1276_v52 = vpop.f32.mrb[12].mxu1 }
 0x19d   : > { %v1117_v6 = vadd.f32 %v1116_v15, %v5124_v26  ;;  %v1277_v42 = vadd.f32 %v1276_v52, %v5124_v26  ;;  %v1118_v46 = vpop.f32.mrb[13].mxu0  ;;  %v1278_v50 = vpop.f32.mrb[13].mxu1 }
 0x19e   : > { %v1119_v62 = vadd.f32 %v1118_v46, %v5127_v28  ;;  %v1279_v10 = vadd.f32 %v1278_v50, %v5127_v28  ;;  %v1120_v12 = vpop.f32.mrb[14].mxu0  ;;  %v1280_v36 = vpop.f32.mrb[14].mxu1 }
 0x19f   : > { %v1121_v18 = vadd.f32 %v1120_v12, %v5124_v26  ;;  %v1281_v38 = vadd.f32 %v1280_v36, %v5124_v26  ;;  %v1122_v0 = vpop.f32.mrb[15].mxu0  ;;  %v1282_v2 = vpop.f32.mrb[15].mxu1 }
 0x1a0   : > { %v3906_v34 = vpack.c.bf16 %v1119_v62, %v1117_v6  ;;  %v4002_v40 = vpack.c.bf16 %v1279_v10, %v1277_v42  ;;  %v1123_v8 = vadd.f32 %v1122_v0, %v5127_v28  ;;  %v1283_v14 = vadd.f32 %v1282_v2, %v5127_v28 }
 0x1a1   : > { %1578 = vmatmul.mubr.bf16.gmra.mrb[120].mxu1 %v5051_v56  ;;  %1931 = vmatmul.mubr.bf16.gmra.mrb[120].mxu0 %v5051_v56 }
 0x1a2   : > { %3281 = vst [vmem:[%s5142_s22 + $0x90] sm:$0xff] %v3906_v34  ;;  %3377 = vst [vmem:[%s5142_s22 + $0x390] sm:$0xff] %v4002_v40  ;;  %v3909_v30 = vpack.c.bf16 %v1123_v8, %v1121_v18  ;;  %v4005_v31 = vpack.c.bf16 %v1283_v14, %v1281_v38  ;;  %1587 = vmatprep.mubr.bf16.mxu1 %v5055_v63  ;;  %1940 = vmatprep.mubr.bf16.mxu0 %v5055_v63 }
 0x1a4   : > { %3284 = vst [vmem:[%s5142_s22 + $0xa8] sm:$0xff] %v3909_v30  ;;  %3380 = vst [vmem:[%s5142_s22 + $0x3a8] sm:$0xff] %v4005_v31  ;;  %v1126_v32 = vpop.f32.mrb[16].mxu0  ;;  %v1286_v17 = vpop.f32.mrb[16].mxu1 }
 0x1a5   : > { %v1127_v33 = vadd.f32 %v1126_v32, %v5124_v26  ;;  %v1287_v58 = vadd.f32 %v1286_v17, %v5124_v26  ;;  %v1128_v59 = vpop.f32.mrb[17].mxu0  ;;  %v1288_v20 = vpop.f32.mrb[17].mxu1 }
 0x1a6   : > { %v1129_v56 = vadd.f32 %v1128_v59, %v5127_v28  ;;  %v1289_v60 = vadd.f32 %v1288_v20, %v5127_v28  ;;  %v1130_v43 = vpop.f32.mrb[18].mxu0  ;;  %v1290_v22 = vpop.f32.mrb[18].mxu1 }
 0x1a7   : > { %v1131_v63 = vadd.f32 %v1130_v43, %v5124_v26  ;;  %v1291_v23 = vadd.f32 %v1290_v22, %v5124_v26  ;;  %v1132_v24 = vpop.f32.mrb[19].mxu0  ;;  %v1292_v44 = vpop.f32.mrb[19].mxu1 }
 0x1a8   : > { %v3912_v45 = vpack.c.bf16 %v1129_v56, %v1127_v33  ;;  %v4008_v54 = vpack.c.bf16 %v1289_v60, %v1287_v58  ;;  %v1133_v55 = vadd.f32 %v1132_v24, %v5127_v28  ;;  %v1293_v15 = vadd.f32 %v1292_v44, %v5127_v28 }
 0x1a9   : > { %1588 = vmatmul.mubr.bf16.gmra.mrb[124].mxu1 %v5067_v25  ;;  %1941 = vmatmul.mubr.bf16.gmra.mrb[124].mxu0 %v5067_v25 }
 0x1aa   : > { %3287 = vst [vmem:[%s5142_s22 + $0xc0] sm:$0xff] %v3912_v45  ;;  %3383 = vst [vmem:[%s5142_s22 + $0x3c0] sm:$0xff] %v4008_v54  ;;  %v3915_v52 = vpack.c.bf16 %v1133_v55, %v1131_v63  ;;  %v4011_v6 = vpack.c.bf16 %v1293_v15, %v1291_v23  ;;  %1597 = vmatprep.mubr.bf16.mxu1 %v4759_v19  ;;  %1950 = vmatprep.mubr.bf16.mxu0 %v4759_v19 }
 0x1ac   : > { %3290 = vst [vmem:[%s5142_s22 + $0xd8] sm:$0xff] %v3915_v52  ;;  %3386 = vst [vmem:[%s5142_s22 + $0x3d8] sm:$0xff] %v4011_v6  ;;  %v1136_v42 = vpop.f32.mrb[20].mxu0  ;;  %v1296_v46 = vpop.f32.mrb[20].mxu1 }
 0x1ad   : > { %v1137_v50 = vadd.f32 %v1136_v42, %v5124_v26  ;;  %v1297_v62 = vadd.f32 %v1296_v46, %v5124_v26  ;;  %v1138_v10 = vpop.f32.mrb[21].mxu0  ;;  %v1298_v12 = vpop.f32.mrb[21].mxu1 }
 0x1ae   : > { %v1139_v25 = vadd.f32 %v1138_v10, %v5127_v28  ;;  %v1299_v36 = vadd.f32 %v1298_v12, %v5127_v28  ;;  %v1140_v18 = vpop.f32.mrb[22].mxu0  ;;  %v1300_v38 = vpop.f32.mrb[22].mxu1 }
 0x1af   : > { %v1141_v19 = vadd.f32 %v1140_v18, %v5124_v26  ;;  %v1301_v0 = vadd.f32 %v1300_v38, %v5124_v26  ;;  %v1142_v2 = vpop.f32.mrb[23].mxu0  ;;  %v1302_v34 = vpop.f32.mrb[23].mxu1 }
 0x1b0   : > { %v3918_v40 = vpack.c.bf16 %v1139_v25, %v1137_v50  ;;  %v4014_v8 = vpack.c.bf16 %v1299_v36, %v1297_v62  ;;  %v1143_v14 = vadd.f32 %v1142_v2, %v5127_v28  ;;  %v1303_v30 = vadd.f32 %v1302_v34, %v5127_v28 }
 0x1b1   : > { %1598 = vmatmul.mubr.bf16.gmra.mrb[128].mxu1 %v4773_v49  ;;  %1951 = vmatmul.mubr.bf16.gmra.mrb[128].mxu0 %v4773_v49 }
 0x1b2   : > { %3293 = vst [vmem:[%s5142_s22 + $0xf0] sm:$0xff] %v3918_v40  ;;  %3389 = vst [vmem:[%s5142_s22 + $0x3f0] sm:$0xff] %v4014_v8  ;;  %v3921_v31 = vpack.c.bf16 %v1143_v14, %v1141_v19  ;;  %v4017_v32 = vpack.c.bf16 %v1303_v30, %v1301_v0  ;;  %1607 = vmatprep.mubr.bf16.mxu1 %v4777_v53  ;;  %1960 = vmatprep.mubr.bf16.mxu0 %v4777_v53 }
 0x1b4   : > { %3296 = vst [vmem:[%s5142_s22 + $0x108] sm:$0xff] %v3921_v31  ;;  %3392 = vst [vmem:[%s5142_s22 + $0x408] sm:$0xff] %v4017_v32  ;;  %v1146_v17 = vpop.f32.mrb[24].mxu0  ;;  %v1306_v33 = vpop.f32.mrb[24].mxu1 }
 0x1b5   : > { %v1147_v58 = vadd.f32 %v1146_v17, %v5124_v26  ;;  %v1307_v59 = vadd.f32 %v1306_v33, %v5124_v26  ;;  %v1148_v20 = vpop.f32.mrb[25].mxu0  ;;  %v1308_v56 = vpop.f32.mrb[25].mxu1 }
 0x1b6   : > { %v1149_v49 = vadd.f32 %v1148_v20, %v5127_v28  ;;  %v1309_v60 = vadd.f32 %v1308_v56, %v5127_v28  ;;  %v1150_v43 = vpop.f32.mrb[26].mxu0  ;;  %v1310_v22 = vpop.f32.mrb[26].mxu1 }
 0x1b7   : > { %v1151_v53 = vadd.f32 %v1150_v43, %v5124_v26  ;;  %v1311_v63 = vadd.f32 %v1310_v22, %v5124_v26  ;;  %v1152_v23 = vpop.f32.mrb[27].mxu0  ;;  %v1312_v24 = vpop.f32.mrb[27].mxu1 }
 0x1b8   : > { %v3924_v44 = vpack.c.bf16 %v1149_v49, %v1147_v58  ;;  %v4020_v45 = vpack.c.bf16 %v1309_v60, %v1307_v59  ;;  %v1153_v54 = vadd.f32 %v1152_v23, %v5127_v28  ;;  %v1313_v55 = vadd.f32 %v1312_v24, %v5127_v28 }
 0x1b9   : > { %1608 = vmatmul.mubr.bf16.gmra.mrb[132].mxu1 %v4793_v5  ;;  %1961 = vmatmul.mubr.bf16.gmra.mrb[132].mxu0 %v4793_v5 }
 0x1ba   : > { %3299 = vst [vmem:[%s5142_s22 + $0x120] sm:$0xff] %v3924_v44  ;;  %3395 = vst [vmem:[%s5142_s22 + $0x420] sm:$0xff] %v4020_v45  ;;  %v3927_v15 = vpack.c.bf16 %v1153_v54, %v1151_v53  ;;  %v4023_v52 = vpack.c.bf16 %v1313_v55, %v1311_v63  ;;  %1617 = vmatprep.mubr.bf16.mxu1 %v4797_v7  ;;  %1970 = vmatprep.mubr.bf16.mxu0 %v4797_v7 }
 0x1bc   : > { %3302 = vst [vmem:[%s5142_s22 + $0x138] sm:$0xff] %v3927_v15  ;;  %3398 = vst [vmem:[%s5142_s22 + $0x438] sm:$0xff] %v4023_v52  ;;  %v1156_v6 = vpop.f32.mrb[28].mxu0  ;;  %v1316_v42 = vpop.f32.mrb[28].mxu1 }
 0x1bd   : > { %v1157_v46 = vadd.f32 %v1156_v6, %v5124_v26  ;;  %v1317_v50 = vadd.f32 %v1316_v42, %v5124_v26  ;;  %v1158_v62 = vpop.f32.mrb[29].mxu0  ;;  %v1318_v10 = vpop.f32.mrb[29].mxu1 }
 0x1be   : > { %v1159_v5 = vadd.f32 %v1158_v62, %v5127_v28  ;;  %v1319_v12 = vadd.f32 %v1318_v10, %v5127_v28  ;;  %v1160_v25 = vpop.f32.mrb[30].mxu0  ;;  %v1320_v36 = vpop.f32.mrb[30].mxu1 }
 0x1bf   : > { %v1161_v7 = vadd.f32 %v1160_v25, %v5124_v26  ;;  %v1321_v18 = vadd.f32 %v1320_v36, %v5124_v26  ;;  %v1162_v38 = vpop.f32.mrb[31].mxu0  ;;  %v1322_v19 = vpop.f32.mrb[31].mxu1 }
 0x1c0   : > { %v3930_v0 = vpack.c.bf16 %v1159_v5, %v1157_v46  ;;  %v4026_v2 = vpack.c.bf16 %v1319_v12, %v1317_v50  ;;  %v1163_v34 = vadd.f32 %v1162_v38, %v5127_v28  ;;  %v1323_v40 = vadd.f32 %v1322_v19, %v5127_v28 }
 0x1c1   : > { %1618 = vmatmul.mubr.bf16.gmra.mrb[136].mxu1 %v4813_v27  ;;  %1971 = vmatmul.mubr.bf16.gmra.mrb[136].mxu0 %v4813_v27 }
 0x1c2   : > { %3305 = vst [vmem:[%s5142_s22 + $0x150] sm:$0xff] %v3930_v0  ;;  %3401 = vst [vmem:[%s5142_s22 + $0x450] sm:$0xff] %v4026_v2  ;;  %v3933_v8 = vpack.c.bf16 %v1163_v34, %v1161_v7  ;;  %v4029_v14 = vpack.c.bf16 %v1323_v40, %v1321_v18  ;;  %1627 = vmatprep.mubr.bf16.mxu1 %v4817_v29  ;;  %1980 = vmatprep.mubr.bf16.mxu0 %v4817_v29 }
 0x1c4   : > { %3308 = vst [vmem:[%s5142_s22 + $0x168] sm:$0xff] %v3933_v8  ;;  %3404 = vst [vmem:[%s5142_s22 + $0x468] sm:$0xff] %v4029_v14  ;;  %v1166_v30 = vpop.f32.mrb[32].mxu0  ;;  %v1326_v31 = vpop.f32.mrb[32].mxu1 }
 0x1c5   : > { %v1167_v32 = vadd.f32 %v1166_v30, %v5124_v26  ;;  %v1327_v17 = vadd.f32 %v1326_v31, %v5124_v26  ;;  %v1168_v33 = vpop.f32.mrb[33].mxu0  ;;  %v1328_v58 = vpop.f32.mrb[33].mxu1 }
 0x1c6   : > { %v1169_v27 = vadd.f32 %v1168_v33, %v5127_v28  ;;  %v1329_v59 = vadd.f32 %v1328_v58, %v5127_v28  ;;  %v1170_v20 = vpop.f32.mrb[34].mxu0  ;;  %v1330_v56 = vpop.f32.mrb[34].mxu1 }
 0x1c7   : > { %v1171_v29 = vadd.f32 %v1170_v20, %v5124_v26  ;;  %v1331_v49 = vadd.f32 %v1330_v56, %v5124_v26  ;;  %v1172_v60 = vpop.f32.mrb[35].mxu0  ;;  %v1332_v43 = vpop.f32.mrb[35].mxu1 }
 0x1c8   : > { %v3936_v22 = vpack.c.bf16 %v1169_v27, %v1167_v32  ;;  %v4032_v53 = vpack.c.bf16 %v1329_v59, %v1327_v17  ;;  %v1173_v63 = vadd.f32 %v1172_v60, %v5127_v28  ;;  %v1333_v23 = vadd.f32 %v1332_v43, %v5127_v28 }
 0x1c9   : > { %1628 = vmatmul.mubr.bf16.gmra.mrb[140].mxu1 %v4833_v47  ;;  %1981 = vmatmul.mubr.bf16.gmra.mrb[140].mxu0 %v4833_v47 }
 0x1ca   : > { %3311 = vst [vmem:[%s5142_s22 + $0x180] sm:$0xff] %v3936_v22  ;;  %3407 = vst [vmem:[%s5142_s22 + $0x480] sm:$0xff] %v4032_v53  ;;  %v3939_v24 = vpack.c.bf16 %v1173_v63, %v1171_v29  ;;  %v4035_v44 = vpack.c.bf16 %v1333_v23, %v1331_v49  ;;  %1637 = vmatprep.mubr.bf16.mxu1 %v4837_v51  ;;  %1990 = vmatprep.mubr.bf16.mxu0 %v4837_v51 }
 0x1cc   : > { %3314 = vst [vmem:[%s5142_s22 + $0x198] sm:$0xff] %v3939_v24  ;;  %3410 = vst [vmem:[%s5142_s22 + $0x498] sm:$0xff] %v4035_v44  ;;  %v1176_v45 = vpop.f32.mrb[36].mxu0  ;;  %v1336_v54 = vpop.f32.mrb[36].mxu1 }
 0x1cd   : > { %v1177_v55 = vadd.f32 %v1176_v45, %v5124_v26  ;;  %v1337_v15 = vadd.f32 %v1336_v54, %v5124_v26  ;;  %v1178_v52 = vpop.f32.mrb[37].mxu0  ;;  %v1338_v6 = vpop.f32.mrb[37].mxu1 }
 0x1ce   : > { %v1179_v47 = vadd.f32 %v1178_v52, %v5127_v28  ;;  %v1339_v42 = vadd.f32 %v1338_v6, %v5127_v28  ;;  %v1180_v46 = vpop.f32.mrb[38].mxu0  ;;  %v1340_v50 = vpop.f32.mrb[38].mxu1 }
 0x1cf   : > { %v1181_v51 = vadd.f32 %v1180_v46, %v5124_v26  ;;  %v1341_v62 = vadd.f32 %v1340_v50, %v5124_v26  ;;  %v1182_v10 = vpop.f32.mrb[39].mxu0  ;;  %v1342_v5 = vpop.f32.mrb[39].mxu1 }
 0x1d0   : > { %v3942_v12 = vpack.c.bf16 %v1179_v47, %v1177_v55  ;;  %v4038_v25 = vpack.c.bf16 %v1339_v42, %v1337_v15  ;;  %v1183_v36 = vadd.f32 %v1182_v10, %v5127_v28  ;;  %v1343_v7 = vadd.f32 %v1342_v5, %v5127_v28 }
 0x1d1   : > { %1638 = vmatmul.mubr.bf16.gmra.mrb[144].mxu1 %v4853_v11  ;;  %1991 = vmatmul.mubr.bf16.gmra.mrb[144].mxu0 %v4853_v11 }
 0x1d2   : > { %3317 = vst [vmem:[%s5142_s22 + $0x1b0] sm:$0xff] %v3942_v12  ;;  %3413 = vst [vmem:[%s5142_s22 + $0x4b0] sm:$0xff] %v4038_v25  ;;  %v3945_v18 = vpack.c.bf16 %v1183_v36, %v1181_v51  ;;  %v4041_v38 = vpack.c.bf16 %v1343_v7, %v1341_v62  ;;  %1647 = vmatprep.mubr.bf16.mxu1 %v4857_v13  ;;  %2000 = vmatprep.mubr.bf16.mxu0 %v4857_v13 }
 0x1d4   : > { %3320 = vst [vmem:[%s5142_s22 + $0x1c8] sm:$0xff] %v3945_v18  ;;  %3416 = vst [vmem:[%s5142_s22 + $0x4c8] sm:$0xff] %v4041_v38  ;;  %v1186_v19 = vpop.f32.mrb[40].mxu0  ;;  %v1346_v0 = vpop.f32.mrb[40].mxu1 }
 0x1d5   : > { %v1187_v2 = vadd.f32 %v1186_v19, %v5124_v26  ;;  %v1347_v34 = vadd.f32 %v1346_v0, %v5124_v26  ;;  %v1188_v40 = vpop.f32.mrb[41].mxu0  ;;  %v1348_v8 = vpop.f32.mrb[41].mxu1 }
 0x1d6   : > { %v1189_v11 = vadd.f32 %v1188_v40, %v5127_v28  ;;  %v1349_v14 = vadd.f32 %v1348_v8, %v5127_v28  ;;  %v1190_v30 = vpop.f32.mrb[42].mxu0  ;;  %v1350_v31 = vpop.f32.mrb[42].mxu1 }
 0x1d7   : > { %v1191_v13 = vadd.f32 %v1190_v30, %v5124_v26  ;;  %v1351_v32 = vadd.f32 %v1350_v31, %v5124_v26  ;;  %v1192_v17 = vpop.f32.mrb[43].mxu0  ;;  %v1352_v33 = vpop.f32.mrb[43].mxu1 }
 0x1d8   : > { %v3948_v58 = vpack.c.bf16 %v1189_v11, %v1187_v2  ;;  %v4044_v27 = vpack.c.bf16 %v1349_v14, %v1347_v34  ;;  %v1193_v59 = vadd.f32 %v1192_v17, %v5127_v28  ;;  %v1353_v20 = vadd.f32 %v1352_v33, %v5127_v28 }
 0x1d9   : > { %1648 = vmatmul.mubr.bf16.gmra.mrb[148].mxu1 %v4873_v37  ;;  %2001 = vmatmul.mubr.bf16.gmra.mrb[148].mxu0 %v4873_v37 }
 0x1da   : > { %3323 = vst [vmem:[%s5142_s22 + $0x1e0] sm:$0xff] %v3948_v58  ;;  %3419 = vst [vmem:[%s5142_s22 + $0x4e0] sm:$0xff] %v4044_v27  ;;  %v3951_v56 = vpack.c.bf16 %v1193_v59, %v1191_v13  ;;  %v4047_v29 = vpack.c.bf16 %v1353_v20, %v1351_v32  ;;  %1657 = vmatprep.mubr.bf16.mxu1 %v4877_v39  ;;  %2010 = vmatprep.mubr.bf16.mxu0 %v4877_v39 }
 0x1dc   : > { %3326 = vst [vmem:[%s5142_s22 + $0x1f8] sm:$0xff] %v3951_v56  ;;  %3422 = vst [vmem:[%s5142_s22 + $0x4f8] sm:$0xff] %v4047_v29  ;;  %v1196_v49 = vpop.f32.mrb[44].mxu0  ;;  %v1356_v60 = vpop.f32.mrb[44].mxu1 }
 0x1dd   : > { %v1197_v43 = vadd.f32 %v1196_v49, %v5124_v26  ;;  %v1357_v22 = vadd.f32 %v1356_v60, %v5124_v26  ;;  %v1198_v53 = vpop.f32.mrb[45].mxu0  ;;  %v1358_v63 = vpop.f32.mrb[45].mxu1 }
 0x1de   : > { %v1199_v37 = vadd.f32 %v1198_v53, %v5127_v28  ;;  %v1359_v23 = vadd.f32 %v1358_v63, %v5127_v28  ;;  %v1200_v24 = vpop.f32.mrb[46].mxu0  ;;  %v1360_v44 = vpop.f32.mrb[46].mxu1 }
 0x1df   : > { %v1201_v39 = vadd.f32 %v1200_v24, %v5124_v26  ;;  %v1361_v45 = vadd.f32 %v1360_v44, %v5124_v26  ;;  %v1202_v54 = vpop.f32.mrb[47].mxu0  ;;  %v1362_v55 = vpop.f32.mrb[47].mxu1 }
 0x1e0   : > { %v3954_v15 = vpack.c.bf16 %v1199_v37, %v1197_v43  ;;  %v4050_v52 = vpack.c.bf16 %v1359_v23, %v1357_v22  ;;  %v1203_v6 = vadd.f32 %v1202_v54, %v5127_v28  ;;  %v1363_v47 = vadd.f32 %v1362_v55, %v5127_v28 }
 0x1e1   : > { %1658 = vmatmul.mubr.bf16.gmra.mrb[152].mxu1 %v4893_v1  ;;  %2011 = vmatmul.mubr.bf16.gmra.mrb[152].mxu0 %v4893_v1 }
 0x1e2   : > { %3329 = vst [vmem:[%s5142_s22 + $0x210] sm:$0xff] %v3954_v15  ;;  %3425 = vst [vmem:[%s5142_s22 + $0x510] sm:$0xff] %v4050_v52  ;;  %v3957_v42 = vpack.c.bf16 %v1203_v6, %v1201_v39  ;;  %v4053_v46 = vpack.c.bf16 %v1363_v47, %v1361_v45  ;;  %1667 = vmatprep.mubr.bf16.mxu1 %v4897_v3  ;;  %2020 = vmatprep.mubr.bf16.mxu0 %v4897_v3 }
 0x1e4   : > { %3332 = vst [vmem:[%s5142_s22 + $0x228] sm:$0xff] %v3957_v42  ;;  %3428 = vst [vmem:[%s5142_s22 + $0x528] sm:$0xff] %v4053_v46  ;;  %v1206_v50 = vpop.f32.mrb[48].mxu0  ;;  %v1366_v51 = vpop.f32.mrb[48].mxu1 }
 0x1e5   : > { %v1207_v62 = vadd.f32 %v1206_v50, %v5124_v26  ;;  %v1367_v10 = vadd.f32 %v1366_v51, %v5124_v26  ;;  %v1208_v5 = vpop.f32.mrb[49].mxu0  ;;  %v1368_v12 = vpop.f32.mrb[49].mxu1  ;;  %v5912_v51 = vld [vmem:[#allocation12_spill] sm:$0xff] }
 0x1e6   : > { %v1209_v1 = vadd.f32 %v1208_v5, %v5127_v28  ;;  %v1369_v25 = vadd.f32 %v1368_v12, %v5127_v28  ;;  %v1210_v36 = vpop.f32.mrb[50].mxu0  ;;  %v1370_v7 = vpop.f32.mrb[50].mxu1  ;;  %v5913_v5 = vld [vmem:[#allocation13_spill] sm:$0xff] }
 0x1e7   : > { %v1211_v3 = vadd.f32 %v1210_v36, %v5124_v26  ;;  %v1371_v18 = vadd.f32 %v1370_v7, %v5124_v26  ;;  %v1212_v38 = vpop.f32.mrb[51].mxu0  ;;  %v1372_v19 = vpop.f32.mrb[51].mxu1 }
 0x1e8   : > { %v3960_v0 = vpack.c.bf16 %v1209_v1, %v1207_v62  ;;  %v4056_v2 = vpack.c.bf16 %v1369_v25, %v1367_v10  ;;  %v1213_v34 = vadd.f32 %v1212_v38, %v5127_v28  ;;  %v1373_v40 = vadd.f32 %v1372_v19, %v5127_v28 }
 0x1e9   : > { %1668 = vmatmul.mubr.bf16.gmra.mrb[156].mxu1 %v4913_v35  ;;  %2021 = vmatmul.mubr.bf16.gmra.mrb[156].mxu0 %v4913_v35  ;;  %v552_v25 = vsub.s32 2, %v5113_v48  ;;  %v560_v38 = vsub.s32 4, %v5113_v48  ;;  %v556_v19 = vsub.s32 3, %v5113_v48 }
 0x1ea   : > { %3335 = vst [vmem:[%s5142_s22 + $0x240] sm:$0xff] %v3960_v0  ;;  %3431 = vst [vmem:[%s5142_s22 + $0x540] sm:$0xff] %v4056_v2  ;;  %v3963_v8 = vpack.c.bf16 %v1213_v34, %v1211_v3  ;;  %v4059_v11 = vpack.c.bf16 %v1373_v40, %v1371_v18  ;;  %1677 = vmatprep.mubr.bf16.mxu1 %v4917_v41  ;;  %2030 = vmatprep.mubr.bf16.mxu0 %v4917_v41 }
 0x1ec   : > { %3338 = vst [vmem:[%s5142_s22 + $0x258] sm:$0xff] %v3963_v8  ;;  %3434 = vst [vmem:[%s5142_s22 + $0x558] sm:$0xff] %v4059_v11  ;;  %v1216_v14 = vpop.f32.mrb[52].mxu0  ;;  %v1376_v30 = vpop.f32.mrb[52].mxu1  ;;  %v564_v8 = vsub.s32 5, %v5113_v48  ;;  %v5389_v48 = vrot.slane %v5118_v4, %v552_v25 }
 0x1ed   : > { %v1217_v31 = vadd.f32 %v1216_v14, %v5124_v26  ;;  %v1377_v13 = vadd.f32 %v1376_v30, %v5124_v26  ;;  %v1218_v32 = vpop.f32.mrb[53].mxu0  ;;  %v1378_v17 = vpop.f32.mrb[53].mxu1 }
 0x1ee   : > { %v1219_v35 = vadd.f32 %v1218_v32, %v5127_v28  ;;  %v1379_v33 = vadd.f32 %v1378_v17, %v5127_v28  ;;  %v1220_v58 = vpop.f32.mrb[54].mxu0  ;;  %v1380_v27 = vpop.f32.mrb[54].mxu1 }
 0x1ef   : > { %v1221_v41 = vadd.f32 %v1220_v58, %v5124_v26  ;;  %v1381_v59 = vadd.f32 %v1380_v27, %v5124_v26  ;;  %v1222_v20 = vpop.f32.mrb[55].mxu0  ;;  %v1382_v56 = vpop.f32.mrb[55].mxu1  ;;  %v5392_v58 = vrot.slane %v5118_v4, %v560_v38 }
 0x1f0   : > { %v3966_v29 = vpack.c.bf16 %v1219_v35, %v1217_v31  ;;  %v4062_v49 = vpack.c.bf16 %v1379_v33, %v1377_v13  ;;  %v1223_v60 = vadd.f32 %v1222_v20, %v5127_v28  ;;  %v1383_v43 = vadd.f32 %v1382_v56, %v5127_v28  ;;  %v5914_v33 = vld [vmem:[#allocation14_spill] sm:$0xff] }
 0x1f1   : > { %1678 = vmatmul.mubr.bf16.gmra.mrb[160].mxu1 %v4933_v9  ;;  %2031 = vmatmul.mubr.bf16.gmra.mrb[160].mxu0 %v4933_v9 }
 0x1f2   : > { %3341 = vst [vmem:[%s5142_s22 + $0x270] sm:$0xff] %v3966_v29  ;;  %3437 = vst [vmem:[%s5142_s22 + $0x570] sm:$0xff] %v4062_v49  ;;  %v3969_v22 = vpack.c.bf16 %v1223_v60, %v1221_v41  ;;  %v4065_v53 = vpack.c.bf16 %v1383_v43, %v1381_v59  ;;  %1687 = vmatprep.mubr.bf16.mxu1 %v4937_v16  ;;  %2040 = vmatprep.mubr.bf16.mxu0 %v4937_v16 }
 0x1f3   : > { %v5400_v59 = vrot.slane %v5118_v4, %v564_v8 }
 0x1f4   : > { %3344 = vst [vmem:[%s5142_s22 + $0x288] sm:$0xff] %v3969_v22  ;;  %3440 = vst [vmem:[%s5142_s22 + $0x588] sm:$0xff] %v4065_v53  ;;  %v1226_v63 = vpop.f32.mrb[56].mxu0  ;;  %v1386_v37 = vpop.f32.mrb[56].mxu1 }
 0x1f5   : > { %v1227_v23 = vadd.f32 %v1226_v63, %v5124_v26  ;;  %v1387_v24 = vadd.f32 %v1386_v37, %v5124_v26  ;;  %v1228_v44 = vpop.f32.mrb[57].mxu0  ;;  %v1388_v39 = vpop.f32.mrb[57].mxu1 }
 0x1f6   : > { %v1229_v9 = vadd.f32 %v1228_v44, %v5127_v28  ;;  %v1389_v45 = vadd.f32 %v1388_v39, %v5127_v28  ;;  %v1230_v54 = vpop.f32.mrb[58].mxu0  ;;  %v1390_v55 = vpop.f32.mrb[58].mxu1 }
 0x1f7   : > { %v1231_v16 = vadd.f32 %v1230_v54, %v5124_v26  ;;  %v1391_v15 = vadd.f32 %v1390_v55, %v5124_v26  ;;  %v1232_v52 = vpop.f32.mrb[59].mxu0  ;;  %v1392_v6 = vpop.f32.mrb[59].mxu1  ;;  %v5916_v55 = vld [vmem:[#allocation16_spill] sm:$0xff] }
 0x1f8   : > { %v3972_v47 = vpack.c.bf16 %v1229_v9, %v1227_v23  ;;  %v4068_v42 = vpack.c.bf16 %v1389_v45, %v1387_v24  ;;  %v1233_v46 = vadd.f32 %v1232_v52, %v5127_v28  ;;  %v1393_v50 = vadd.f32 %v1392_v6, %v5127_v28  ;;  %v5917_v52 = vld [vmem:[#allocation17_spill] sm:$0xff] }
 0x1f9   : > { %1688 = vmatmul.mubr.bf16.gmra.mrb[164].mxu1 %v5912_v51  ;;  %2041 = vmatmul.mubr.bf16.gmra.mrb[164].mxu0 %v5912_v51 }
 0x1fa   : > { %3347 = vst [vmem:[%s5142_s22 + $0x2a0] sm:$0xff] %v3972_v47  ;;  %3443 = vst [vmem:[%s5142_s22 + $0x5a0] sm:$0xff] %v4068_v42  ;;  %v3975_v62 = vpack.c.bf16 %v1233_v46, %v1231_v16  ;;  %v4071_v10 = vpack.c.bf16 %v1393_v50, %v1391_v15  ;;  %1697 = vmatprep.mubr.bf16.mxu1 %v5913_v5  ;;  %2050 = vmatprep.mubr.bf16.mxu0 %v5913_v5 }
 0x1fc   : > { %3350 = vst [vmem:[%s5142_s22 + $0x2b8] sm:$0xff] %v3975_v62  ;;  %3446 = vst [vmem:[%s5142_s22 + $0x5b8] sm:$0xff] %v4071_v10  ;;  %v1236_v12 = vpop.f32.mrb[60].mxu0  ;;  %v1396_v1 = vpop.f32.mrb[60].mxu1 }
 0x1fd   : > { %v1237_v36 = vadd.f32 %v1236_v12, %v5124_v26  ;;  %v1397_v7 = vadd.f32 %v1396_v1, %v5124_v26  ;;  %v1238_v3 = vpop.f32.mrb[61].mxu0  ;;  %v1398_v18 = vpop.f32.mrb[61].mxu1 }
 0x1fe   : > { %v1239_v0 = vadd.f32 %v1238_v3, %v5127_v28  ;;  %v1399_v2 = vadd.f32 %v1398_v18, %v5127_v28  ;;  %v1240_v34 = vpop.f32.mrb[62].mxu0  ;;  %v1400_v40 = vpop.f32.mrb[62].mxu1 }
 0x1ff   : > { %v1241_v11 = vadd.f32 %v1240_v34, %v5124_v26  ;;  %v1401_v14 = vadd.f32 %v1400_v40, %v5124_v26  ;;  %v1242_v30 = vpop.f32.mrb[63].mxu0  ;;  %v1402_v31 = vpop.f32.mrb[63].mxu1  ;;  %v5395_v26 = vrot.slane %v5118_v4, %v556_v19  ;;  %v5919_v40 = vld [vmem:[#allocation19_spill] sm:$0xff] }
 0x200   : > { %v3978_v13 = vpack.c.bf16 %v1239_v0, %v1237_v36  ;;  %v4074_v32 = vpack.c.bf16 %v1399_v2, %v1397_v7  ;;  %v1243_v17 = vadd.f32 %v1242_v30, %v5127_v28  ;;  %v1403_v35 = vadd.f32 %v1402_v31, %v5127_v28  ;;  %v5915_v28 = vld [vmem:[#allocation15_spill] sm:$0xff]  ;;  %v5918_v0 = vld [vmem:[#allocation18_spill] sm:$0xff] }
 0x201   : > { %1698 = vmatmul.mubr.bf16.gmra.mrb[168].mxu1 %v5914_v33  ;;  %2051 = vmatmul.mubr.bf16.gmra.mrb[168].mxu0 %v5914_v33 }
 0x202   : > { %3353 = vst [vmem:[%s5142_s22 + $0x2d0] sm:$0xff] %v3978_v13  ;;  %3449 = vst [vmem:[%s5142_s22 + $0x5d0] sm:$0xff] %v4074_v32  ;;  %v3981_v27 = vpack.c.bf16 %v1243_v17, %v1241_v11  ;;  %v4077_v41 = vpack.c.bf16 %v1403_v35, %v1401_v14  ;;  %1707 = vmatprep.mubr.bf16.mxu1 %v5915_v28  ;;  %2060 = vmatprep.mubr.bf16.mxu0 %v5915_v28 }
 0x204   : > { %3356 = vst [vmem:[%s5142_s22 + $0x2e8] sm:$0xff] %v3981_v27  ;;  %3452 = vst [vmem:[%s5142_s22 + $0x5e8] sm:$0xff] %v4077_v41  ;;  %v1439_v20 = vpop.f32.mrb[64].mxu1  ;;  %v1792_v56 = vpop.f32.mrb[64].mxu0 }
 0x205   : > { %v1440_v29 = vadd.f32 %v1439_v20, %v5389_v48  ;;  %v1793_v49 = vadd.f32 %v1792_v56, %v5392_v58  ;;  %v1441_v60 = vpop.f32.mrb[65].mxu1  ;;  %v1794_v43 = vpop.f32.mrb[65].mxu0 }
 0x206   : > { %v1442_v22 = vadd.f32 %v1441_v60, %v5395_v26  ;;  %v1795_v4 = vadd.f32 %v1794_v43, %v5400_v59  ;;  %v1443_v53 = vpop.f32.mrb[66].mxu1  ;;  %v1796_v63 = vpop.f32.mrb[66].mxu0  ;;  %v5920_v43 = vld [vmem:[#allocation20_spill] sm:$0xff] }
 0x207   : > { %v1444_v37 = vadd.f32 %v1443_v53, %v5389_v48  ;;  %v1797_v23 = vadd.f32 %v1796_v63, %v5392_v58  ;;  %v1445_v24 = vpop.f32.mrb[67].mxu1  ;;  %v1798_v44 = vpop.f32.mrb[67].mxu0  ;;  %v5921_v53 = vld [vmem:[#allocation21_spill] sm:$0xff] }
 0x208   : > { %v3889_v39 = vpack.c.bf16 %v1442_v22, %v1440_v29  ;;  %v3890_v9 = vpack.c.bf16 %v1795_v4, %v1793_v49  ;;  %v1446_v45 = vadd.f32 %v1445_v24, %v5395_v26  ;;  %v1799_v54 = vadd.f32 %v1798_v44, %v5400_v59 }
 0x209   : > { %1708 = vmatmul.mubr.bf16.gmra.mrb[172].mxu1 %v5916_v55  ;;  %2061 = vmatmul.mubr.bf16.gmra.mrb[172].mxu0 %v5916_v55 }
 0x20a   : > { %3264 = vst [vmem:[%s5142_s22 + $0x8] sm:$0xff] %v3889_v39  ;;  %3265 = vst [vmem:[%s5142_s22 + $0x10] sm:$0xff] %v3890_v9  ;;  %v3892_v16 = vpack.c.bf16 %v1446_v45, %v1444_v37  ;;  %v3893_v15 = vpack.c.bf16 %v1799_v54, %v1797_v23  ;;  %1717 = vmatprep.mubr.bf16.mxu1 %v5917_v52  ;;  %2070 = vmatprep.mubr.bf16.mxu0 %v5917_v52 }
 0x20c   : > { %3267 = vst [vmem:[%s5142_s22 + $0x20] sm:$0xff] %v3892_v16  ;;  %3268 = vst [vmem:[%s5142_s22 + $0x28] sm:$0xff] %v3893_v15  ;;  %v1449_v6 = vpop.f32.mrb[68].mxu1  ;;  %v1802_v47 = vpop.f32.mrb[68].mxu0 }
 0x20d   : > { %v1450_v42 = vadd.f32 %v1449_v6, %v5389_v48  ;;  %v1803_v46 = vadd.f32 %v1802_v47, %v5392_v58  ;;  %v1451_v50 = vpop.f32.mrb[69].mxu1  ;;  %v1804_v51 = vpop.f32.mrb[69].mxu0 }
 0x20e   : > { %v1452_v62 = vadd.f32 %v1451_v50, %v5395_v26  ;;  %v1805_v10 = vadd.f32 %v1804_v51, %v5400_v59  ;;  %v1453_v5 = vpop.f32.mrb[70].mxu1  ;;  %v1806_v12 = vpop.f32.mrb[70].mxu0 }
 0x20f   : > { %v1454_v1 = vadd.f32 %v1453_v5, %v5389_v48  ;;  %v1807_v25 = vadd.f32 %v1806_v12, %v5392_v58  ;;  %v1455_v36 = vpop.f32.mrb[71].mxu1  ;;  %v1808_v7 = vpop.f32.mrb[71].mxu0 }
 0x210   : > { %v3895_v3 = vpack.c.bf16 %v1452_v62, %v1450_v42  ;;  %v3896_v18 = vpack.c.bf16 %v1805_v10, %v1803_v46  ;;  %v1456_v38 = vadd.f32 %v1455_v36, %v5395_v26  ;;  %v1809_v19 = vadd.f32 %v1808_v7, %v5400_v59 }
 0x211   : > { %1718 = vmatmul.mubr.bf16.gmra.mrb[176].mxu1 %v5918_v0  ;;  %2071 = vmatmul.mubr.bf16.gmra.mrb[176].mxu0 %v5918_v0 }
 0x212   : > { %3270 = vst [vmem:[%s5142_s22 + $0x38] sm:$0xff] %v3895_v3  ;;  %3271 = vst [vmem:[%s5142_s22 + $0x40] sm:$0xff] %v3896_v18  ;;  %v3898_v2 = vpack.c.bf16 %v1456_v38, %v1454_v1  ;;  %v3899_v34 = vpack.c.bf16 %v1809_v19, %v1807_v25  ;;  %1727 = vmatprep.mubr.bf16.mxu1 %v5919_v40  ;;  %2080 = vmatprep.mubr.bf16.mxu0 %v5919_v40 }
 0x214   : > { %3273 = vst [vmem:[%s5142_s22 + $0x50] sm:$0xff] %v3898_v2  ;;  %3274 = vst [vmem:[%s5142_s22 + $0x58] sm:$0xff] %v3899_v34  ;;  %v1459_v8 = vpop.f32.mrb[72].mxu1  ;;  %v1812_v11 = vpop.f32.mrb[72].mxu0 }
 0x215   : > { %v1460_v14 = vadd.f32 %v1459_v8, %v5389_v48  ;;  %v1813_v30 = vadd.f32 %v1812_v11, %v5392_v58  ;;  %v1461_v31 = vpop.f32.mrb[73].mxu1  ;;  %v1814_v13 = vpop.f32.mrb[73].mxu0 }
 0x216   : > { %v1462_v32 = vadd.f32 %v1461_v31, %v5395_v26  ;;  %v1815_v17 = vadd.f32 %v1814_v13, %v5400_v59  ;;  %v1463_v35 = vpop.f32.mrb[74].mxu1  ;;  %v1816_v33 = vpop.f32.mrb[74].mxu0 }
 0x217   : > { %v1464_v27 = vadd.f32 %v1463_v35, %v5389_v48  ;;  %v1817_v41 = vadd.f32 %v1816_v33, %v5392_v58  ;;  %v1465_v28 = vpop.f32.mrb[75].mxu1  ;;  %v1818_v20 = vpop.f32.mrb[75].mxu0 }
 0x218   : > { %v3901_v56 = vpack.c.bf16 %v1462_v32, %v1460_v14  ;;  %v3902_v29 = vpack.c.bf16 %v1815_v17, %v1813_v30  ;;  %v1466_v49 = vadd.f32 %v1465_v28, %v5395_v26  ;;  %v1819_v60 = vadd.f32 %v1818_v20, %v5400_v59 }
 0x219   : > { %1728 = vmatmul.mubr.bf16.gmra.mrb[180].mxu1 %v5920_v43  ;;  %2081 = vmatmul.mubr.bf16.gmra.mrb[180].mxu0 %v5920_v43 }
 0x21a   : > { %3276 = vst [vmem:[%s5142_s22 + $0x68] sm:$0xff] %v3901_v56  ;;  %3277 = vst [vmem:[%s5142_s22 + $0x70] sm:$0xff] %v3902_v29  ;;  %v3904_v22 = vpack.c.bf16 %v1466_v49, %v1464_v27  ;;  %v3905_v4 = vpack.c.bf16 %v1819_v60, %v1817_v41  ;;  %1737 = vmatprep.mubr.bf16.mxu1 %v5921_v53  ;;  %2090 = vmatprep.mubr.bf16.mxu0 %v5921_v53 }
 0x21c   : > { %3279 = vst [vmem:[%s5142_s22 + $0x80] sm:$0xff] %v3904_v22  ;;  %3280 = vst [vmem:[%s5142_s22 + $0x88] sm:$0xff] %v3905_v4  ;;  %v1469_v63 = vpop.f32.mrb[76].mxu1  ;;  %v1822_v37 = vpop.f32.mrb[76].mxu0 }
 0x21d   : > { %v1470_v23 = vadd.f32 %v1469_v63, %v5389_v48  ;;  %v1823_v24 = vadd.f32 %v1822_v37, %v5392_v58  ;;  %v1471_v44 = vpop.f32.mrb[77].mxu1  ;;  %v1824_v39 = vpop.f32.mrb[77].mxu0 }
 0x21e   : > { %v1472_v9 = vadd.f32 %v1471_v44, %v5395_v26  ;;  %v1825_v45 = vadd.f32 %v1824_v39, %v5400_v59  ;;  %v1473_v54 = vpop.f32.mrb[78].mxu1  ;;  %v1826_v55 = vpop.f32.mrb[78].mxu0 }
 0x21f   : > { %v1474_v16 = vadd.f32 %v1473_v54, %v5389_v48  ;;  %v1827_v15 = vadd.f32 %v1826_v55, %v5392_v58  ;;  %v1475_v52 = vpop.f32.mrb[79].mxu1  ;;  %v1828_v6 = vpop.f32.mrb[79].mxu0 }
 0x220   : > { %v3907_v47 = vpack.c.bf16 %v1472_v9, %v1470_v23  ;;  %v3908_v42 = vpack.c.bf16 %v1825_v45, %v1823_v24  ;;  %v1476_v46 = vadd.f32 %v1475_v52, %v5395_v26  ;;  %v1829_v50 = vadd.f32 %v1828_v6, %v5400_v59 }
 0x221   : > { %1738 = vmatmul.mubr.bf16.gmra.mrb[184].mxu1 %v5053_v57  ;;  %2091 = vmatmul.mubr.bf16.gmra.mrb[184].mxu0 %v5053_v57 }
 0x222   : > { %3282 = vst [vmem:[%s5142_s22 + $0x98] sm:$0xff] %v3907_v47  ;;  %3283 = vst [vmem:[%s5142_s22 + $0xa0] sm:$0xff] %v3908_v42  ;;  %v3910_v51 = vpack.c.bf16 %v1476_v46, %v1474_v16  ;;  %v3911_v62 = vpack.c.bf16 %v1829_v50, %v1827_v15  ;;  %1747 = vmatprep.mubr.bf16.mxu1 %v5057_v61  ;;  %2100 = vmatprep.mubr.bf16.mxu0 %v5057_v61 }
 0x224   : > { %3285 = vst [vmem:[%s5142_s22 + $0xb0] sm:$0xff] %v3910_v51  ;;  %3286 = vst [vmem:[%s5142_s22 + $0xb8] sm:$0xff] %v3911_v62  ;;  %v1479_v10 = vpop.f32.mrb[80].mxu1  ;;  %v1832_v5 = vpop.f32.mrb[80].mxu0 }
 0x225   : > { %v1480_v12 = vadd.f32 %v1479_v10, %v5389_v48  ;;  %v1833_v1 = vadd.f32 %v1832_v5, %v5392_v58  ;;  %v1481_v25 = vpop.f32.mrb[81].mxu1  ;;  %v1834_v36 = vpop.f32.mrb[81].mxu0 }
 0x226   : > { %v1482_v57 = vadd.f32 %v1481_v25, %v5395_v26  ;;  %v1835_v7 = vadd.f32 %v1834_v36, %v5400_v59  ;;  %v1483_v3 = vpop.f32.mrb[82].mxu1  ;;  %v1836_v18 = vpop.f32.mrb[82].mxu0 }
 0x227   : > { %v1484_v61 = vadd.f32 %v1483_v3, %v5389_v48  ;;  %v1837_v38 = vadd.f32 %v1836_v18, %v5392_v58  ;;  %v1485_v19 = vpop.f32.mrb[83].mxu1  ;;  %v1838_v0 = vpop.f32.mrb[83].mxu0 }
 0x228   : > { %v3913_v2 = vpack.c.bf16 %v1482_v57, %v1480_v12  ;;  %v3914_v34 = vpack.c.bf16 %v1835_v7, %v1833_v1  ;;  %v1486_v40 = vadd.f32 %v1485_v19, %v5395_v26  ;;  %v1839_v8 = vadd.f32 %v1838_v0, %v5400_v59 }
 0x229   : > { %1748 = vmatmul.mubr.bf16.gmra.mrb[188].mxu1 %v5069_v21  ;;  %2101 = vmatmul.mubr.bf16.gmra.mrb[188].mxu0 %v5069_v21 }
 0x22a   : > { %3288 = vst [vmem:[%s5142_s22 + $0xc8] sm:$0xff] %v3913_v2  ;;  %3289 = vst [vmem:[%s5142_s22 + $0xd0] sm:$0xff] %v3914_v34  ;;  %v3916_v11 = vpack.c.bf16 %v1486_v40, %v1484_v61  ;;  %v3917_v14 = vpack.c.bf16 %v1839_v8, %v1837_v38 }
 0x22c   : > { %3291 = vst [vmem:[%s5142_s22 + $0xe0] sm:$0xff] %v3916_v11  ;;  %3292 = vst [vmem:[%s5142_s22 + $0xe8] sm:$0xff] %v3917_v14  ;;  %v1489_v30 = vpop.f32.mrb[84].mxu1  ;;  %v1842_v31 = vpop.f32.mrb[84].mxu0 }
 0x22d   : > { %v1490_v13 = vadd.f32 %v1489_v30, %v5389_v48  ;;  %v1843_v32 = vadd.f32 %v1842_v31, %v5392_v58  ;;  %v1491_v17 = vpop.f32.mrb[85].mxu1  ;;  %v1844_v35 = vpop.f32.mrb[85].mxu0 }
 0x22e   : > { %v1492_v33 = vadd.f32 %v1491_v17, %v5395_v26  ;;  %v1845_v21 = vadd.f32 %v1844_v35, %v5400_v59  ;;  %v1493_v27 = vpop.f32.mrb[86].mxu1  ;;  %v1846_v41 = vpop.f32.mrb[86].mxu0 }
 0x22f   : > { %v1494_v28 = vadd.f32 %v1493_v27, %v5389_v48  ;;  %v1847_v20 = vadd.f32 %v1846_v41, %v5392_v58  ;;  %v1495_v56 = vpop.f32.mrb[87].mxu1  ;;  %v1848_v29 = vpop.f32.mrb[87].mxu0 }
 0x230   : > { %v3919_v49 = vpack.c.bf16 %v1492_v33, %v1490_v13  ;;  %v3920_v60 = vpack.c.bf16 %v1845_v21, %v1843_v32  ;;  %v1496_v43 = vadd.f32 %v1495_v56, %v5395_v26  ;;  %v1849_v22 = vadd.f32 %v1848_v29, %v5400_v59 }
 0x232   : > { %3294 = vst [vmem:[%s5142_s22 + $0xf8] sm:$0xff] %v3919_v49  ;;  %3295 = vst [vmem:[%s5142_s22 + $0x100] sm:$0xff] %v3920_v60  ;;  %v3922_v4 = vpack.c.bf16 %v1496_v43, %v1494_v28  ;;  %v3923_v53 = vpack.c.bf16 %v1849_v22, %v1847_v20 }
 0x234   : > { %3297 = vst [vmem:[%s5142_s22 + $0x110] sm:$0xff] %v3922_v4  ;;  %3298 = vst [vmem:[%s5142_s22 + $0x118] sm:$0xff] %v3923_v53  ;;  %v1499_v63 = vpop.f32.mrb[88].mxu1  ;;  %v1852_v37 = vpop.f32.mrb[88].mxu0 }
 0x235   : > { %v1500_v23 = vadd.f32 %v1499_v63, %v5389_v48  ;;  %v1853_v24 = vadd.f32 %v1852_v37, %v5392_v58  ;;  %v1501_v44 = vpop.f32.mrb[89].mxu1  ;;  %v1854_v39 = vpop.f32.mrb[89].mxu0 }
 0x236   : > { %v1502_v9 = vadd.f32 %v1501_v44, %v5395_v26  ;;  %v1855_v45 = vadd.f32 %v1854_v39, %v5400_v59  ;;  %v1503_v54 = vpop.f32.mrb[90].mxu1  ;;  %v1856_v55 = vpop.f32.mrb[90].mxu0 }
 0x237   : > { %v1504_v16 = vadd.f32 %v1503_v54, %v5389_v48  ;;  %v1857_v15 = vadd.f32 %v1856_v55, %v5392_v58  ;;  %v1505_v52 = vpop.f32.mrb[91].mxu1  ;;  %v1858_v6 = vpop.f32.mrb[91].mxu0 }
 0x238   : > { %v3925_v47 = vpack.c.bf16 %v1502_v9, %v1500_v23  ;;  %v3926_v42 = vpack.c.bf16 %v1855_v45, %v1853_v24  ;;  %v1506_v46 = vadd.f32 %v1505_v52, %v5395_v26  ;;  %v1859_v50 = vadd.f32 %v1858_v6, %v5400_v59 }
 0x23a   : > { %3300 = vst [vmem:[%s5142_s22 + $0x128] sm:$0xff] %v3925_v47  ;;  %3301 = vst [vmem:[%s5142_s22 + $0x130] sm:$0xff] %v3926_v42  ;;  %v3928_v51 = vpack.c.bf16 %v1506_v46, %v1504_v16  ;;  %v3929_v62 = vpack.c.bf16 %v1859_v50, %v1857_v15 }
 0x23c   : > { %3303 = vst [vmem:[%s5142_s22 + $0x140] sm:$0xff] %v3928_v51  ;;  %3304 = vst [vmem:[%s5142_s22 + $0x148] sm:$0xff] %v3929_v62  ;;  %v1509_v10 = vpop.f32.mrb[92].mxu1  ;;  %v1862_v5 = vpop.f32.mrb[92].mxu0 }
 0x23d   : > { %v1510_v12 = vadd.f32 %v1509_v10, %v5389_v48  ;;  %v1863_v1 = vadd.f32 %v1862_v5, %v5392_v58  ;;  %v1511_v25 = vpop.f32.mrb[93].mxu1  ;;  %v1864_v36 = vpop.f32.mrb[93].mxu0 }
 0x23e   : > { %v1512_v57 = vadd.f32 %v1511_v25, %v5395_v26  ;;  %v1865_v7 = vadd.f32 %v1864_v36, %v5400_v59  ;;  %v1513_v3 = vpop.f32.mrb[94].mxu1  ;;  %v1866_v18 = vpop.f32.mrb[94].mxu0 }
 0x23f   : > { %v1514_v61 = vadd.f32 %v1513_v3, %v5389_v48  ;;  %v1867_v38 = vadd.f32 %v1866_v18, %v5392_v58  ;;  %v1515_v19 = vpop.f32.mrb[95].mxu1  ;;  %v1868_v0 = vpop.f32.mrb[95].mxu0 }
 0x240   : > { %v3931_v2 = vpack.c.bf16 %v1512_v57, %v1510_v12  ;;  %v3932_v34 = vpack.c.bf16 %v1865_v7, %v1863_v1  ;;  %v1516_v40 = vadd.f32 %v1515_v19, %v5395_v26  ;;  %v1869_v8 = vadd.f32 %v1868_v0, %v5400_v59 }
 0x242   : > { %3306 = vst [vmem:[%s5142_s22 + $0x158] sm:$0xff] %v3931_v2  ;;  %3307 = vst [vmem:[%s5142_s22 + $0x160] sm:$0xff] %v3932_v34  ;;  %v3934_v11 = vpack.c.bf16 %v1516_v40, %v1514_v61  ;;  %v3935_v14 = vpack.c.bf16 %v1869_v8, %v1867_v38 }
 0x244   : > { %3309 = vst [vmem:[%s5142_s22 + $0x170] sm:$0xff] %v3934_v11  ;;  %3310 = vst [vmem:[%s5142_s22 + $0x178] sm:$0xff] %v3935_v14  ;;  %v1519_v30 = vpop.f32.mrb[96].mxu1  ;;  %v1872_v31 = vpop.f32.mrb[96].mxu0 }
 0x245   : > { %v1520_v13 = vadd.f32 %v1519_v30, %v5389_v48  ;;  %v1873_v32 = vadd.f32 %v1872_v31, %v5392_v58  ;;  %v1521_v17 = vpop.f32.mrb[97].mxu1  ;;  %v1874_v35 = vpop.f32.mrb[97].mxu0 }
 0x246   : > { %v1522_v33 = vadd.f32 %v1521_v17, %v5395_v26  ;;  %v1875_v21 = vadd.f32 %v1874_v35, %v5400_v59  ;;  %v1523_v27 = vpop.f32.mrb[98].mxu1  ;;  %v1876_v41 = vpop.f32.mrb[98].mxu0 }
 0x247   : > { %v1524_v28 = vadd.f32 %v1523_v27, %v5389_v48  ;;  %v1877_v20 = vadd.f32 %v1876_v41, %v5392_v58  ;;  %v1525_v56 = vpop.f32.mrb[99].mxu1  ;;  %v1878_v29 = vpop.f32.mrb[99].mxu0 }
 0x248   : > { %v3937_v49 = vpack.c.bf16 %v1522_v33, %v1520_v13  ;;  %v3938_v60 = vpack.c.bf16 %v1875_v21, %v1873_v32  ;;  %v1526_v43 = vadd.f32 %v1525_v56, %v5395_v26  ;;  %v1879_v22 = vadd.f32 %v1878_v29, %v5400_v59 }
 0x24a   : > { %3312 = vst [vmem:[%s5142_s22 + $0x188] sm:$0xff] %v3937_v49  ;;  %3313 = vst [vmem:[%s5142_s22 + $0x190] sm:$0xff] %v3938_v60  ;;  %v3940_v4 = vpack.c.bf16 %v1526_v43, %v1524_v28  ;;  %v3941_v53 = vpack.c.bf16 %v1879_v22, %v1877_v20 }
 0x24c   : > { %3315 = vst [vmem:[%s5142_s22 + $0x1a0] sm:$0xff] %v3940_v4  ;;  %3316 = vst [vmem:[%s5142_s22 + $0x1a8] sm:$0xff] %v3941_v53  ;;  %v1529_v63 = vpop.f32.mrb[100].mxu1  ;;  %v1882_v37 = vpop.f32.mrb[100].mxu0 }
 0x24d   : > { %v1530_v23 = vadd.f32 %v1529_v63, %v5389_v48  ;;  %v1883_v24 = vadd.f32 %v1882_v37, %v5392_v58  ;;  %v1531_v44 = vpop.f32.mrb[101].mxu1  ;;  %v1884_v39 = vpop.f32.mrb[101].mxu0 }
 0x24e   : > { %v1532_v9 = vadd.f32 %v1531_v44, %v5395_v26  ;;  %v1885_v45 = vadd.f32 %v1884_v39, %v5400_v59  ;;  %v1533_v54 = vpop.f32.mrb[102].mxu1  ;;  %v1886_v55 = vpop.f32.mrb[102].mxu0 }
 0x24f   : > { %v1534_v16 = vadd.f32 %v1533_v54, %v5389_v48  ;;  %v1887_v15 = vadd.f32 %v1886_v55, %v5392_v58  ;;  %v1535_v52 = vpop.f32.mrb[103].mxu1  ;;  %v1888_v6 = vpop.f32.mrb[103].mxu0 }
 0x250   : > { %v3943_v47 = vpack.c.bf16 %v1532_v9, %v1530_v23  ;;  %v3944_v42 = vpack.c.bf16 %v1885_v45, %v1883_v24  ;;  %v1536_v46 = vadd.f32 %v1535_v52, %v5395_v26  ;;  %v1889_v50 = vadd.f32 %v1888_v6, %v5400_v59 }
 0x252   : > { %3318 = vst [vmem:[%s5142_s22 + $0x1b8] sm:$0xff] %v3943_v47  ;;  %3319 = vst [vmem:[%s5142_s22 + $0x1c0] sm:$0xff] %v3944_v42  ;;  %v3946_v51 = vpack.c.bf16 %v1536_v46, %v1534_v16  ;;  %v3947_v62 = vpack.c.bf16 %v1889_v50, %v1887_v15 }
 0x254   : > { %3321 = vst [vmem:[%s5142_s22 + $0x1d0] sm:$0xff] %v3946_v51  ;;  %3322 = vst [vmem:[%s5142_s22 + $0x1d8] sm:$0xff] %v3947_v62  ;;  %v1539_v10 = vpop.f32.mrb[104].mxu1  ;;  %v1892_v5 = vpop.f32.mrb[104].mxu0 }
 0x255   : > { %v1540_v12 = vadd.f32 %v1539_v10, %v5389_v48  ;;  %v1893_v1 = vadd.f32 %v1892_v5, %v5392_v58  ;;  %v1541_v25 = vpop.f32.mrb[105].mxu1  ;;  %v1894_v36 = vpop.f32.mrb[105].mxu0 }
 0x256   : > { %v1542_v57 = vadd.f32 %v1541_v25, %v5395_v26  ;;  %v1895_v7 = vadd.f32 %v1894_v36, %v5400_v59  ;;  %v1543_v3 = vpop.f32.mrb[106].mxu1  ;;  %v1896_v18 = vpop.f32.mrb[106].mxu0 }
 0x257   : > { %v1544_v61 = vadd.f32 %v1543_v3, %v5389_v48  ;;  %v1897_v38 = vadd.f32 %v1896_v18, %v5392_v58  ;;  %v1545_v19 = vpop.f32.mrb[107].mxu1  ;;  %v1898_v0 = vpop.f32.mrb[107].mxu0 }
 0x258   : > { %v3949_v2 = vpack.c.bf16 %v1542_v57, %v1540_v12  ;;  %v3950_v34 = vpack.c.bf16 %v1895_v7, %v1893_v1  ;;  %v1546_v40 = vadd.f32 %v1545_v19, %v5395_v26  ;;  %v1899_v8 = vadd.f32 %v1898_v0, %v5400_v59 }
 0x25a   : > { %3324 = vst [vmem:[%s5142_s22 + $0x1e8] sm:$0xff] %v3949_v2  ;;  %3325 = vst [vmem:[%s5142_s22 + $0x1f0] sm:$0xff] %v3950_v34  ;;  %v3952_v11 = vpack.c.bf16 %v1546_v40, %v1544_v61  ;;  %v3953_v14 = vpack.c.bf16 %v1899_v8, %v1897_v38 }
 0x25c   : > { %3327 = vst [vmem:[%s5142_s22 + $0x200] sm:$0xff] %v3952_v11  ;;  %3328 = vst [vmem:[%s5142_s22 + $0x208] sm:$0xff] %v3953_v14  ;;  %v1549_v30 = vpop.f32.mrb[108].mxu1  ;;  %v1902_v31 = vpop.f32.mrb[108].mxu0 }
 0x25d   : > { %v1550_v13 = vadd.f32 %v1549_v30, %v5389_v48  ;;  %v1903_v32 = vadd.f32 %v1902_v31, %v5392_v58  ;;  %v1551_v17 = vpop.f32.mrb[109].mxu1  ;;  %v1904_v35 = vpop.f32.mrb[109].mxu0 }
 0x25e   : > { %v1552_v33 = vadd.f32 %v1551_v17, %v5395_v26  ;;  %v1905_v21 = vadd.f32 %v1904_v35, %v5400_v59  ;;  %v1553_v27 = vpop.f32.mrb[110].mxu1  ;;  %v1906_v41 = vpop.f32.mrb[110].mxu0 }
 0x25f   : > { %v1554_v28 = vadd.f32 %v1553_v27, %v5389_v48  ;;  %v1907_v20 = vadd.f32 %v1906_v41, %v5392_v58  ;;  %v1555_v56 = vpop.f32.mrb[111].mxu1  ;;  %v1908_v29 = vpop.f32.mrb[111].mxu0 }
 0x260   : > { %v3955_v49 = vpack.c.bf16 %v1552_v33, %v1550_v13  ;;  %v3956_v60 = vpack.c.bf16 %v1905_v21, %v1903_v32  ;;  %v1556_v43 = vadd.f32 %v1555_v56, %v5395_v26  ;;  %v1909_v22 = vadd.f32 %v1908_v29, %v5400_v59 }
 0x262   : > { %3330 = vst [vmem:[%s5142_s22 + $0x218] sm:$0xff] %v3955_v49  ;;  %3331 = vst [vmem:[%s5142_s22 + $0x220] sm:$0xff] %v3956_v60  ;;  %v3958_v4 = vpack.c.bf16 %v1556_v43, %v1554_v28  ;;  %v3959_v53 = vpack.c.bf16 %v1909_v22, %v1907_v20 }
 0x264   : > { %3333 = vst [vmem:[%s5142_s22 + $0x230] sm:$0xff] %v3958_v4  ;;  %3334 = vst [vmem:[%s5142_s22 + $0x238] sm:$0xff] %v3959_v53  ;;  %v1559_v63 = vpop.f32.mrb[112].mxu1  ;;  %v1912_v37 = vpop.f32.mrb[112].mxu0 }
 0x265   : > { %v1560_v23 = vadd.f32 %v1559_v63, %v5389_v48  ;;  %v1913_v24 = vadd.f32 %v1912_v37, %v5392_v58  ;;  %v1561_v44 = vpop.f32.mrb[113].mxu1  ;;  %v1914_v39 = vpop.f32.mrb[113].mxu0 }
 0x266   : > { %v1562_v9 = vadd.f32 %v1561_v44, %v5395_v26  ;;  %v1915_v45 = vadd.f32 %v1914_v39, %v5400_v59  ;;  %v1563_v54 = vpop.f32.mrb[114].mxu1  ;;  %v1916_v55 = vpop.f32.mrb[114].mxu0 }
 0x267   : > { %v1564_v16 = vadd.f32 %v1563_v54, %v5389_v48  ;;  %v1917_v15 = vadd.f32 %v1916_v55, %v5392_v58  ;;  %v1565_v52 = vpop.f32.mrb[115].mxu1  ;;  %v1918_v6 = vpop.f32.mrb[115].mxu0 }
 0x268   : > { %v3961_v47 = vpack.c.bf16 %v1562_v9, %v1560_v23  ;;  %v3962_v42 = vpack.c.bf16 %v1915_v45, %v1913_v24  ;;  %v1566_v46 = vadd.f32 %v1565_v52, %v5395_v26  ;;  %v1919_v50 = vadd.f32 %v1918_v6, %v5400_v59 }
 0x26a   : > { %3336 = vst [vmem:[%s5142_s22 + $0x248] sm:$0xff] %v3961_v47  ;;  %3337 = vst [vmem:[%s5142_s22 + $0x250] sm:$0xff] %v3962_v42  ;;  %v3964_v51 = vpack.c.bf16 %v1566_v46, %v1564_v16  ;;  %v3965_v62 = vpack.c.bf16 %v1919_v50, %v1917_v15 }
 0x26c   : > { %3339 = vst [vmem:[%s5142_s22 + $0x260] sm:$0xff] %v3964_v51  ;;  %3340 = vst [vmem:[%s5142_s22 + $0x268] sm:$0xff] %v3965_v62  ;;  %v1569_v10 = vpop.f32.mrb[116].mxu1  ;;  %v1922_v5 = vpop.f32.mrb[116].mxu0 }
 0x26d   : > { %v1570_v12 = vadd.f32 %v1569_v10, %v5389_v48  ;;  %v1923_v1 = vadd.f32 %v1922_v5, %v5392_v58  ;;  %v1571_v25 = vpop.f32.mrb[117].mxu1  ;;  %v1924_v36 = vpop.f32.mrb[117].mxu0 }
 0x26e   : > { %v1572_v57 = vadd.f32 %v1571_v25, %v5395_v26  ;;  %v1925_v7 = vadd.f32 %v1924_v36, %v5400_v59  ;;  %v1573_v3 = vpop.f32.mrb[118].mxu1  ;;  %v1926_v18 = vpop.f32.mrb[118].mxu0 }
 0x26f   : > { %v1574_v61 = vadd.f32 %v1573_v3, %v5389_v48  ;;  %v1927_v38 = vadd.f32 %v1926_v18, %v5392_v58  ;;  %v1575_v19 = vpop.f32.mrb[119].mxu1  ;;  %v1928_v0 = vpop.f32.mrb[119].mxu0 }
 0x270   : > { %v3967_v2 = vpack.c.bf16 %v1572_v57, %v1570_v12  ;;  %v3968_v34 = vpack.c.bf16 %v1925_v7, %v1923_v1  ;;  %v1576_v40 = vadd.f32 %v1575_v19, %v5395_v26  ;;  %v1929_v8 = vadd.f32 %v1928_v0, %v5400_v59 }
 0x272   : > { %3342 = vst [vmem:[%s5142_s22 + $0x278] sm:$0xff] %v3967_v2  ;;  %3343 = vst [vmem:[%s5142_s22 + $0x280] sm:$0xff] %v3968_v34  ;;  %v3970_v11 = vpack.c.bf16 %v1576_v40, %v1574_v61  ;;  %v3971_v14 = vpack.c.bf16 %v1929_v8, %v1927_v38 }
 0x274   : > { %3345 = vst [vmem:[%s5142_s22 + $0x290] sm:$0xff] %v3970_v11  ;;  %3346 = vst [vmem:[%s5142_s22 + $0x298] sm:$0xff] %v3971_v14  ;;  %v1579_v30 = vpop.f32.mrb[120].mxu1  ;;  %v1932_v31 = vpop.f32.mrb[120].mxu0 }
 0x275   : > { %v1580_v13 = vadd.f32 %v1579_v30, %v5389_v48  ;;  %v1933_v32 = vadd.f32 %v1932_v31, %v5392_v58  ;;  %v1581_v17 = vpop.f32.mrb[121].mxu1  ;;  %v1934_v35 = vpop.f32.mrb[121].mxu0 }
 0x276   : > { %v1582_v33 = vadd.f32 %v1581_v17, %v5395_v26  ;;  %v1935_v21 = vadd.f32 %v1934_v35, %v5400_v59  ;;  %v1583_v27 = vpop.f32.mrb[122].mxu1  ;;  %v1936_v41 = vpop.f32.mrb[122].mxu0 }
 0x277   : > { %v1584_v28 = vadd.f32 %v1583_v27, %v5389_v48  ;;  %v1937_v20 = vadd.f32 %v1936_v41, %v5392_v58  ;;  %v1585_v56 = vpop.f32.mrb[123].mxu1  ;;  %v1938_v29 = vpop.f32.mrb[123].mxu0 }
 0x278   : > { %v3973_v49 = vpack.c.bf16 %v1582_v33, %v1580_v13  ;;  %v3974_v60 = vpack.c.bf16 %v1935_v21, %v1933_v32  ;;  %v1586_v43 = vadd.f32 %v1585_v56, %v5395_v26  ;;  %v1939_v22 = vadd.f32 %v1938_v29, %v5400_v59 }
 0x27a   : > { %3348 = vst [vmem:[%s5142_s22 + $0x2a8] sm:$0xff] %v3973_v49  ;;  %3349 = vst [vmem:[%s5142_s22 + $0x2b0] sm:$0xff] %v3974_v60  ;;  %v3976_v4 = vpack.c.bf16 %v1586_v43, %v1584_v28  ;;  %v3977_v53 = vpack.c.bf16 %v1939_v22, %v1937_v20 }
 0x27c   : > { %3351 = vst [vmem:[%s5142_s22 + $0x2c0] sm:$0xff] %v3976_v4  ;;  %3352 = vst [vmem:[%s5142_s22 + $0x2c8] sm:$0xff] %v3977_v53  ;;  %v1589_v63 = vpop.f32.mrb[124].mxu1  ;;  %v1942_v37 = vpop.f32.mrb[124].mxu0 }
 0x27d   : > { %v1590_v23 = vadd.f32 %v1589_v63, %v5389_v48  ;;  %v1943_v24 = vadd.f32 %v1942_v37, %v5392_v58  ;;  %v1591_v44 = vpop.f32.mrb[125].mxu1  ;;  %v1944_v39 = vpop.f32.mrb[125].mxu0 }
 0x27e   : > { %v1592_v9 = vadd.f32 %v1591_v44, %v5395_v26  ;;  %v1945_v45 = vadd.f32 %v1944_v39, %v5400_v59  ;;  %v1593_v54 = vpop.f32.mrb[126].mxu1  ;;  %v1946_v55 = vpop.f32.mrb[126].mxu0 }
 0x27f   : > { %v1594_v16 = vadd.f32 %v1593_v54, %v5389_v48  ;;  %v1947_v15 = vadd.f32 %v1946_v55, %v5392_v58  ;;  %v1595_v52 = vpop.f32.mrb[127].mxu1  ;;  %v1948_v6 = vpop.f32.mrb[127].mxu0 }
 0x280   : > { %v3979_v47 = vpack.c.bf16 %v1592_v9, %v1590_v23  ;;  %v3980_v42 = vpack.c.bf16 %v1945_v45, %v1943_v24  ;;  %v1596_v46 = vadd.f32 %v1595_v52, %v5395_v26  ;;  %v1949_v50 = vadd.f32 %v1948_v6, %v5400_v59 }
 0x282   : > { %3354 = vst [vmem:[%s5142_s22 + $0x2d8] sm:$0xff] %v3979_v47  ;;  %3355 = vst [vmem:[%s5142_s22 + $0x2e0] sm:$0xff] %v3980_v42  ;;  %v3982_v51 = vpack.c.bf16 %v1596_v46, %v1594_v16  ;;  %v3983_v62 = vpack.c.bf16 %v1949_v50, %v1947_v15 }
 0x284   : > { %3357 = vst [vmem:[%s5142_s22 + $0x2f0] sm:$0xff] %v3982_v51  ;;  %3358 = vst [vmem:[%s5142_s22 + $0x2f8] sm:$0xff] %v3983_v62  ;;  %v1599_v10 = vpop.f32.mrb[128].mxu1  ;;  %v1952_v5 = vpop.f32.mrb[128].mxu0 }
 0x285   : > { %v1600_v12 = vadd.f32 %v1599_v10, %v5389_v48  ;;  %v1953_v1 = vadd.f32 %v1952_v5, %v5392_v58  ;;  %v1601_v25 = vpop.f32.mrb[129].mxu1  ;;  %v1954_v36 = vpop.f32.mrb[129].mxu0 }
 0x286   : > { %v1602_v57 = vadd.f32 %v1601_v25, %v5395_v26  ;;  %v1955_v7 = vadd.f32 %v1954_v36, %v5400_v59  ;;  %v1603_v3 = vpop.f32.mrb[130].mxu1  ;;  %v1956_v18 = vpop.f32.mrb[130].mxu0 }
 0x287   : > { %v1604_v61 = vadd.f32 %v1603_v3, %v5389_v48  ;;  %v1957_v38 = vadd.f32 %v1956_v18, %v5392_v58  ;;  %v1605_v19 = vpop.f32.mrb[131].mxu1  ;;  %v1958_v0 = vpop.f32.mrb[131].mxu0 }
 0x288   : > { %v3985_v2 = vpack.c.bf16 %v1602_v57, %v1600_v12  ;;  %v3986_v34 = vpack.c.bf16 %v1955_v7, %v1953_v1  ;;  %v1606_v40 = vadd.f32 %v1605_v19, %v5395_v26  ;;  %v1959_v8 = vadd.f32 %v1958_v0, %v5400_v59 }
 0x28a   : > { %3360 = vst [vmem:[%s5142_s22 + $0x308] sm:$0xff] %v3985_v2  ;;  %3361 = vst [vmem:[%s5142_s22 + $0x310] sm:$0xff] %v3986_v34  ;;  %v3988_v11 = vpack.c.bf16 %v1606_v40, %v1604_v61  ;;  %v3989_v14 = vpack.c.bf16 %v1959_v8, %v1957_v38 }
 0x28c   : > { %3363 = vst [vmem:[%s5142_s22 + $0x320] sm:$0xff] %v3988_v11  ;;  %3364 = vst [vmem:[%s5142_s22 + $0x328] sm:$0xff] %v3989_v14  ;;  %v1609_v30 = vpop.f32.mrb[132].mxu1  ;;  %v1962_v31 = vpop.f32.mrb[132].mxu0 }
 0x28d   : > { %v1610_v13 = vadd.f32 %v1609_v30, %v5389_v48  ;;  %v1963_v32 = vadd.f32 %v1962_v31, %v5392_v58  ;;  %v1611_v17 = vpop.f32.mrb[133].mxu1  ;;  %v1964_v35 = vpop.f32.mrb[133].mxu0 }
 0x28e   : > { %v1612_v33 = vadd.f32 %v1611_v17, %v5395_v26  ;;  %v1965_v21 = vadd.f32 %v1964_v35, %v5400_v59  ;;  %v1613_v27 = vpop.f32.mrb[134].mxu1  ;;  %v1966_v41 = vpop.f32.mrb[134].mxu0 }
 0x28f   : > { %v1614_v28 = vadd.f32 %v1613_v27, %v5389_v48  ;;  %v1967_v20 = vadd.f32 %v1966_v41, %v5392_v58  ;;  %v1615_v56 = vpop.f32.mrb[135].mxu1  ;;  %v1968_v29 = vpop.f32.mrb[135].mxu0 }
 0x290   : > { %v3991_v49 = vpack.c.bf16 %v1612_v33, %v1610_v13  ;;  %v3992_v60 = vpack.c.bf16 %v1965_v21, %v1963_v32  ;;  %v1616_v43 = vadd.f32 %v1615_v56, %v5395_v26  ;;  %v1969_v22 = vadd.f32 %v1968_v29, %v5400_v59 }
 0x292   : > { %3366 = vst [vmem:[%s5142_s22 + $0x338] sm:$0xff] %v3991_v49  ;;  %3367 = vst [vmem:[%s5142_s22 + $0x340] sm:$0xff] %v3992_v60  ;;  %v3994_v4 = vpack.c.bf16 %v1616_v43, %v1614_v28  ;;  %v3995_v53 = vpack.c.bf16 %v1969_v22, %v1967_v20 }
 0x294   : > { %3369 = vst [vmem:[%s5142_s22 + $0x350] sm:$0xff] %v3994_v4  ;;  %3370 = vst [vmem:[%s5142_s22 + $0x358] sm:$0xff] %v3995_v53  ;;  %v1619_v63 = vpop.f32.mrb[136].mxu1  ;;  %v1972_v37 = vpop.f32.mrb[136].mxu0 }
 0x295   : > { %v1620_v23 = vadd.f32 %v1619_v63, %v5389_v48  ;;  %v1973_v24 = vadd.f32 %v1972_v37, %v5392_v58  ;;  %v1621_v44 = vpop.f32.mrb[137].mxu1  ;;  %v1974_v39 = vpop.f32.mrb[137].mxu0 }
 0x296   : > { %v1622_v9 = vadd.f32 %v1621_v44, %v5395_v26  ;;  %v1975_v45 = vadd.f32 %v1974_v39, %v5400_v59  ;;  %v1623_v54 = vpop.f32.mrb[138].mxu1  ;;  %v1976_v55 = vpop.f32.mrb[138].mxu0 }
 0x297   : > { %v1624_v16 = vadd.f32 %v1623_v54, %v5389_v48  ;;  %v1977_v15 = vadd.f32 %v1976_v55, %v5392_v58  ;;  %v1625_v52 = vpop.f32.mrb[139].mxu1  ;;  %v1978_v6 = vpop.f32.mrb[139].mxu0 }
 0x298   : > { %v3997_v47 = vpack.c.bf16 %v1622_v9, %v1620_v23  ;;  %v3998_v42 = vpack.c.bf16 %v1975_v45, %v1973_v24  ;;  %v1626_v46 = vadd.f32 %v1625_v52, %v5395_v26  ;;  %v1979_v50 = vadd.f32 %v1978_v6, %v5400_v59 }
 0x29a   : > { %3372 = vst [vmem:[%s5142_s22 + $0x368] sm:$0xff] %v3997_v47  ;;  %3373 = vst [vmem:[%s5142_s22 + $0x370] sm:$0xff] %v3998_v42  ;;  %v4000_v51 = vpack.c.bf16 %v1626_v46, %v1624_v16  ;;  %v4001_v62 = vpack.c.bf16 %v1979_v50, %v1977_v15 }
 0x29c   : > { %3375 = vst [vmem:[%s5142_s22 + $0x380] sm:$0xff] %v4000_v51  ;;  %3376 = vst [vmem:[%s5142_s22 + $0x388] sm:$0xff] %v4001_v62  ;;  %v1629_v10 = vpop.f32.mrb[140].mxu1  ;;  %v1982_v5 = vpop.f32.mrb[140].mxu0 }
 0x29d   : > { %v1630_v12 = vadd.f32 %v1629_v10, %v5389_v48  ;;  %v1983_v1 = vadd.f32 %v1982_v5, %v5392_v58  ;;  %v1631_v25 = vpop.f32.mrb[141].mxu1  ;;  %v1984_v36 = vpop.f32.mrb[141].mxu0 }
 0x29e   : > { %v1632_v57 = vadd.f32 %v1631_v25, %v5395_v26  ;;  %v1985_v7 = vadd.f32 %v1984_v36, %v5400_v59  ;;  %v1633_v3 = vpop.f32.mrb[142].mxu1  ;;  %v1986_v18 = vpop.f32.mrb[142].mxu0 }
 0x29f   : > { %v1634_v61 = vadd.f32 %v1633_v3, %v5389_v48  ;;  %v1987_v38 = vadd.f32 %v1986_v18, %v5392_v58  ;;  %v1635_v19 = vpop.f32.mrb[143].mxu1  ;;  %v1988_v0 = vpop.f32.mrb[143].mxu0 }
 0x2a0   : > { %v4003_v2 = vpack.c.bf16 %v1632_v57, %v1630_v12  ;;  %v4004_v34 = vpack.c.bf16 %v1985_v7, %v1983_v1  ;;  %v1636_v40 = vadd.f32 %v1635_v19, %v5395_v26  ;;  %v1989_v8 = vadd.f32 %v1988_v0, %v5400_v59 }
 0x2a2   : > { %3378 = vst [vmem:[%s5142_s22 + $0x398] sm:$0xff] %v4003_v2  ;;  %3379 = vst [vmem:[%s5142_s22 + $0x3a0] sm:$0xff] %v4004_v34  ;;  %v4006_v11 = vpack.c.bf16 %v1636_v40, %v1634_v61  ;;  %v4007_v14 = vpack.c.bf16 %v1989_v8, %v1987_v38 }
 0x2a4   : > { %3381 = vst [vmem:[%s5142_s22 + $0x3b0] sm:$0xff] %v4006_v11  ;;  %3382 = vst [vmem:[%s5142_s22 + $0x3b8] sm:$0xff] %v4007_v14  ;;  %v1639_v30 = vpop.f32.mrb[144].mxu1  ;;  %v1992_v31 = vpop.f32.mrb[144].mxu0 }
 0x2a5   : > { %v1640_v13 = vadd.f32 %v1639_v30, %v5389_v48  ;;  %v1993_v32 = vadd.f32 %v1992_v31, %v5392_v58  ;;  %v1641_v17 = vpop.f32.mrb[145].mxu1  ;;  %v1994_v35 = vpop.f32.mrb[145].mxu0 }
 0x2a6   : > { %v1642_v33 = vadd.f32 %v1641_v17, %v5395_v26  ;;  %v1995_v21 = vadd.f32 %v1994_v35, %v5400_v59  ;;  %v1643_v27 = vpop.f32.mrb[146].mxu1  ;;  %v1996_v41 = vpop.f32.mrb[146].mxu0 }
 0x2a7   : > { %v1644_v28 = vadd.f32 %v1643_v27, %v5389_v48  ;;  %v1997_v20 = vadd.f32 %v1996_v41, %v5392_v58  ;;  %v1645_v56 = vpop.f32.mrb[147].mxu1  ;;  %v1998_v29 = vpop.f32.mrb[147].mxu0 }
 0x2a8   : > { %v4009_v49 = vpack.c.bf16 %v1642_v33, %v1640_v13  ;;  %v4010_v60 = vpack.c.bf16 %v1995_v21, %v1993_v32  ;;  %v1646_v43 = vadd.f32 %v1645_v56, %v5395_v26  ;;  %v1999_v22 = vadd.f32 %v1998_v29, %v5400_v59 }
 0x2aa   : > { %3384 = vst [vmem:[%s5142_s22 + $0x3c8] sm:$0xff] %v4009_v49  ;;  %3385 = vst [vmem:[%s5142_s22 + $0x3d0] sm:$0xff] %v4010_v60  ;;  %v4012_v4 = vpack.c.bf16 %v1646_v43, %v1644_v28  ;;  %v4013_v53 = vpack.c.bf16 %v1999_v22, %v1997_v20 }
 0x2ac   : > { %3387 = vst [vmem:[%s5142_s22 + $0x3e0] sm:$0xff] %v4012_v4  ;;  %3388 = vst [vmem:[%s5142_s22 + $0x3e8] sm:$0xff] %v4013_v53  ;;  %v1649_v63 = vpop.f32.mrb[148].mxu1  ;;  %v2002_v37 = vpop.f32.mrb[148].mxu0 }
 0x2ad   : > { %v1650_v23 = vadd.f32 %v1649_v63, %v5389_v48  ;;  %v2003_v24 = vadd.f32 %v2002_v37, %v5392_v58  ;;  %v1651_v44 = vpop.f32.mrb[149].mxu1  ;;  %v2004_v39 = vpop.f32.mrb[149].mxu0 }
 0x2ae   : > { %v1652_v9 = vadd.f32 %v1651_v44, %v5395_v26  ;;  %v2005_v45 = vadd.f32 %v2004_v39, %v5400_v59  ;;  %v1653_v54 = vpop.f32.mrb[150].mxu1  ;;  %v2006_v55 = vpop.f32.mrb[150].mxu0 }
 0x2af   : > { %v1654_v16 = vadd.f32 %v1653_v54, %v5389_v48  ;;  %v2007_v15 = vadd.f32 %v2006_v55, %v5392_v58  ;;  %v1655_v52 = vpop.f32.mrb[151].mxu1  ;;  %v2008_v6 = vpop.f32.mrb[151].mxu0 }
 0x2b0   : > { %v4015_v47 = vpack.c.bf16 %v1652_v9, %v1650_v23  ;;  %v4016_v42 = vpack.c.bf16 %v2005_v45, %v2003_v24  ;;  %v1656_v46 = vadd.f32 %v1655_v52, %v5395_v26  ;;  %v2009_v50 = vadd.f32 %v2008_v6, %v5400_v59 }
 0x2b2   : > { %3390 = vst [vmem:[%s5142_s22 + $0x3f8] sm:$0xff] %v4015_v47  ;;  %3391 = vst [vmem:[%s5142_s22 + $0x400] sm:$0xff] %v4016_v42  ;;  %v4018_v51 = vpack.c.bf16 %v1656_v46, %v1654_v16  ;;  %v4019_v62 = vpack.c.bf16 %v2009_v50, %v2007_v15 }
 0x2b4   : > { %3393 = vst [vmem:[%s5142_s22 + $0x410] sm:$0xff] %v4018_v51  ;;  %3394 = vst [vmem:[%s5142_s22 + $0x418] sm:$0xff] %v4019_v62  ;;  %v1659_v10 = vpop.f32.mrb[152].mxu1  ;;  %v2012_v5 = vpop.f32.mrb[152].mxu0 }
 0x2b5   : > { %v1660_v12 = vadd.f32 %v1659_v10, %v5389_v48  ;;  %v2013_v1 = vadd.f32 %v2012_v5, %v5392_v58  ;;  %v1661_v25 = vpop.f32.mrb[153].mxu1  ;;  %v2014_v36 = vpop.f32.mrb[153].mxu0 }
 0x2b6   : > { %v1662_v57 = vadd.f32 %v1661_v25, %v5395_v26  ;;  %v2015_v7 = vadd.f32 %v2014_v36, %v5400_v59  ;;  %v1663_v3 = vpop.f32.mrb[154].mxu1  ;;  %v2016_v18 = vpop.f32.mrb[154].mxu0 }
 0x2b7   : > { %v1664_v61 = vadd.f32 %v1663_v3, %v5389_v48  ;;  %v2017_v38 = vadd.f32 %v2016_v18, %v5392_v58  ;;  %v1665_v19 = vpop.f32.mrb[155].mxu1  ;;  %v2018_v0 = vpop.f32.mrb[155].mxu0 }
 0x2b8   : > { %v4021_v2 = vpack.c.bf16 %v1662_v57, %v1660_v12  ;;  %v4022_v34 = vpack.c.bf16 %v2015_v7, %v2013_v1  ;;  %v1666_v40 = vadd.f32 %v1665_v19, %v5395_v26  ;;  %v2019_v8 = vadd.f32 %v2018_v0, %v5400_v59 }
 0x2ba   : > { %3396 = vst [vmem:[%s5142_s22 + $0x428] sm:$0xff] %v4021_v2  ;;  %3397 = vst [vmem:[%s5142_s22 + $0x430] sm:$0xff] %v4022_v34  ;;  %v4024_v11 = vpack.c.bf16 %v1666_v40, %v1664_v61  ;;  %v4025_v14 = vpack.c.bf16 %v2019_v8, %v2017_v38 }
 0x2bc   : > { %3399 = vst [vmem:[%s5142_s22 + $0x440] sm:$0xff] %v4024_v11  ;;  %3400 = vst [vmem:[%s5142_s22 + $0x448] sm:$0xff] %v4025_v14  ;;  %v1669_v30 = vpop.f32.mrb[156].mxu1  ;;  %v2022_v31 = vpop.f32.mrb[156].mxu0 }
 0x2bd   : > { %v1670_v13 = vadd.f32 %v1669_v30, %v5389_v48  ;;  %v2023_v32 = vadd.f32 %v2022_v31, %v5392_v58  ;;  %v1671_v17 = vpop.f32.mrb[157].mxu1  ;;  %v2024_v35 = vpop.f32.mrb[157].mxu0 }
 0x2be   : > { %v1672_v33 = vadd.f32 %v1671_v17, %v5395_v26  ;;  %v2025_v21 = vadd.f32 %v2024_v35, %v5400_v59  ;;  %v1673_v27 = vpop.f32.mrb[158].mxu1  ;;  %v2026_v41 = vpop.f32.mrb[158].mxu0 }
 0x2bf   : > { %v1674_v28 = vadd.f32 %v1673_v27, %v5389_v48  ;;  %v2027_v20 = vadd.f32 %v2026_v41, %v5392_v58  ;;  %v1675_v56 = vpop.f32.mrb[159].mxu1  ;;  %v2028_v29 = vpop.f32.mrb[159].mxu0 }
 0x2c0   : > { %v4027_v49 = vpack.c.bf16 %v1672_v33, %v1670_v13  ;;  %v4028_v60 = vpack.c.bf16 %v2025_v21, %v2023_v32  ;;  %v1676_v43 = vadd.f32 %v1675_v56, %v5395_v26  ;;  %v2029_v22 = vadd.f32 %v2028_v29, %v5400_v59 }
 0x2c2   : > { %3402 = vst [vmem:[%s5142_s22 + $0x458] sm:$0xff] %v4027_v49  ;;  %3403 = vst [vmem:[%s5142_s22 + $0x460] sm:$0xff] %v4028_v60  ;;  %v4030_v4 = vpack.c.bf16 %v1676_v43, %v1674_v28  ;;  %v4031_v53 = vpack.c.bf16 %v2029_v22, %v2027_v20 }
 0x2c4   : > { %3405 = vst [vmem:[%s5142_s22 + $0x470] sm:$0xff] %v4030_v4  ;;  %3406 = vst [vmem:[%s5142_s22 + $0x478] sm:$0xff] %v4031_v53  ;;  %v1679_v63 = vpop.f32.mrb[160].mxu1  ;;  %v2032_v37 = vpop.f32.mrb[160].mxu0 }
 0x2c5   : > { %v1680_v23 = vadd.f32 %v1679_v63, %v5389_v48  ;;  %v2033_v24 = vadd.f32 %v2032_v37, %v5392_v58  ;;  %v1681_v44 = vpop.f32.mrb[161].mxu1  ;;  %v2034_v39 = vpop.f32.mrb[161].mxu0 }
 0x2c6   : > { %v1682_v9 = vadd.f32 %v1681_v44, %v5395_v26  ;;  %v2035_v45 = vadd.f32 %v2034_v39, %v5400_v59  ;;  %v1683_v54 = vpop.f32.mrb[162].mxu1  ;;  %v2036_v55 = vpop.f32.mrb[162].mxu0 }
 0x2c7   : > { %v1684_v16 = vadd.f32 %v1683_v54, %v5389_v48  ;;  %v2037_v15 = vadd.f32 %v2036_v55, %v5392_v58  ;;  %v1685_v52 = vpop.f32.mrb[163].mxu1  ;;  %v2038_v6 = vpop.f32.mrb[163].mxu0 }
 0x2c8   : > { %v4033_v47 = vpack.c.bf16 %v1682_v9, %v1680_v23  ;;  %v4034_v42 = vpack.c.bf16 %v2035_v45, %v2033_v24  ;;  %v1686_v46 = vadd.f32 %v1685_v52, %v5395_v26  ;;  %v2039_v50 = vadd.f32 %v2038_v6, %v5400_v59 }
 0x2ca   : > { %3408 = vst [vmem:[%s5142_s22 + $0x488] sm:$0xff] %v4033_v47  ;;  %3409 = vst [vmem:[%s5142_s22 + $0x490] sm:$0xff] %v4034_v42  ;;  %v4036_v51 = vpack.c.bf16 %v1686_v46, %v1684_v16  ;;  %v4037_v62 = vpack.c.bf16 %v2039_v50, %v2037_v15 }
 0x2cc   : > { %3411 = vst [vmem:[%s5142_s22 + $0x4a0] sm:$0xff] %v4036_v51  ;;  %3412 = vst [vmem:[%s5142_s22 + $0x4a8] sm:$0xff] %v4037_v62  ;;  %v1689_v10 = vpop.f32.mrb[164].mxu1  ;;  %v2042_v5 = vpop.f32.mrb[164].mxu0 }
 0x2cd   : > { %v1690_v12 = vadd.f32 %v1689_v10, %v5389_v48  ;;  %v2043_v1 = vadd.f32 %v2042_v5, %v5392_v58  ;;  %v1691_v25 = vpop.f32.mrb[165].mxu1  ;;  %v2044_v36 = vpop.f32.mrb[165].mxu0 }
 0x2ce   : > { %v1692_v57 = vadd.f32 %v1691_v25, %v5395_v26  ;;  %v2045_v7 = vadd.f32 %v2044_v36, %v5400_v59  ;;  %v1693_v3 = vpop.f32.mrb[166].mxu1  ;;  %v2046_v18 = vpop.f32.mrb[166].mxu0 }
 0x2cf   : > { %v1694_v61 = vadd.f32 %v1693_v3, %v5389_v48  ;;  %v2047_v38 = vadd.f32 %v2046_v18, %v5392_v58  ;;  %v1695_v19 = vpop.f32.mrb[167].mxu1  ;;  %v2048_v0 = vpop.f32.mrb[167].mxu0 }
 0x2d0   : > { %v4039_v2 = vpack.c.bf16 %v1692_v57, %v1690_v12  ;;  %v4040_v34 = vpack.c.bf16 %v2045_v7, %v2043_v1  ;;  %v1696_v40 = vadd.f32 %v1695_v19, %v5395_v26  ;;  %v2049_v8 = vadd.f32 %v2048_v0, %v5400_v59 }
 0x2d2   : > { %3414 = vst [vmem:[%s5142_s22 + $0x4b8] sm:$0xff] %v4039_v2  ;;  %3415 = vst [vmem:[%s5142_s22 + $0x4c0] sm:$0xff] %v4040_v34  ;;  %v4042_v11 = vpack.c.bf16 %v1696_v40, %v1694_v61  ;;  %v4043_v14 = vpack.c.bf16 %v2049_v8, %v2047_v38 }
 0x2d4   : > { %3417 = vst [vmem:[%s5142_s22 + $0x4d0] sm:$0xff] %v4042_v11  ;;  %3418 = vst [vmem:[%s5142_s22 + $0x4d8] sm:$0xff] %v4043_v14  ;;  %v1699_v30 = vpop.f32.mrb[168].mxu1  ;;  %v2052_v31 = vpop.f32.mrb[168].mxu0 }
 0x2d5   : > { %v1700_v13 = vadd.f32 %v1699_v30, %v5389_v48  ;;  %v2053_v32 = vadd.f32 %v2052_v31, %v5392_v58  ;;  %v1701_v17 = vpop.f32.mrb[169].mxu1  ;;  %v2054_v35 = vpop.f32.mrb[169].mxu0 }
 0x2d6   : > { %v1702_v33 = vadd.f32 %v1701_v17, %v5395_v26  ;;  %v2055_v21 = vadd.f32 %v2054_v35, %v5400_v59  ;;  %v1703_v27 = vpop.f32.mrb[170].mxu1  ;;  %v2056_v41 = vpop.f32.mrb[170].mxu0 }
 0x2d7   : > { %v1704_v28 = vadd.f32 %v1703_v27, %v5389_v48  ;;  %v2057_v20 = vadd.f32 %v2056_v41, %v5392_v58  ;;  %v1705_v56 = vpop.f32.mrb[171].mxu1  ;;  %v2058_v29 = vpop.f32.mrb[171].mxu0 }
 0x2d8   : > { %v4045_v49 = vpack.c.bf16 %v1702_v33, %v1700_v13  ;;  %v4046_v60 = vpack.c.bf16 %v2055_v21, %v2053_v32  ;;  %v1706_v43 = vadd.f32 %v1705_v56, %v5395_v26  ;;  %v2059_v22 = vadd.f32 %v2058_v29, %v5400_v59 }
 0x2da   : > { %3420 = vst [vmem:[%s5142_s22 + $0x4e8] sm:$0xff] %v4045_v49  ;;  %3421 = vst [vmem:[%s5142_s22 + $0x4f0] sm:$0xff] %v4046_v60  ;;  %v4048_v4 = vpack.c.bf16 %v1706_v43, %v1704_v28  ;;  %v4049_v53 = vpack.c.bf16 %v2059_v22, %v2057_v20 }
 0x2dc   : > { %3423 = vst [vmem:[%s5142_s22 + $0x500] sm:$0xff] %v4048_v4  ;;  %3424 = vst [vmem:[%s5142_s22 + $0x508] sm:$0xff] %v4049_v53  ;;  %v1709_v63 = vpop.f32.mrb[172].mxu1  ;;  %v2062_v37 = vpop.f32.mrb[172].mxu0 }
 0x2dd   : > { %v1710_v23 = vadd.f32 %v1709_v63, %v5389_v48  ;;  %v2063_v24 = vadd.f32 %v2062_v37, %v5392_v58  ;;  %v1711_v44 = vpop.f32.mrb[173].mxu1  ;;  %v2064_v39 = vpop.f32.mrb[173].mxu0 }
 0x2de   : > { %v1712_v9 = vadd.f32 %v1711_v44, %v5395_v26  ;;  %v2065_v45 = vadd.f32 %v2064_v39, %v5400_v59  ;;  %v1713_v54 = vpop.f32.mrb[174].mxu1  ;;  %v2066_v55 = vpop.f32.mrb[174].mxu0 }
 0x2df   : > { %v1714_v16 = vadd.f32 %v1713_v54, %v5389_v48  ;;  %v2067_v15 = vadd.f32 %v2066_v55, %v5392_v58  ;;  %v1715_v52 = vpop.f32.mrb[175].mxu1  ;;  %v2068_v6 = vpop.f32.mrb[175].mxu0 }
 0x2e0   : > { %v4051_v47 = vpack.c.bf16 %v1712_v9, %v1710_v23  ;;  %v4052_v42 = vpack.c.bf16 %v2065_v45, %v2063_v24  ;;  %v1716_v46 = vadd.f32 %v1715_v52, %v5395_v26  ;;  %v2069_v50 = vadd.f32 %v2068_v6, %v5400_v59 }
 0x2e2   : > { %3426 = vst [vmem:[%s5142_s22 + $0x518] sm:$0xff] %v4051_v47  ;;  %3427 = vst [vmem:[%s5142_s22 + $0x520] sm:$0xff] %v4052_v42  ;;  %v4054_v51 = vpack.c.bf16 %v1716_v46, %v1714_v16  ;;  %v4055_v62 = vpack.c.bf16 %v2069_v50, %v2067_v15 }
 0x2e4   : > { %3429 = vst [vmem:[%s5142_s22 + $0x530] sm:$0xff] %v4054_v51  ;;  %3430 = vst [vmem:[%s5142_s22 + $0x538] sm:$0xff] %v4055_v62  ;;  %v1719_v10 = vpop.f32.mrb[176].mxu1  ;;  %v2072_v5 = vpop.f32.mrb[176].mxu0 }
 0x2e5   : > { %v1720_v12 = vadd.f32 %v1719_v10, %v5389_v48  ;;  %v2073_v1 = vadd.f32 %v2072_v5, %v5392_v58  ;;  %v1721_v25 = vpop.f32.mrb[177].mxu1  ;;  %v2074_v36 = vpop.f32.mrb[177].mxu0 }
 0x2e6   : > { %v1722_v57 = vadd.f32 %v1721_v25, %v5395_v26  ;;  %v2075_v7 = vadd.f32 %v2074_v36, %v5400_v59  ;;  %v1723_v3 = vpop.f32.mrb[178].mxu1  ;;  %v2076_v18 = vpop.f32.mrb[178].mxu0 }
 0x2e7   : > { %v1724_v61 = vadd.f32 %v1723_v3, %v5389_v48  ;;  %v2077_v38 = vadd.f32 %v2076_v18, %v5392_v58  ;;  %v1725_v19 = vpop.f32.mrb[179].mxu1  ;;  %v2078_v0 = vpop.f32.mrb[179].mxu0 }
 0x2e8   : > { %v4057_v2 = vpack.c.bf16 %v1722_v57, %v1720_v12  ;;  %v4058_v34 = vpack.c.bf16 %v2075_v7, %v2073_v1  ;;  %v1726_v40 = vadd.f32 %v1725_v19, %v5395_v26  ;;  %v2079_v8 = vadd.f32 %v2078_v0, %v5400_v59 }
 0x2ea   : > { %3432 = vst [vmem:[%s5142_s22 + $0x548] sm:$0xff] %v4057_v2  ;;  %3433 = vst [vmem:[%s5142_s22 + $0x550] sm:$0xff] %v4058_v34  ;;  %v4060_v11 = vpack.c.bf16 %v1726_v40, %v1724_v61  ;;  %v4061_v14 = vpack.c.bf16 %v2079_v8, %v2077_v38 }
 0x2ec   : > { %3435 = vst [vmem:[%s5142_s22 + $0x560] sm:$0xff] %v4060_v11  ;;  %3436 = vst [vmem:[%s5142_s22 + $0x568] sm:$0xff] %v4061_v14  ;;  %v1729_v30 = vpop.f32.mrb[180].mxu1  ;;  %v2082_v31 = vpop.f32.mrb[180].mxu0 }
 0x2ed   : > { %v1730_v13 = vadd.f32 %v1729_v30, %v5389_v48  ;;  %v2083_v32 = vadd.f32 %v2082_v31, %v5392_v58  ;;  %v1731_v17 = vpop.f32.mrb[181].mxu1  ;;  %v2084_v35 = vpop.f32.mrb[181].mxu0 }
 0x2ee   : > { %v1732_v33 = vadd.f32 %v1731_v17, %v5395_v26  ;;  %v2085_v21 = vadd.f32 %v2084_v35, %v5400_v59  ;;  %v1733_v27 = vpop.f32.mrb[182].mxu1  ;;  %v2086_v41 = vpop.f32.mrb[182].mxu0 }
 0x2ef   : > { %v1734_v28 = vadd.f32 %v1733_v27, %v5389_v48  ;;  %v2087_v20 = vadd.f32 %v2086_v41, %v5392_v58  ;;  %v1735_v56 = vpop.f32.mrb[183].mxu1  ;;  %v2088_v29 = vpop.f32.mrb[183].mxu0 }
 0x2f0   : > { %v4063_v49 = vpack.c.bf16 %v1732_v33, %v1730_v13  ;;  %v4064_v60 = vpack.c.bf16 %v2085_v21, %v2083_v32  ;;  %v1736_v43 = vadd.f32 %v1735_v56, %v5395_v26  ;;  %v2089_v22 = vadd.f32 %v2088_v29, %v5400_v59 }
 0x2f2   : > { %3438 = vst [vmem:[%s5142_s22 + $0x578] sm:$0xff] %v4063_v49  ;;  %3439 = vst [vmem:[%s5142_s22 + $0x580] sm:$0xff] %v4064_v60  ;;  %v4066_v4 = vpack.c.bf16 %v1736_v43, %v1734_v28  ;;  %v4067_v53 = vpack.c.bf16 %v2089_v22, %v2087_v20 }
 0x2f4   : > { %3441 = vst [vmem:[%s5142_s22 + $0x590] sm:$0xff] %v4066_v4  ;;  %3442 = vst [vmem:[%s5142_s22 + $0x598] sm:$0xff] %v4067_v53  ;;  %v1739_v63 = vpop.f32.mrb[184].mxu1  ;;  %v2092_v37 = vpop.f32.mrb[184].mxu0 }
 0x2f5   : > { %v1740_v23 = vadd.f32 %v1739_v63, %v5389_v48  ;;  %v2093_v24 = vadd.f32 %v2092_v37, %v5392_v58  ;;  %v1741_v44 = vpop.f32.mrb[185].mxu1  ;;  %v2094_v39 = vpop.f32.mrb[185].mxu0 }
 0x2f6   : > { %v1742_v9 = vadd.f32 %v1741_v44, %v5395_v26  ;;  %v2095_v45 = vadd.f32 %v2094_v39, %v5400_v59  ;;  %v1743_v54 = vpop.f32.mrb[186].mxu1  ;;  %v2096_v55 = vpop.f32.mrb[186].mxu0 }
 0x2f7   : > { %v1744_v16 = vadd.f32 %v1743_v54, %v5389_v48  ;;  %v2097_v15 = vadd.f32 %v2096_v55, %v5392_v58  ;;  %v1745_v52 = vpop.f32.mrb[187].mxu1  ;;  %v2098_v6 = vpop.f32.mrb[187].mxu0 }
 0x2f8   : > { %v4069_v47 = vpack.c.bf16 %v1742_v9, %v1740_v23  ;;  %v4070_v42 = vpack.c.bf16 %v2095_v45, %v2093_v24  ;;  %v1746_v46 = vadd.f32 %v1745_v52, %v5395_v26  ;;  %v2099_v50 = vadd.f32 %v2098_v6, %v5400_v59 }
 0x2fa   : > { %3444 = vst [vmem:[%s5142_s22 + $0x5a8] sm:$0xff] %v4069_v47  ;;  %3445 = vst [vmem:[%s5142_s22 + $0x5b0] sm:$0xff] %v4070_v42  ;;  %v4072_v51 = vpack.c.bf16 %v1746_v46, %v1744_v16  ;;  %v4073_v62 = vpack.c.bf16 %v2099_v50, %v2097_v15 }
 0x2fc   : > { %3447 = vst [vmem:[%s5142_s22 + $0x5c0] sm:$0xff] %v4072_v51  ;;  %3448 = vst [vmem:[%s5142_s22 + $0x5c8] sm:$0xff] %v4073_v62  ;;  %v1749_v10 = vpop.f32.mrb[188].mxu1  ;;  %v2102_v5 = vpop.f32.mrb[188].mxu0 }
 0x2fd   : > { %v1750_v12 = vadd.f32 %v1749_v10, %v5389_v48  ;;  %v2103_v1 = vadd.f32 %v2102_v5, %v5392_v58  ;;  %v1751_v25 = vpop.f32.mrb[189].mxu1  ;;  %v2104_v36 = vpop.f32.mrb[189].mxu0 }
 0x2fe   : > { %v1752_v57 = vadd.f32 %v1751_v25, %v5395_v26  ;;  %v2105_v7 = vadd.f32 %v2104_v36, %v5400_v59  ;;  %v1753_v3 = vpop.f32.mrb[190].mxu1  ;;  %v2106_v18 = vpop.f32.mrb[190].mxu0 }
 0x2ff   : > { %v1754_v61 = vadd.f32 %v1753_v3, %v5389_v48  ;;  %v2107_v38 = vadd.f32 %v2106_v18, %v5392_v58  ;;  %v1755_v19 = vpop.f32.mrb[191].mxu1  ;;  %v2108_v0 = vpop.f32.mrb[191].mxu0 }
 0x300   : > { %v4075_v2 = vpack.c.bf16 %v1752_v57, %v1750_v12  ;;  %v4076_v34 = vpack.c.bf16 %v2105_v7, %v2103_v1  ;;  %v1756_v40 = vadd.f32 %v1755_v19, %v5395_v26  ;;  %v2109_v8 = vadd.f32 %v2108_v0, %v5400_v59 }
 0x302   : > { %3450 = vst [vmem:[%s5142_s22 + $0x5d8] sm:$0xff] %v4075_v2  ;;  %3451 = vst [vmem:[%s5142_s22 + $0x5e0] sm:$0xff] %v4076_v34  ;;  %v4078_v48 = vpack.c.bf16 %v1756_v40, %v1754_v61  ;;  %v4079_v58 = vpack.c.bf16 %v2109_v8, %v2107_v38 }
 0x304   : > { %3453 = vst [vmem:[%s5142_s22 + $0x5f0] sm:$0xff] %v4078_v48  ;;  %3454 = vst [vmem:[%s5142_s22 + $0x5f8] sm:$0xff] %v4079_v58 }
 0x305   : > { %4446 = shalt.err (!%p4443_p11)
}
 0x306   : > { %s4447_s9 = scalar_lea.hbm %s5809_s8, 24576  ;;  %s4451_s29 = scalar_lea.hbm %s5867_s3, 49152 }
 0x307   : > { %p4448_p0 = scmp.ne.s32.totalorder %s5809_s8, %s4447_s9  ;;  %p4452_p6 = scmp.lt.u32.totalorder %s5809_s8, %s5867_s3 }
 0x308   : > { %p4453_p7 = scmp.lt.u32.totalorder %s4451_s29, %s4447_s9  ;;  %p4455_p8 = scmp.lt.u32.totalorder %s4447_s9, %s5809_s8 }
 0x309   : > { %p4449_p4 = pnand %p4448_p0, %p5922_p12 }
 0x30a   : > { %p4454_p2 = por %p4453_p7, %p4452_p6 }
 0x30b   : > { %p4450_p13 = pneg %p4449_p4 }
 0x30c   : > { %p4456_p1 = por %p4455_p8, %p4454_p2 }
 0x30e   : > { %p4457_p10 = pnand %p4456_p1, %p4450_p13 }
 0x310   : > { %4460 = shalt.err (!%p4457_p10)
}
 0x311   : > { %s4529_s22 = smov 384   ;;  %s4530_s24 = smov 24  }
 0x312   : > { %4124 = dma.vmem_to_hbm [thread:$0]  (%p5922_p12), %s5811_s6, 24576, %s5809_s8, %s3456_s26, %s4529_s22, %s4529_s22, %s4530_s24  }
 0x313 PF: > { %s3487_s15 = sand.u32 1, %s4499_s12   ;;  %p5923_p3 = scmp.ne.s32.totalorder %s5895_s23, 0 }
 0x314   : > { %p5924_p5 = scmp.ge.s32.totalorder %s4519_s17, 2  ;;  %s3488_s7 = scalar_lea.sflag [#allocation4], %s3487_s15 }
 0x316   : > { %p4138_p9 = pnand %p5924_p5, %p5923_p3 }
 0x318   : > { %4494 = dma.done.wait (!%p4138_p9), %s3488_s7, 24576  }
 0x319   : > { %4496 = vsyncadd (!%p4138_p9), %s3488_s7, 4294942720  ;;  %s20_s17 = sadd.s32 1, %s4519_s17   ;;  %s5925_s12 = smov %s4503_s13 }
 0x31a   : > { %p17_p11 = scmp.ge.s32.totalorder %s20_s17, 4   ;;  %s5926_s13 = smov %s4507_s14 }
 0x31b   : > { %s5927_s14 = smov %s4693_s30  ;;  %s5928_s15 = smov %s4515_s16 }
 0x31c   : > { %s5929_s16 = smov %s5931_s11  ;;  %19 = sbr.rel (!%p17_p11) target bundleno = 7 (0x7), region = 87 }
 0x323   :  { %3493 = vsyncpa [#allocation3], 1 }
 0x324   :  { %3495 = vsyncpa [#allocation3 + $0x1], 1 }
 0x325   :  { %3496 = vsyncpa [#allocation6], 1 }
 0x326   :  { %3497 = vsyncpa [#allocation4], 1 }
 0x327   :  { %3499 = vsyncpa [#allocation4 + $0x1], 1 }

</bundles_post_ra>
